<compile_context>
chip_gen: v6e
topology: v6e:2x2x1
jax: 0.10.0
libtpu: 0.0.40
codegen_flags: <defaults>
</compile_context>

<pallas_src>
import jax
import jax.numpy as jnp
from jax.experimental import pallas as pl
from jax.experimental.pallas import tpu as pltpu


# ------------------------------ helpers ----------------------------------- #

def _gelu(x):
    # matches the module's gelu: sigmoid(1.702 * x) * x   (kept in f32)
    return jax.nn.sigmoid(1.702 * x) * x


def _prep_params(params):
    """Transform PyTorch-layout weights into the fused, bf16 kernel matrices."""
    f32, bf16 = jnp.float32, jnp.bfloat16
    w1 = params["conv1_w"].astype(f32)[:, 0]   # (10, 5, 5)   [o, kh, kw]
    b1 = params["conv1_b"].astype(f32)         # (10,)
    w2 = params["conv2_w"].astype(f32)         # (20, 10, 5, 5) [c, o, kh, kw]
    b2 = params["conv2_b"].astype(f32)         # (20,)
    fc1_w = params["fc1_w"].astype(f32)        # (50, 320)
    fc1_b = params["fc1_b"].astype(f32)        # (50,)
    fc2_w = params["fc2_w"].astype(f32)        # (10, 50)
    fc2_b = params["fc2_b"].astype(f32)        # (10,)

    # ---- conv1 banded weights, even/odd output columns fused along N ----
    # lane layout of a conv1 activation row: pj*10 + o  (pj = pooled W pos)
    w_idx = jnp.arange(28)
    pj_idx = jnp.arange(12)

    def band1(parity):
        dj = w_idx[:, None] - (2 * pj_idx[None, :] + parity)       # (28, 12)
        valid = (dj >= 0) & (dj < 5)
        vals = w1[:, :, jnp.clip(dj, 0, 4)]                        # (10,5,28,12)
        vals = jnp.where(valid[None, None], vals, 0.0)
        return vals.transpose(1, 2, 3, 0).reshape(5, 28, 120)      # [kh, w, pj*10+o]

    w1f = jnp.zeros((5, 28, 256), f32)
    w1f = w1f.at[:, :, 0:120].set(band1(0))        # even cols -> lanes   0..119
    w1f = w1f.at[:, :, 128:248].set(band1(1))      # odd  cols -> lanes 128..247
    b1row = jnp.zeros((1, 128), f32).at[0, :120].set(jnp.tile(b1, 12))

    # ---- conv2 banded weights, even/odd fused along N ----
    # input lane pj*10+o, output lane q*20 + c  (q = pooled W pos of layer 2)
    pj2 = jnp.arange(12)
    q_idx = jnp.arange(4)

    def band2(parity):
        dj = pj2[:, None] - (2 * q_idx[None, :] + parity)          # (12, 4)
        valid = (dj >= 0) & (dj < 5)
        vals = w2[:, :, :, jnp.clip(dj, 0, 4)]                     # (20,10,5,12,4)
        vals = jnp.where(valid[None, None, None], vals, 0.0)
        return vals.transpose(2, 3, 1, 4, 0).reshape(5, 120, 80)   # [kh, pj*10+o, q*20+c]

    w2f = jnp.zeros((5, 128, 256), f32)
    w2f = w2f.at[:, 0:120, 0:80].set(band2(0))     # even -> lanes   0..79
    w2f = w2f.at[:, 0:120, 128:208].set(band2(1))  # odd  -> lanes 128..207
    b2row = jnp.zeros((1, 128), f32).at[0, :80].set(jnp.tile(b2, 4))

    # ---- fc1: feat lane = p*128 + q*20 + c  maps to torch flat c*16 + p*4 + q
    p_i = jnp.arange(4)[:, None, None]     # pooled H
    q_i = jnp.arange(4)[None, :, None]     # pooled W
    c_i = jnp.arange(20)[None, None, :]    # channel
    feat_rows = (p_i * 128 + q_i * 20 + c_i).reshape(-1)   # (320,) rows into 512
    torch_cols = (c_i * 16 + p_i * 4 + q_i).reshape(-1)    # (320,) torch flat idx
    wf1 = jnp.zeros((512, 128), f32).at[feat_rows, :50].set(fc1_w[:, torch_cols].T)
    bf1 = jnp.zeros((1, 128), f32).at[0, :50].set(fc1_b)

    wf2 = jnp.zeros((128, 128), f32).at[:50, :10].set(fc2_w.T)
    bf2 = jnp.zeros((1, 128), f32).at[0, :10].set(fc2_b)

    return dict(w1=w1f.astype(bf16), b1=b1row,          # biases stay f32
                w2=w2f.astype(bf16), b2=b2row,
                wf1=wf1.astype(bf16), bf1=bf1,
                wf2=wf2.astype(bf16), bf2=bf2)


def _make_selectors(tb):
    """Host-precomputed 0/1 row-selection matrices (bf16-exact)."""
    bf16 = jnp.bfloat16
    # layer 1: pick even conv rows (2*s) per image from the pairwise-max'ed
    # (tb*24 - 1, 128) activation; 16 output rows/image, rows 12..15 are zero.
    r1 = jnp.arange(tb * 16)
    col1 = (r1 // 16) * 24 + 2 * (r1 % 16)
    valid1 = (r1 % 16) < 12
    sel1 = ((jnp.arange(tb * 24 - 1)[None, :] == col1[:, None]) & valid1[:, None])

    # layer 2: one matmul does pool+gather; output row p*tb + b picks conv2
    # row b*8 + 2*p from the pairwise-max'ed (tb*8 - 1, 128) activation.
    r2 = jnp.arange(tb * 4)
    col2 = (r2 % tb) * 8 + 2 * (r2 // tb)
    sel2 = (jnp.arange(tb * 8 - 1)[None, :] == col2[:, None])
    return sel1.astype(bf16), sel2.astype(bf16)


# ------------------------------ kernel ------------------------------------- #

def make_convnet_kernel(tb):
    H1 = 24    # conv1 output rows per image
    R1 = 16    # rows/image of the pooled 12x12 map (padded to 16, 8-aligned)
    H2 = 8     # conv2 output rows per image

    def kernel(x_ref, w1_ref, b1_ref, w2_ref, b2_ref, sel1_ref, sel2_ref,
               wf1_ref, bf1_ref, wf2_ref, bf2_ref, out_ref):
        f32, bf16 = jnp.float32, jnp.bfloat16
        x = x_ref[...]                                            # (tb, 28, 28) f32

        # -------- layer 1: conv1 (banded, even/odd cols fused along N) ------
        acc1 = jnp.zeros((tb * H1, 256), f32)
        for di in range(5):
            rows = x[:, di:di + H1, :].reshape(tb * H1, 28).astype(bf16)
            acc1 = acc1 + jnp.dot(rows, w1_ref[di], preferred_element_type=f32)
        # W-pool = max of even/odd lane halves (128-aligned split), then bias.
        wp1 = jnp.maximum(acc1[:, :128], acc1[:, 128:]) + b1_ref[...]   # (tb*24,128)

        # H-pool: pairwise adjacent-row max (shifted-slice == roll+max), then a
        # single precomputed 0/1 selection matmul picking even rows per image.
        m1 = jnp.maximum(wp1[:-1, :], wp1[1:, :])                       # (tb*24-1,128)
        a1 = _gelu(jnp.dot(sel1_ref[...], m1.astype(bf16),
                           preferred_element_type=f32))                 # (tb*16, 128)

        # -------- layer 2: conv2 (banded, even/odd cols fused along N) ------
        a1_3d = a1.reshape(tb, R1, 128)
        acc2 = jnp.zeros((tb * H2, 256), f32)
        for di in range(5):
            rows2 = a1_3d[:, di:di + H2, :].reshape(tb * H2, 128).astype(bf16)
            acc2 = acc2 + jnp.dot(rows2, w2_ref[di], preferred_element_type=f32)
        wp2 = jnp.maximum(acc2[:, :128], acc2[:, 128:]) + b2_ref[...]   # (tb*8, 128)

        # H-pool + flatten: pairwise row max, ONE selection matmul, then a
        # 128-aligned lane concat of the 4 pooled-H blocks -> (tb, 512) feature.
        m2 = jnp.maximum(wp2[:-1, :], wp2[1:, :])                       # (tb*8-1,128)
        R = jnp.dot(sel2_ref[...], m2.astype(bf16),
                    preferred_element_type=f32)                         # (tb*4, 128)
        feat = _gelu(jnp.concatenate(
            [R[p * tb:(p + 1) * tb, :] for p in range(4)], axis=1))     # (tb, 512)

        # -------- fc1 + gelu + fc2 (128-lane padded, lane-dense store) ------
        h = _gelu(jnp.dot(feat.astype(bf16), wf1_ref[...],
                          preferred_element_type=f32) + bf1_ref[...])   # (tb, 128)
        out = jnp.dot(h.astype(bf16), wf2_ref[...],
                      preferred_element_type=f32) + bf2_ref[...]
        out_ref[...] = out.astype(out_ref.dtype)

    return kernel


# ------------------------------ wrapper ------------------------------------ #

def _const_spec(shape):
    zeros = (0,) * len(shape)
    return pl.BlockSpec(shape, lambda i, _z=zeros: _z)


def convnet_forward(x_nchw, params):
    """x_nchw: (B, 1, 28, 28) float32 -> logits (B, 10)."""
    B = x_nchw.shape[0]
    x = x_nchw.reshape(B, 28, 28).astype(jnp.float32)   # drop C=1

    # Batch tiling: pad B to a multiple of 8; pick tb <= 32 (selection matmuls
    # are O(tb^2)) while keeping the grid >= 2 steps when the batch allows it.
    b_pad = ((B + 7) // 8) * 8
    if b_pad >= 64 and b_pad % 32 == 0:
        tb = 32
    elif b_pad >= 32 and b_pad % 16 == 0:
        tb = 16
    else:
        tb = 8
    if b_pad != B:
        x = jnp.pad(x, ((0, b_pad - B), (0, 0), (0, 0)))

    w = _prep_params(params)
    sel1, sel2 = _make_selectors(tb)
    grid = (b_pad // tb,)

    out = pl.pallas_call(
        make_convnet_kernel(tb),
        out_shape=jax.ShapeDtypeStruct((b_pad, 128), jnp.float32),
        grid_spec=pltpu.PrefetchScalarGridSpec(
            num_scalar_prefetch=0,
            grid=grid,
            in_specs=[
                pl.BlockSpec((tb, 28, 28), lambda i: (i, 0, 0)),  # x (per-step DMA)
                _const_spec((5, 28, 256)),            # conv1 banded (even|odd), bf16
                _const_spec((1, 128)),                # conv1 bias, f32
                _const_spec((5, 128, 256)),           # conv2 banded (even|odd), bf16
                _const_spec((1, 128)),                # conv2 bias, f32
                _const_spec((tb * 16, tb * 24 - 1)),  # layer-1 H-pool selection, bf16
                _const_spec((tb * 4, tb * 8 - 1)),    # layer-2 pool+flatten selection, bf16
                _const_spec((512, 128)),              # fc1 (permuted + padded), bf16
                _const_spec((1, 128)),                # fc1 bias, f32
                _const_spec((128, 128)),              # fc2 (padded), bf16
                _const_spec((1, 128)),                # fc2 bias, f32
            ],
            out_specs=pl.BlockSpec((tb, 128), lambda i: (i, 0)),
        ),
        compiler_params=pltpu.CompilerParams(
            dimension_semantics=("parallel",)),
    )(x, w["w1"], w["b1"], w["w2"], w["b2"], sel1, sel2,
      w["wf1"], w["bf1"], w["wf2"], w["bf2"])

    return out[:B, :10]


# ------------------------------ params ------------------------------------- #

def init_params(key):
    ks = jax.random.split(key, 8)

    def u(k, shape, fan_in):
        bound = 1.0 / jnp.sqrt(fan_in)
        return jax.random.uniform(k, shape, jnp.float32, -bound, bound)

    return {
        "conv1_w": u(ks[0], (10, 1, 5, 5), 1 * 5 * 5),
        "conv1_b": u(ks[1], (10,), 1 * 5 * 5),
        "conv2_w": u(ks[2], (20, 10, 5, 5), 10 * 5 * 5),
        "conv2_b": u(ks[3], (20,), 10 * 5 * 5),
        "fc1_w":   u(ks[4], (50, 320), 320),
        "fc1_b":   u(ks[5], (50,), 320),
        "fc2_w":   u(ks[6], (10, 50), 50),
        "fc2_b":   u(ks[7], (10,), 50),
    }


if __name__ == "__main__":
    key = jax.random.PRNGKey(0)
    pkey, xkey = jax.random.split(key)
    params = init_params(pkey)
    # 28x28 input is what the forward implies (320 = 20 * 4 * 4 after two conv+pool).
    x = jax.random.normal(xkey, (2, 1, 28, 28), dtype=jnp.float32)

    logits = jax.jit(convnet_forward)(x, params)
    jax.block_until_ready(logits)
    assert logits.shape == (2, 10)
    assert bool(jnp.all(jnp.isfinite(logits)))
    print("KERNEL_OK")
</pallas_src>

<mosaic_0001>
module attributes {stable_mosaic.version = 11 : i64} {
  func.func @kernel(%arg0: i32, %arg1: memref<8x28x28xf32, #tpu.memory_space<vmem>>, %arg2: memref<5x28x256xbf16, #tpu.memory_space<vmem>>, %arg3: memref<1x128xf32, #tpu.memory_space<vmem>>, %arg4: memref<5x128x256xbf16, #tpu.memory_space<vmem>>, %arg5: memref<1x128xf32, #tpu.memory_space<vmem>>, %arg6: memref<128x191xbf16, #tpu.memory_space<vmem>>, %arg7: memref<32x63xbf16, #tpu.memory_space<vmem>>, %arg8: memref<512x128xbf16, #tpu.memory_space<vmem>>, %arg9: memref<1x128xf32, #tpu.memory_space<vmem>>, %arg10: memref<128x128xbf16, #tpu.memory_space<vmem>>, %arg11: memref<1x128xf32, #tpu.memory_space<vmem>>, %arg12: memref<8x128xf32, #tpu.memory_space<vmem>>) attributes {dimension_semantics = [#tpu.dimension_semantics<parallel>], iteration_bounds = array<i64: 1>, scalar_prefetch = 0 : i64, scratch_operands = 0 : i64, tpu.core_type = #tpu.core_type<tc>, window_params = [{transform_indices = @transform_0, window_bounds = array<i64: 8, 28, 28>}, {pipeline_mode = #tpu.pipeline_mode<synchronous>, transform_indices = @transform_1, window_bounds = array<i64: 5, 28, 256>}, {pipeline_mode = #tpu.pipeline_mode<synchronous>, transform_indices = @transform_2, window_bounds = array<i64: 1, 128>}, {pipeline_mode = #tpu.pipeline_mode<synchronous>, transform_indices = @transform_3, window_bounds = array<i64: 5, 128, 256>}, {pipeline_mode = #tpu.pipeline_mode<synchronous>, transform_indices = @transform_4, window_bounds = array<i64: 1, 128>}, {pipeline_mode = #tpu.pipeline_mode<synchronous>, transform_indices = @transform_5, window_bounds = array<i64: 128, 191>}, {pipeline_mode = #tpu.pipeline_mode<synchronous>, transform_indices = @transform_6, window_bounds = array<i64: 32, 63>}, {pipeline_mode = #tpu.pipeline_mode<synchronous>, transform_indices = @transform_7, window_bounds = array<i64: 512, 128>}, {pipeline_mode = #tpu.pipeline_mode<synchronous>, transform_indices = @transform_8, window_bounds = array<i64: 1, 128>}, {pipeline_mode = #tpu.pipeline_mode<synchronous>, transform_indices = @transform_9, window_bounds = array<i64: 128, 128>}, {pipeline_mode = #tpu.pipeline_mode<synchronous>, transform_indices = @transform_10, window_bounds = array<i64: 1, 128>}, {transform_indices = @transform_11, window_bounds = array<i64: 8, 128>}]} {
    %c0 = arith.constant 0 : index
    %c0_0 = arith.constant 0 : index
    %c0_1 = arith.constant 0 : index
    %0 = vector.load %arg1[%c0, %c0_0, %c0_1] : memref<8x28x28xf32, #tpu.memory_space<vmem>>, vector<8x28x28xf32>
    %cst = arith.constant 0.000000e+00 : f32
    %1 = vector.broadcast %cst : f32 to vector<192x256xf32>
    %2 = vector.extract_strided_slice %0 {offsets = [0, 0, 0], sizes = [8, 24, 28], strides = [1, 1, 1]} : vector<8x28x28xf32> to vector<8x24x28xf32>
    %3 = vector.shape_cast %2 : vector<8x24x28xf32> to vector<192x28xf32>
    %4 = arith.truncf %3 : vector<192x28xf32> to vector<192x28xbf16>
    %c0_2 = arith.constant 0 : index
    %c0_3 = arith.constant 0 : index
    %c0_4 = arith.constant 0 : index
    %5 = vector.load %arg2[%c0_2, %c0_3, %c0_4] : memref<5x28x256xbf16, #tpu.memory_space<vmem>>, vector<1x28x256xbf16>
    %6 = vector.shape_cast %5 : vector<1x28x256xbf16> to vector<28x256xbf16>
    %cst_5 = arith.constant dense<0.000000e+00> : vector<192x256xf32>
    %7 = tpu.matmul %4, %6, %cst_5 {dimension_numbers = #tpu.dot_dimension_numbers<[1], [0], [0], [1], [0, 0, 1, 1], [], []>} : vector<192x28xbf16>, vector<28x256xbf16>, vector<192x256xf32> -> vector<192x256xf32>
    %8 = arith.addf %1, %7 : vector<192x256xf32>
    %9 = vector.extract_strided_slice %0 {offsets = [0, 1, 0], sizes = [8, 24, 28], strides = [1, 1, 1]} : vector<8x28x28xf32> to vector<8x24x28xf32>
    %10 = vector.shape_cast %9 : vector<8x24x28xf32> to vector<192x28xf32>
    %11 = arith.truncf %10 : vector<192x28xf32> to vector<192x28xbf16>
    %c1 = arith.constant 1 : index
    %c0_6 = arith.constant 0 : index
    %c0_7 = arith.constant 0 : index
    %12 = vector.load %arg2[%c1, %c0_6, %c0_7] : memref<5x28x256xbf16, #tpu.memory_space<vmem>>, vector<1x28x256xbf16>
    %13 = vector.shape_cast %12 : vector<1x28x256xbf16> to vector<28x256xbf16>
    %cst_8 = arith.constant dense<0.000000e+00> : vector<192x256xf32>
    %14 = tpu.matmul %11, %13, %cst_8 {dimension_numbers = #tpu.dot_dimension_numbers<[1], [0], [0], [1], [0, 0, 1, 1], [], []>} : vector<192x28xbf16>, vector<28x256xbf16>, vector<192x256xf32> -> vector<192x256xf32>
    %15 = arith.addf %8, %14 : vector<192x256xf32>
    %16 = vector.extract_strided_slice %0 {offsets = [0, 2, 0], sizes = [8, 24, 28], strides = [1, 1, 1]} : vector<8x28x28xf32> to vector<8x24x28xf32>
    %17 = vector.shape_cast %16 : vector<8x24x28xf32> to vector<192x28xf32>
    %18 = arith.truncf %17 : vector<192x28xf32> to vector<192x28xbf16>
    %c2 = arith.constant 2 : index
    %c0_9 = arith.constant 0 : index
    %c0_10 = arith.constant 0 : index
    %19 = vector.load %arg2[%c2, %c0_9, %c0_10] : memref<5x28x256xbf16, #tpu.memory_space<vmem>>, vector<1x28x256xbf16>
    %20 = vector.shape_cast %19 : vector<1x28x256xbf16> to vector<28x256xbf16>
    %cst_11 = arith.constant dense<0.000000e+00> : vector<192x256xf32>
    %21 = tpu.matmul %18, %20, %cst_11 {dimension_numbers = #tpu.dot_dimension_numbers<[1], [0], [0], [1], [0, 0, 1, 1], [], []>} : vector<192x28xbf16>, vector<28x256xbf16>, vector<192x256xf32> -> vector<192x256xf32>
    %22 = arith.addf %15, %21 : vector<192x256xf32>
    %23 = vector.extract_strided_slice %0 {offsets = [0, 3, 0], sizes = [8, 24, 28], strides = [1, 1, 1]} : vector<8x28x28xf32> to vector<8x24x28xf32>
    %24 = vector.shape_cast %23 : vector<8x24x28xf32> to vector<192x28xf32>
    %25 = arith.truncf %24 : vector<192x28xf32> to vector<192x28xbf16>
    %c3 = arith.constant 3 : index
    %c0_12 = arith.constant 0 : index
    %c0_13 = arith.constant 0 : index
    %26 = vector.load %arg2[%c3, %c0_12, %c0_13] : memref<5x28x256xbf16, #tpu.memory_space<vmem>>, vector<1x28x256xbf16>
    %27 = vector.shape_cast %26 : vector<1x28x256xbf16> to vector<28x256xbf16>
    %cst_14 = arith.constant dense<0.000000e+00> : vector<192x256xf32>
    %28 = tpu.matmul %25, %27, %cst_14 {dimension_numbers = #tpu.dot_dimension_numbers<[1], [0], [0], [1], [0, 0, 1, 1], [], []>} : vector<192x28xbf16>, vector<28x256xbf16>, vector<192x256xf32> -> vector<192x256xf32>
    %29 = arith.addf %22, %28 : vector<192x256xf32>
    %30 = vector.extract_strided_slice %0 {offsets = [0, 4, 0], sizes = [8, 24, 28], strides = [1, 1, 1]} : vector<8x28x28xf32> to vector<8x24x28xf32>
    %31 = vector.shape_cast %30 : vector<8x24x28xf32> to vector<192x28xf32>
    %32 = arith.truncf %31 : vector<192x28xf32> to vector<192x28xbf16>
    %c4 = arith.constant 4 : index
    %c0_15 = arith.constant 0 : index
    %c0_16 = arith.constant 0 : index
    %33 = vector.load %arg2[%c4, %c0_15, %c0_16] : memref<5x28x256xbf16, #tpu.memory_space<vmem>>, vector<1x28x256xbf16>
    %34 = vector.shape_cast %33 : vector<1x28x256xbf16> to vector<28x256xbf16>
    %cst_17 = arith.constant dense<0.000000e+00> : vector<192x256xf32>
    %35 = tpu.matmul %32, %34, %cst_17 {dimension_numbers = #tpu.dot_dimension_numbers<[1], [0], [0], [1], [0, 0, 1, 1], [], []>} : vector<192x28xbf16>, vector<28x256xbf16>, vector<192x256xf32> -> vector<192x256xf32>
    %36 = arith.addf %29, %35 : vector<192x256xf32>
    %37 = vector.extract_strided_slice %36 {offsets = [0, 0], sizes = [192, 128], strides = [1, 1]} : vector<192x256xf32> to vector<192x128xf32>
    %38 = vector.extract_strided_slice %36 {offsets = [0, 128], sizes = [192, 128], strides = [1, 1]} : vector<192x256xf32> to vector<192x128xf32>
    %39 = arith.maximumf %37, %38 : vector<192x128xf32>
    %c0_18 = arith.constant 0 : index
    %c0_19 = arith.constant 0 : index
    %40 = vector.load %arg3[%c0_18, %c0_19] : memref<1x128xf32, #tpu.memory_space<vmem>>, vector<1x128xf32>
    %41 = vector.broadcast %40 : vector<1x128xf32> to vector<192x128xf32>
    %42 = arith.addf %39, %41 : vector<192x128xf32>
    %43 = vector.extract_strided_slice %42 {offsets = [0, 0], sizes = [191, 128], strides = [1, 1]} : vector<192x128xf32> to vector<191x128xf32>
    %44 = vector.extract_strided_slice %42 {offsets = [1, 0], sizes = [191, 128], strides = [1, 1]} : vector<192x128xf32> to vector<191x128xf32>
    %45 = arith.maximumf %43, %44 : vector<191x128xf32>
    %c0_20 = arith.constant 0 : index
    %c0_21 = arith.constant 0 : index
    %46 = vector.load %arg6[%c0_20, %c0_21] : memref<128x191xbf16, #tpu.memory_space<vmem>>, vector<128x191xbf16>
    %47 = arith.truncf %45 : vector<191x128xf32> to vector<191x128xbf16>
    %cst_22 = arith.constant dense<0.000000e+00> : vector<128x128xf32>
    %48 = tpu.matmul %46, %47, %cst_22 {dimension_numbers = #tpu.dot_dimension_numbers<[1], [0], [0], [1], [0, 0, 1, 1], [], []>} : vector<128x191xbf16>, vector<191x128xbf16>, vector<128x128xf32> -> vector<128x128xf32>
    %cst_23 = arith.constant 1.702000e+00 : f32
    %49 = vector.broadcast %cst_23 : f32 to vector<128x128xf32>
    %50 = arith.mulf %49, %48 : vector<128x128xf32>
    %51 = arith.negf %50 : vector<128x128xf32>
    %52 = math.exp %51 : vector<128x128xf32>
    %cst_24 = arith.constant 1.000000e+00 : f32
    %53 = vector.broadcast %cst_24 : f32 to vector<128x128xf32>
    %54 = arith.addf %53, %52 : vector<128x128xf32>
    %55 = arith.divf %53, %54 : vector<128x128xf32>
    %56 = arith.mulf %55, %48 : vector<128x128xf32>
    %57 = vector.shape_cast %56 : vector<128x128xf32> to vector<8x16x128xf32>
    %cst_25 = arith.constant 0.000000e+00 : f32
    %58 = vector.broadcast %cst_25 : f32 to vector<64x256xf32>
    %59 = vector.extract_strided_slice %57 {offsets = [0, 0, 0], sizes = [8, 8, 128], strides = [1, 1, 1]} : vector<8x16x128xf32> to vector<8x8x128xf32>
    %60 = vector.shape_cast %59 : vector<8x8x128xf32> to vector<64x128xf32>
    %61 = arith.truncf %60 : vector<64x128xf32> to vector<64x128xbf16>
    %c0_26 = arith.constant 0 : index
    %c0_27 = arith.constant 0 : index
    %c0_28 = arith.constant 0 : index
    %62 = vector.load %arg4[%c0_26, %c0_27, %c0_28] : memref<5x128x256xbf16, #tpu.memory_space<vmem>>, vector<1x128x256xbf16>
    %63 = vector.shape_cast %62 : vector<1x128x256xbf16> to vector<128x256xbf16>
    %cst_29 = arith.constant dense<0.000000e+00> : vector<64x256xf32>
    %64 = tpu.matmul %61, %63, %cst_29 {dimension_numbers = #tpu.dot_dimension_numbers<[1], [0], [0], [1], [0, 0, 1, 1], [], []>} : vector<64x128xbf16>, vector<128x256xbf16>, vector<64x256xf32> -> vector<64x256xf32>
    %65 = arith.addf %58, %64 : vector<64x256xf32>
    %66 = vector.extract_strided_slice %57 {offsets = [0, 1, 0], sizes = [8, 8, 128], strides = [1, 1, 1]} : vector<8x16x128xf32> to vector<8x8x128xf32>
    %67 = vector.shape_cast %66 : vector<8x8x128xf32> to vector<64x128xf32>
    %68 = arith.truncf %67 : vector<64x128xf32> to vector<64x128xbf16>
    %c1_30 = arith.constant 1 : index
    %c0_31 = arith.constant 0 : index
    %c0_32 = arith.constant 0 : index
    %69 = vector.load %arg4[%c1_30, %c0_31, %c0_32] : memref<5x128x256xbf16, #tpu.memory_space<vmem>>, vector<1x128x256xbf16>
    %70 = vector.shape_cast %69 : vector<1x128x256xbf16> to vector<128x256xbf16>
    %cst_33 = arith.constant dense<0.000000e+00> : vector<64x256xf32>
    %71 = tpu.matmul %68, %70, %cst_33 {dimension_numbers = #tpu.dot_dimension_numbers<[1], [0], [0], [1], [0, 0, 1, 1], [], []>} : vector<64x128xbf16>, vector<128x256xbf16>, vector<64x256xf32> -> vector<64x256xf32>
    %72 = arith.addf %65, %71 : vector<64x256xf32>
    %73 = vector.extract_strided_slice %57 {offsets = [0, 2, 0], sizes = [8, 8, 128], strides = [1, 1, 1]} : vector<8x16x128xf32> to vector<8x8x128xf32>
    %74 = vector.shape_cast %73 : vector<8x8x128xf32> to vector<64x128xf32>
    %75 = arith.truncf %74 : vector<64x128xf32> to vector<64x128xbf16>
    %c2_34 = arith.constant 2 : index
    %c0_35 = arith.constant 0 : index
    %c0_36 = arith.constant 0 : index
    %76 = vector.load %arg4[%c2_34, %c0_35, %c0_36] : memref<5x128x256xbf16, #tpu.memory_space<vmem>>, vector<1x128x256xbf16>
    %77 = vector.shape_cast %76 : vector<1x128x256xbf16> to vector<128x256xbf16>
    %cst_37 = arith.constant dense<0.000000e+00> : vector<64x256xf32>
    %78 = tpu.matmul %75, %77, %cst_37 {dimension_numbers = #tpu.dot_dimension_numbers<[1], [0], [0], [1], [0, 0, 1, 1], [], []>} : vector<64x128xbf16>, vector<128x256xbf16>, vector<64x256xf32> -> vector<64x256xf32>
    %79 = arith.addf %72, %78 : vector<64x256xf32>
    %80 = vector.extract_strided_slice %57 {offsets = [0, 3, 0], sizes = [8, 8, 128], strides = [1, 1, 1]} : vector<8x16x128xf32> to vector<8x8x128xf32>
    %81 = vector.shape_cast %80 : vector<8x8x128xf32> to vector<64x128xf32>
    %82 = arith.truncf %81 : vector<64x128xf32> to vector<64x128xbf16>
    %c3_38 = arith.constant 3 : index
    %c0_39 = arith.constant 0 : index
    %c0_40 = arith.constant 0 : index
    %83 = vector.load %arg4[%c3_38, %c0_39, %c0_40] : memref<5x128x256xbf16, #tpu.memory_space<vmem>>, vector<1x128x256xbf16>
    %84 = vector.shape_cast %83 : vector<1x128x256xbf16> to vector<128x256xbf16>
    %cst_41 = arith.constant dense<0.000000e+00> : vector<64x256xf32>
    %85 = tpu.matmul %82, %84, %cst_41 {dimension_numbers = #tpu.dot_dimension_numbers<[1], [0], [0], [1], [0, 0, 1, 1], [], []>} : vector<64x128xbf16>, vector<128x256xbf16>, vector<64x256xf32> -> vector<64x256xf32>
    %86 = arith.addf %79, %85 : vector<64x256xf32>
    %87 = vector.extract_strided_slice %57 {offsets = [0, 4, 0], sizes = [8, 8, 128], strides = [1, 1, 1]} : vector<8x16x128xf32> to vector<8x8x128xf32>
    %88 = vector.shape_cast %87 : vector<8x8x128xf32> to vector<64x128xf32>
    %89 = arith.truncf %88 : vector<64x128xf32> to vector<64x128xbf16>
    %c4_42 = arith.constant 4 : index
    %c0_43 = arith.constant 0 : index
    %c0_44 = arith.constant 0 : index
    %90 = vector.load %arg4[%c4_42, %c0_43, %c0_44] : memref<5x128x256xbf16, #tpu.memory_space<vmem>>, vector<1x128x256xbf16>
    %91 = vector.shape_cast %90 : vector<1x128x256xbf16> to vector<128x256xbf16>
    %cst_45 = arith.constant dense<0.000000e+00> : vector<64x256xf32>
    %92 = tpu.matmul %89, %91, %cst_45 {dimension_numbers = #tpu.dot_dimension_numbers<[1], [0], [0], [1], [0, 0, 1, 1], [], []>} : vector<64x128xbf16>, vector<128x256xbf16>, vector<64x256xf32> -> vector<64x256xf32>
    %93 = arith.addf %86, %92 : vector<64x256xf32>
    %94 = vector.extract_strided_slice %93 {offsets = [0, 0], sizes = [64, 128], strides = [1, 1]} : vector<64x256xf32> to vector<64x128xf32>
    %95 = vector.extract_strided_slice %93 {offsets = [0, 128], sizes = [64, 128], strides = [1, 1]} : vector<64x256xf32> to vector<64x128xf32>
    %96 = arith.maximumf %94, %95 : vector<64x128xf32>
    %c0_46 = arith.constant 0 : index
    %c0_47 = arith.constant 0 : index
    %97 = vector.load %arg5[%c0_46, %c0_47] : memref<1x128xf32, #tpu.memory_space<vmem>>, vector<1x128xf32>
    %98 = vector.broadcast %97 : vector<1x128xf32> to vector<64x128xf32>
    %99 = arith.addf %96, %98 : vector<64x128xf32>
    %100 = vector.extract_strided_slice %99 {offsets = [0, 0], sizes = [63, 128], strides = [1, 1]} : vector<64x128xf32> to vector<63x128xf32>
    %101 = vector.extract_strided_slice %99 {offsets = [1, 0], sizes = [63, 128], strides = [1, 1]} : vector<64x128xf32> to vector<63x128xf32>
    %102 = arith.maximumf %100, %101 : vector<63x128xf32>
    %c0_48 = arith.constant 0 : index
    %c0_49 = arith.constant 0 : index
    %103 = vector.load %arg7[%c0_48, %c0_49] : memref<32x63xbf16, #tpu.memory_space<vmem>>, vector<32x63xbf16>
    %104 = arith.truncf %102 : vector<63x128xf32> to vector<63x128xbf16>
    %cst_50 = arith.constant dense<0.000000e+00> : vector<32x128xf32>
    %105 = tpu.matmul %103, %104, %cst_50 {dimension_numbers = #tpu.dot_dimension_numbers<[1], [0], [0], [1], [0, 0, 1, 1], [], []>} : vector<32x63xbf16>, vector<63x128xbf16>, vector<32x128xf32> -> vector<32x128xf32>
    %106 = vector.extract_strided_slice %105 {offsets = [0, 0], sizes = [8, 128], strides = [1, 1]} : vector<32x128xf32> to vector<8x128xf32>
    %107 = vector.extract_strided_slice %105 {offsets = [8, 0], sizes = [8, 128], strides = [1, 1]} : vector<32x128xf32> to vector<8x128xf32>
    %108 = vector.extract_strided_slice %105 {offsets = [16, 0], sizes = [8, 128], strides = [1, 1]} : vector<32x128xf32> to vector<8x128xf32>
    %109 = vector.extract_strided_slice %105 {offsets = [24, 0], sizes = [8, 128], strides = [1, 1]} : vector<32x128xf32> to vector<8x128xf32>
    %110 = tpu.concatenate %106, %107, %108, %109 in 1 : vector<8x128xf32>, vector<8x128xf32>, vector<8x128xf32>, vector<8x128xf32> -> vector<8x512xf32>
    %cst_51 = arith.constant 1.702000e+00 : f32
    %111 = vector.broadcast %cst_51 : f32 to vector<8x512xf32>
    %112 = arith.mulf %111, %110 : vector<8x512xf32>
    %113 = arith.negf %112 : vector<8x512xf32>
    %114 = math.exp %113 : vector<8x512xf32>
    %cst_52 = arith.constant 1.000000e+00 : f32
    %115 = vector.broadcast %cst_52 : f32 to vector<8x512xf32>
    %116 = arith.addf %115, %114 : vector<8x512xf32>
    %117 = arith.divf %115, %116 : vector<8x512xf32>
    %118 = arith.mulf %117, %110 : vector<8x512xf32>
    %119 = arith.truncf %118 : vector<8x512xf32> to vector<8x512xbf16>
    %c0_53 = arith.constant 0 : index
    %c0_54 = arith.constant 0 : index
    %120 = vector.load %arg8[%c0_53, %c0_54] : memref<512x128xbf16, #tpu.memory_space<vmem>>, vector<512x128xbf16>
    %cst_55 = arith.constant dense<0.000000e+00> : vector<8x128xf32>
    %121 = tpu.matmul %119, %120, %cst_55 {dimension_numbers = #tpu.dot_dimension_numbers<[1], [0], [0], [1], [0, 0, 1, 1], [], []>} : vector<8x512xbf16>, vector<512x128xbf16>, vector<8x128xf32> -> vector<8x128xf32>
    %c0_56 = arith.constant 0 : index
    %c0_57 = arith.constant 0 : index
    %122 = vector.load %arg9[%c0_56, %c0_57] : memref<1x128xf32, #tpu.memory_space<vmem>>, vector<1x128xf32>
    %123 = vector.broadcast %122 : vector<1x128xf32> to vector<8x128xf32>
    %124 = arith.addf %121, %123 : vector<8x128xf32>
    %cst_58 = arith.constant 1.702000e+00 : f32
    %125 = vector.broadcast %cst_58 : f32 to vector<8x128xf32>
    %126 = arith.mulf %125, %124 : vector<8x128xf32>
    %127 = arith.negf %126 : vector<8x128xf32>
    %128 = math.exp %127 : vector<8x128xf32>
    %cst_59 = arith.constant 1.000000e+00 : f32
    %129 = vector.broadcast %cst_59 : f32 to vector<8x128xf32>
    %130 = arith.addf %129, %128 : vector<8x128xf32>
    %131 = arith.divf %129, %130 : vector<8x128xf32>
    %132 = arith.mulf %131, %124 : vector<8x128xf32>
    %133 = arith.truncf %132 : vector<8x128xf32> to vector<8x128xbf16>
    %c0_60 = arith.constant 0 : index
    %c0_61 = arith.constant 0 : index
    %134 = vector.load %arg10[%c0_60, %c0_61] : memref<128x128xbf16, #tpu.memory_space<vmem>>, vector<128x128xbf16>
    %cst_62 = arith.constant dense<0.000000e+00> : vector<8x128xf32>
    %135 = tpu.matmul %133, %134, %cst_62 {dimension_numbers = #tpu.dot_dimension_numbers<[1], [0], [0], [1], [0, 0, 1, 1], [], []>} : vector<8x128xbf16>, vector<128x128xbf16>, vector<8x128xf32> -> vector<8x128xf32>
    %c0_63 = arith.constant 0 : index
    %c0_64 = arith.constant 0 : index
    %136 = vector.load %arg11[%c0_63, %c0_64] : memref<1x128xf32, #tpu.memory_space<vmem>>, vector<1x128xf32>
    %137 = vector.broadcast %136 : vector<1x128xf32> to vector<8x128xf32>
    %138 = arith.addf %135, %137 : vector<8x128xf32>
    %c0_65 = arith.constant 0 : index
    %c0_66 = arith.constant 0 : index
    %139 = vector.load %arg12[%c0_65, %c0_66] : memref<8x128xf32, #tpu.memory_space<vmem>>, vector<8x128xf32>
    tpu.vector_store %arg12[%c0_65, %c0_66], %138 {strides = array<i32>} : memref<8x128xf32, #tpu.memory_space<vmem>>, vector<8x128xf32>,
    return
  }
  func.func @transform_0(%arg0: i32) -> (i32, i32, i32) {
    %c0_i32 = arith.constant 0 : i32
    %c0_i32_0 = arith.constant 0 : i32
    %c0_i32_1 = arith.constant 0 : i32
    return %arg0, %c0_i32, %c0_i32_0 : i32, i32, i32
  }
  func.func @transform_1(%arg0: i32) -> (i32, i32, i32) {
    %c0_i32 = arith.constant 0 : i32
    %c0_i32_0 = arith.constant 0 : i32
    %c0_i32_1 = arith.constant 0 : i32
    %c0_i32_2 = arith.constant 0 : i32
    return %c0_i32, %c0_i32_0, %c0_i32_1 : i32, i32, i32
  }
  func.func @transform_2(%arg0: i32) -> (i32, i32) {
    %c0_i32 = arith.constant 0 : i32
    %c0_i32_0 = arith.constant 0 : i32
    %c0_i32_1 = arith.constant 0 : i32
    return %c0_i32, %c0_i32_0 : i32, i32
  }
  func.func @transform_3(%arg0: i32) -> (i32, i32, i32) {
    %c0_i32 = arith.constant 0 : i32
    %c0_i32_0 = arith.constant 0 : i32
    %c0_i32_1 = arith.constant 0 : i32
    %c0_i32_2 = arith.constant 0 : i32
    return %c0_i32, %c0_i32_0, %c0_i32_1 : i32, i32, i32
  }
  func.func @transform_4(%arg0: i32) -> (i32, i32) {
    %c0_i32 = arith.constant 0 : i32
    %c0_i32_0 = arith.constant 0 : i32
    %c0_i32_1 = arith.constant 0 : i32
    return %c0_i32, %c0_i32_0 : i32, i32
  }
  func.func @transform_5(%arg0: i32) -> (i32, i32) {
    %c0_i32 = arith.constant 0 : i32
    %c0_i32_0 = arith.constant 0 : i32
    %c0_i32_1 = arith.constant 0 : i32
    return %c0_i32, %c0_i32_0 : i32, i32
  }
  func.func @transform_6(%arg0: i32) -> (i32, i32) {
    %c0_i32 = arith.constant 0 : i32
    %c0_i32_0 = arith.constant 0 : i32
    %c0_i32_1 = arith.constant 0 : i32
    return %c0_i32, %c0_i32_0 : i32, i32
  }
  func.func @transform_7(%arg0: i32) -> (i32, i32) {
    %c0_i32 = arith.constant 0 : i32
    %c0_i32_0 = arith.constant 0 : i32
    %c0_i32_1 = arith.constant 0 : i32
    return %c0_i32, %c0_i32_0 : i32, i32
  }
  func.func @transform_8(%arg0: i32) -> (i32, i32) {
    %c0_i32 = arith.constant 0 : i32
    %c0_i32_0 = arith.constant 0 : i32
    %c0_i32_1 = arith.constant 0 : i32
    return %c0_i32, %c0_i32_0 : i32, i32
  }
  func.func @transform_9(%arg0: i32) -> (i32, i32) {
    %c0_i32 = arith.constant 0 : i32
    %c0_i32_0 = arith.constant 0 : i32
    %c0_i32_1 = arith.constant 0 : i32
    return %c0_i32, %c0_i32_0 : i32, i32
  }
  func.func @transform_10(%arg0: i32) -> (i32, i32) {
    %c0_i32 = arith.constant 0 : i32
    %c0_i32_0 = arith.constant 0 : i32
    %c0_i32_1 = arith.constant 0 : i32
    return %c0_i32, %c0_i32_0 : i32, i32
  }
  func.func @transform_11(%arg0: i32) -> (i32, i32) {
    %c0_i32 = arith.constant 0 : i32
    %c0_i32_0 = arith.constant 0 : i32
    return %arg0, %c0_i32 : i32, i32
  }
}

</mosaic_0001>

<bundles_post_ra>
// kernel: convnet_forward.1
= control target key start
LH: loop header
LB: loop body
LE: loop exit
PB: predicated region body
PF: predicated region fallthrough
CT: control target
= control target key end

     0   :  { %vm272_vm0 = vcmask 1045504   ;;  %v6677_v1 = vmov 0   ;;  %vm119_vm1 = vcmask 1046528   ;;  %vm235_vm2 = vcmask 228352   ;;  %s6665_s1 = inlined_call_operand.vmem [shape: bf16[5,28,256], index: 1, kind: input, shape index: {}]   ;;  %s6666_s0 = inlined_call_operand.vmem [shape: f32[8,28,28], index: 0, kind: input, shape index: {}]   ;;  %s6667_s5 = inlined_call_operand.vmem [shape: bf16[128,191], index: 5, kind: input, shape index: {}]   ;;  %s6668_s2 = inlined_call_operand.vmem [shape: f32[1,128], index: 2, kind: input, shape index: {}]   ;;  %s6669_s3 = inlined_call_operand.vmem [shape: bf16[5,128,256], index: 3, kind: input, shape index: {}]   ;;  %s6670_s6 = inlined_call_operand.vmem [shape: bf16[32,63], index: 6, kind: input, shape index: {}]   ;;  %s6671_s4 = inlined_call_operand.vmem [shape: f32[1,128], index: 4, kind: input, shape index: {}]   ;;  %s6672_s7 = inlined_call_operand.vmem [shape: bf16[512,128], index: 7, kind: input, shape index: {}]   ;;  %s6673_s9 = inlined_call_operand.vmem [shape: bf16[128,128], index: 9, kind: input, shape index: {}]   ;;  %s6674_s8 = inlined_call_operand.vmem [shape: f32[1,128], index: 8, kind: input, shape index: {}]   ;;  %s6675_s10 = inlined_call_operand.vmem [shape: f32[1,128], index: 10, kind: input, shape index: {}]   ;;  %s6676_s11 = inlined_call_operand.vmem [shape: f32[8,128], index: 11, kind: output, shape index: {}]  }
   0x1   :  { %v4387_v0 = vld [vmem:[%s6665_s1 + $0x34] ss:$8 sps:$4 sm:$0x3f]   ;;  %311 = vmatprep.mubr.bf16.mxu0 %v6677_v1  ;;  %524 = vmatprep.mubr.bf16.mxu1 %v6677_v1  ;;  %v4391_v3 = vld [vmem:[%s6665_s1 + $0x30] ss:$8 sps:$4 sm:$0x3f]  }
   0x2   :  { %v4389_v2 = vld [vmem:[%s6665_s1 + $0x14] ss:$8 sps:$4 sm:$0x3f]   ;;  %3962 = vmatprep.subr.msk.bf16.mxu0 %vm272_vm0, %v4387_v0  ;;  %v4392_v4 = vld [vmem:[%s6665_s1 + $0x10] ss:$8 sps:$4 sm:$0x3f]  }
   0x3   :  { %3979 = vmatprep.subr.msk.bf16.mxu1 %vm272_vm0, %v4389_v2  ;;  %v4393_v5 = vld [vmem:[%s6665_s1 + $0x24] ss:$8 sps:$4 sm:$0xff]   ;;  %v274_v6 = vsel %vm272_vm0, %v4391_v3, 0  ;;  %v487_v7 = vsel %vm272_vm0, %v4392_v4, 0  ;;  %v4397_v9 = vld [vmem:[%s6665_s1 + $0x20] ss:$8 sps:$4 sm:$0xff]  }
   0x4   :  { %v4395_v8 = vld [vmem:[%s6665_s1 + $0x4] ss:$8 sps:$4 sm:$0xff]   ;;  %292 = vmatpush1.bf16.msra.mxu0 %v274_v6  ;;  %505 = vmatpush1.bf16.msra.mxu1 %v487_v7  ;;  %v4398_v10 = vld [vmem:[%s6665_s1] ss:$8 sps:$4 sm:$0xff]   ;;  %v4794_v13 = vld [vmem:[%s6666_s0 + $0x10] sm:$0xff]  ;;  %vm1003_vm3 = vcmask 1044480  }
   0x5   :  { %v4784_v11 = vld [vmem:[%s6666_s0] sm:$0xff]  ;;  %293 = vmatprep.subr.bf16.mxu0 %v4393_v5  ;;  %506 = vmatprep.subr.bf16.mxu1 %v4395_v8  ;;  %v4789_v12 = vld [vmem:[%s6666_s0 + $0x8] sm:$0xff]  ;;  %v4800_v15 = vld [vmem:[%s6666_s0 + $0x18] sm:$0xf]  ;;  %v123_v17 = vrot.slane %v4794_v13, 1  ;;  %v648_v57 = vrot.slane %v4794_v13, 2 }
   0x6   :  { %v120_v14 = vrot.slane %v4784_v11, 1  ;;  %v121_v16 = vrot.slane %v4789_v12, 1  ;;  %v4807_v18 = vld [vmem:[%s6666_s0 + $0x20] sm:$0xff]  ;;  %v4812_v19 = vld [vmem:[%s6666_s0 + $0x28] sm:$0xff]  ;;  %v71_v20 = vpack.c.bf16 %v4789_v12, %v4784_v11  ;;  %v125_v21 = vrot.slane %v4800_v15, 1  ;;  %v4833_v30 = vld [vmem:[%s6666_s0 + $0x30] sm:$0xff] }
   0x7   :  { %v127_v24 = vrot.slane %v4807_v18, 1  ;;  %v128_v25 = vrot.slane %v4812_v19, 1  ;;  %v4399_v29 = vld [vmem:[%s6665_s1 + $0x54] ss:$8 sps:$4 sm:$0x3f]   ;;  %v72_v34 = vpack.c.bf16 %v4807_v18, %v4794_v13  ;;  %v130_v35 = vrot.slane %v4833_v30, 1 }
   0x8   :  { %294 = vmatpush1.bf16.msra.mxu0 %v4397_v9  ;;  %507 = vmatpush1.bf16.msra.mxu1 %v4398_v10  ;;  %v122_v22 = vsel %vm119_vm1, %v120_v14, %v121_v16  ;;  %v124_v23 = vsel %vm119_vm1, %v121_v16, %v123_v17  ;;  %v126_v27 = vsel %vm119_vm1, %v123_v17, %v125_v21  ;;  %v4838_v31 = vld [vmem:[%s6666_s0 + $0x38] sm:$0xf]  ;;  %v4852_v38 = vld [vmem:[%s6666_s0 + $0x40] sm:$0xff]  ;;  %v4402_v39 = vld [vmem:[%s6665_s1 + $0x74] ss:$8 sps:$4 sm:$0x3f]  }
   0x9   :  { %v200_v26 = vpack.c.bf16 %v124_v23, %v122_v22  ;;  %v129_v28 = vsel %vm119_vm1, %v127_v24, %v128_v25  ;;  %v4401_v32 = vld [vmem:[%s6665_s1 + $0x50] ss:$8 sps:$4 sm:$0x3f]   ;;  %4000 = vmatprep.subr.msk.bf16.mxu0 %vm272_vm0, %v4399_v29  ;;  %v132_v36 = vrot.slane %v4838_v31, 1  ;;  %v131_v40 = vsel %vm119_vm1, %v128_v25, %v130_v35  ;;  %v4866_v42 = vld [vmem:[%s6666_s0 + $0x48] sm:$0xff]  ;;  %4021 = vmatprep.subr.msk.bf16.mxu1 %vm272_vm0, %v4402_v39  ;;  %v4926_v4 = vld [vmem:[%s6666_s0 + $0x60] sm:$0xff] }
   0xa   :  { %v201_v33 = vpack.c.bf16 %v129_v28, %v126_v27  ;;  %v797_v37 = vsel %vm272_vm0, %v4401_v32, 0  ;;  %v4871_v43 = vld [vmem:[%s6666_s0 + $0x50] sm:$0xff]  ;;  %v4405_v44 = vld [vmem:[%s6665_s1 + $0x40] ss:$8 sps:$4 sm:$0xff]   ;;  %v4407_v46 = vld [vmem:[%s6665_s1 + $0x44] ss:$8 sps:$4 sm:$0xff]   ;;  %v73_v48 = vpack.c.bf16 %v4833_v30, %v4812_v19  ;;  %v74_v14 = vpack.c.bf16 %v4866_v42, %v4852_v38 }
   0xb   :  { %3963 = vmatmul.mubr.msk.bf16.vlgmr.msra.gmra.mxu0 %vm235_vm2, %v200_v26  ;;  %3980 = vmatmul.mubr.msk.bf16.vlgmr.msra.gmra.mxu1 %vm235_vm2, %v71_v20  ;;  %v133_v41 = vsel %vm119_vm1, %v130_v35, %v132_v36  ;;  %v4404_v45 = vld [vmem:[%s6665_s1 + $0x70] ss:$8 sps:$4 sm:$0x3f]   ;;  %v134_v49 = vrot.slane %v4852_v38, 1  ;;  %v135_v50 = vrot.slane %v4866_v42, 1  ;;  %v137_v51 = vrot.slane %v4871_v43, 1 }
   0xc   :  { %321 = vmatprep.mubr.bf16.mxu0 %v6677_v1  ;;  %534 = vmatprep.mubr.bf16.mxu1 %v6677_v1  ;;  %v202_v47 = vpack.c.bf16 %v133_v41, %v131_v40  ;;  %v645_v52 = vrot.slane %v4784_v11, 2  ;;  %v1156_v53 = vsel %vm272_vm0, %v4404_v45, 0  ;;  %v4410_v54 = vld [vmem:[%s6665_s1 + $0x64] ss:$8 sps:$4 sm:$0xff]   ;;  %v4408_v55 = vld [vmem:[%s6665_s1 + $0x60] ss:$8 sps:$4 sm:$0xff]   ;;  %v75_v26 = vpack.c.bf16 %v4926_v4, %v4871_v43 }
   0xd   :  { %815 = vmatpush1.bf16.msra.mxu0 %v797_v37  ;;  %1174 = vmatpush1.bf16.msra.mxu1 %v1156_v53  ;;  %v646_v56 = vrot.slane %v4789_v12, 2  ;;  %v1004_v58 = vrot.slane %v4784_v11, 3  ;;  %v136_v59 = vsel %vm119_vm1, %v134_v49, %v135_v50  ;;  %v1005_v60 = vrot.slane %v4789_v12, 3  ;;  %v4411_v2 = vld [vmem:[%s6665_s1 + $0x94] ss:$8 sps:$4 sm:$0x3f]  }
   0xe   :  { %816 = vmatprep.subr.bf16.mxu0 %v4407_v46  ;;  %v1007_v61 = vrot.slane %v4794_v13, 3  ;;  %v138_v62 = vsel %vm119_vm1, %v135_v50, %v137_v51  ;;  %v4921_v3 = vld [vmem:[%s6666_s0 + $0x58] sm:$0xf]  ;;  %v4931_v5 = vld [vmem:[%s6666_s0 + $0x68] sm:$0xff]  ;;  %1175 = vmatprep.subr.bf16.mxu1 %v4410_v54  ;;  %v141_v17 = vrot.slane %v4926_v4, 1  ;;  %v4961_v23 = vld [vmem:[%s6666_s0 + $0x70] sm:$0xff] }
   0xf   :  { %v4908_v63 = vsel %vm272_vm0, %v645_v52, %v646_v56  ;;  %v4913_v0 = vsel %vm272_vm0, %v646_v56, %v648_v57  ;;  %v4936_v7 = vsel %vm1003_vm3, %v1004_v58, %v1005_v60  ;;  %v203_v10 = vpack.c.bf16 %v138_v62, %v136_v59  ;;  %v4966_v24 = vld [vmem:[%s6666_s0 + $0x78] sm:$0xf]  ;;  %v4991_v35 = vld [vmem:[%s6666_s0 + $0x90] sm:$0xff] }
  0x10   :  { %v725_v6 = vpack.c.bf16 %v4913_v0, %v4908_v63  ;;  %v4941_v8 = vsel %vm1003_vm3, %v1005_v60, %v1007_v61  ;;  %v139_v16 = vrot.slane %v4921_v3, 1  ;;  %v142_v20 = vrot.slane %v4931_v5, 1  ;;  %v5007_v46 = vld [vmem:[%s6666_s0 + $0x98] sm:$0xf]  ;;  %v5033_v56 = vld [vmem:[%s6666_s0 + $0xb0] sm:$0xff] }
  0x11   :  { %817 = vmatpush1.bf16.msra.mxu0 %v4405_v44  ;;  %1176 = vmatpush1.bf16.msra.mxu1 %v4408_v55  ;;  %v1084_v9 = vpack.c.bf16 %v4941_v8, %v4936_v7  ;;  %v144_v27 = vrot.slane %v4961_v23, 1  ;;  %v146_v28 = vrot.slane %v4966_v24, 1  ;;  %v76_v37 = vpack.c.bf16 %v4961_v23, %v4931_v5  ;;  %v5038_v58 = vld [vmem:[%s6666_s0 + $0xb8] sm:$0xf] }
  0x12   :  { %4042 = vmatprep.subr.msk.bf16.mxu0 %vm272_vm0, %v4411_v2  ;;  %2026 = vmatprep.subr.bf16.mxu1 %v6677_v1  ;;  %v140_v21 = vsel %vm119_vm1, %v137_v51, %v139_v16  ;;  %v143_v22 = vsel %vm119_vm1, %v141_v17, %v142_v20  ;;  %v151_v41 = vrot.slane %v4991_v35, 1  ;;  %v153_v51 = vrot.slane %v5007_v46, 1  ;;  %v5053_v16 = vld [vmem:[%s6666_s0 + $0xc0] sm:$0xff]  ;;  %v5058_v17 = vld [vmem:[%s6666_s0 + $0xc8] sm:$0xff] }
  0x13   :  { %3964 = vmatmul.mubr.msk.bf16.gmra.mxu0 %vm235_vm2, %v201_v33  ;;  %3981 = vmatmul.mubr.msk.bf16.gmra.mxu1 %vm235_vm2, %v72_v34  ;;  %v204_v25 = vpack.c.bf16 %v143_v22, %v140_v21  ;;  %v145_v29 = vsel %vm119_vm1, %v142_v20, %v144_v27  ;;  %v147_v32 = vsel %vm119_vm1, %v144_v27, %v146_v28  ;;  %v4981_v33 = vld [vmem:[%s6666_s0 + $0x80] sm:$0xff]  ;;  %v4986_v34 = vld [vmem:[%s6666_s0 + $0x88] sm:$0xff]  ;;  %v158_v62 = vrot.slane %v5033_v56, 1  ;;  %v5063_v20 = vld [vmem:[%s6666_s0 + $0xd0] sm:$0xff] }
  0x14   :  { %331 = vmatprep.mubr.bf16.mxu0 %v6677_v1  ;;  %544 = vmatprep.mubr.bf16.mxu1 %v6677_v1  ;;  %v205_v36 = vpack.c.bf16 %v147_v32, %v145_v29  ;;  %v148_v39 = vrot.slane %v4981_v33, 1  ;;  %v149_v40 = vrot.slane %v4986_v34, 1  ;;  %v77_v50 = vpack.c.bf16 %v4986_v34, %v4981_v33 }
  0x15   :  { %v154_v54 = vsel %vm119_vm1, %v151_v41, %v153_v51  ;;  %v160_v2 = vrot.slane %v5038_v58, 1  ;;  %v1363_v21 = vrot.slane %v4784_v11, 4  ;;  %v1364_v22 = vrot.slane %v4789_v12, 4 }
  0x16   :  { %v150_v44 = vsel %vm119_vm1, %v148_v39, %v149_v40  ;;  %v152_v45 = vsel %vm119_vm1, %v149_v40, %v151_v41  ;;  %v162_v28 = vrot.slane %v5053_v16, 1  ;;  %vm1362_vm4 = vcmask 1043456   ;;  %v5092_v40 = vld [vmem:[%s6666_s0 + $0xd8] sm:$0xf]  ;;  %v5097_v41 = vld [vmem:[%s6666_s0 + $0xe0] sm:$0xff] }
  0x17   :  { %v206_v49 = vpack.c.bf16 %v152_v45, %v150_v44  ;;  %v163_v29 = vrot.slane %v5058_v17, 1  ;;  %v165_v32 = vrot.slane %v5063_v20, 1  ;;  %v5102_v44 = vld [vmem:[%s6666_s0 + $0xe8] sm:$0xff]  ;;  %v169_v51 = vrot.slane %v5097_v41, 1 }
  0x18   :  { %v655_v8 = vrot.slane %v4833_v30, 2  ;;  %vm1995_vm5 = vcmask 515072   ;;  %vm2020_vm6 = vcmask 1047552   ;;  %vm4690_vm7 = vmmov 0  }
  0x19   :  { %v166_v39 = vsel %vm119_vm1, %v163_v29, %v165_v32 }
  0x1b   :  { %3965 = vmatmul.mubr.msk.bf16.gmra.mxu0 %vm235_vm2, %v202_v47  ;;  %3982 = vmatmul.mubr.msk.bf16.gmra.mxu1 %vm235_vm2, %v73_v48  ;;  %v5012_v47 = vld [vmem:[%s6666_s0 + $0xa0] sm:$0xff]  ;;  %v5017_v48 = vld [vmem:[%s6666_s0 + $0xa8] sm:$0xff] }
  0x1c   :  { %341 = vmatprep.mubr.bf16.mxu0 %v6677_v1  ;;  %554 = vmatprep.mubr.bf16.mxu1 %v6677_v1  ;;  %v155_v52 = vrot.slane %v5012_v47, 1  ;;  %v156_v53 = vrot.slane %v5017_v48, 1  ;;  %v78_v60 = vpack.c.bf16 %v5012_v47, %v4991_v35  ;;  %v79_v27 = vpack.c.bf16 %v5033_v56, %v5017_v48 }
  0x1e   :  { %v157_v55 = vsel %vm119_vm1, %v155_v52, %v156_v53  ;;  %v170_v52 = vrot.slane %v5102_v44, 1 }
  0x1f   :  { %v207_v59 = vpack.c.bf16 %v157_v55, %v154_v54  ;;  %v5118_v55 = vld [vmem:[%s6666_s0 + $0xf0] sm:$0xff] }
  0x20   :  { %v171_v54 = vsel %vm119_vm1, %v169_v51, %v170_v52 }
  0x23   :  { %3966 = vmatmul.mubr.msk.bf16.gmra.mxu0 %vm235_vm2, %v203_v10  ;;  %3983 = vmatmul.mubr.msk.bf16.gmra.mxu1 %vm235_vm2, %v74_v14  ;;  %v159_v10 = vsel %vm119_vm1, %v156_v53, %v158_v62  ;;  %v161_v14 = vsel %vm119_vm1, %v158_v62, %v160_v2  ;;  %v81_v62 = vpack.c.bf16 %v5097_v41, %v5063_v20  ;;  %v172_v2 = vrot.slane %v5118_v55, 1 }
  0x24   :  { %351 = vmatprep.mubr.bf16.mxu0 %v6677_v1  ;;  %564 = vmatprep.mubr.bf16.mxu1 %v6677_v1 }
  0x2b   :  { %3967 = vmatmul.mubr.msk.bf16.gmra.mxu0 %vm235_vm2, %v204_v25  ;;  %3984 = vmatmul.mubr.msk.bf16.gmra.mxu1 %vm235_vm2, %v75_v26  ;;  %v1366_v25 = vrot.slane %v4794_v13, 4  ;;  %v208_v26 = vpack.c.bf16 %v161_v14, %v159_v10  ;;  %v173_v14 = vsel %vm119_vm1, %v170_v52, %v172_v2 }
  0x2c   :  { %361 = vmatprep.mubr.bf16.mxu0 %v6677_v1  ;;  %574 = vmatprep.mubr.bf16.mxu1 %v6677_v1 }
  0x2d   :  { %v5079_v11 = vsel %vm1362_vm4, %v1364_v22, %v1366_v25 }
  0x33   :  { %3968 = vmatmul.mubr.msk.bf16.gmra.mxu0 %vm235_vm2, %v205_v36  ;;  %3985 = vmatmul.mubr.msk.bf16.gmra.mxu1 %vm235_vm2, %v76_v37  ;;  %v5074_v36 = vsel %vm1362_vm4, %v1363_v21, %v1364_v22  ;;  %v164_v37 = vsel %vm119_vm1, %v162_v28, %v163_v29  ;;  %v650_v28 = vrot.slane %v4800_v15, 2  ;;  %v652_v29 = vrot.slane %v4807_v18, 2 }
  0x34   :  { %371 = vmatprep.mubr.bf16.mxu0 %v6677_v1  ;;  %584 = vmatprep.mubr.bf16.mxu1 %v6677_v1  ;;  %v1443_v12 = vpack.c.bf16 %v5079_v11, %v5074_v36  ;;  %v209_v45 = vpack.c.bf16 %v166_v39, %v164_v37  ;;  %v1009_v37 = vrot.slane %v4800_v15, 3  ;;  %v1011_v39 = vrot.slane %v4807_v18, 3 }
  0x35   :  { %v651_v51 = vsel %vm272_vm0, %v648_v57, %v650_v28  ;;  %v1019_v28 = vrot.slane %v4866_v42, 3  ;;  %v1373_v11 = vrot.slane %v4833_v30, 4 }
  0x36   :  { %v1010_v63 = vsel %vm1003_vm3, %v1007_v61, %v1009_v37 }
  0x3b   :  { %3969 = vmatmul.mubr.msk.bf16.gmra.mxu0 %vm235_vm2, %v206_v49  ;;  %3986 = vmatmul.mubr.msk.bf16.gmra.mxu1 %vm235_vm2, %v77_v50  ;;  %v80_v49 = vpack.c.bf16 %v5058_v17, %v5053_v16  ;;  %v167_v50 = vrot.slane %v5092_v40, 1 }
  0x3c   :  { %381 = vmatprep.mubr.bf16.mxu0 %v6677_v1  ;;  %594 = vmatprep.mubr.bf16.mxu1 %v6677_v1 }
  0x3d   :  { %v168_v53 = vsel %vm119_vm1, %v165_v32, %v167_v50  ;;  %v653_v32 = vrot.slane %v4812_v19, 2  ;;  %v4416_v50 = vld [vmem:[%s6665_s1 + $0x84] ss:$8 sps:$4 sm:$0xff]  }
  0x3f   :  { %v654_v52 = vsel %vm272_vm0, %v652_v29, %v653_v32  ;;  %v656_v61 = vsel %vm272_vm0, %v653_v32, %v655_v8  ;;  %v1021_v29 = vrot.slane %v4871_v43, 3 }
  0x40   :  { %v726_v7 = vpack.c.bf16 %v654_v52, %v651_v51  ;;  %v664_v51 = vrot.slane %v4921_v3, 2  ;;  %v666_v52 = vrot.slane %v4926_v4, 2 }
  0x43   :  { %3970 = vmatmul.mubr.msk.bf16.gmra.mxu0 %vm235_vm2, %v207_v59  ;;  %3987 = vmatmul.mubr.msk.bf16.gmra.mxu1 %vm235_vm2, %v78_v60  ;;  %v5123_v59 = vld [vmem:[%s6666_s0 + $0xf8] sm:$0xf]  ;;  %v210_v60 = vpack.c.bf16 %v171_v54, %v168_v53  ;;  %v1014_v53 = vrot.slane %v4833_v30, 3  ;;  %v1016_v54 = vrot.slane %v4838_v31, 3 }
  0x44   :  { %391 = vmatprep.mubr.bf16.mxu0 %v6677_v1  ;;  %604 = vmatprep.mubr.bf16.mxu1 %v6677_v1  ;;  %v174_v10 = vrot.slane %v5123_v59, 1 }
  0x46   :  { %v175_v21 = vsel %vm119_vm1, %v172_v2, %v174_v10  ;;  %v1017_v2 = vsel %vm1003_vm3, %v1014_v53, %v1016_v54 }
  0x47   :  { %v211_v22 = vpack.c.bf16 %v175_v21, %v173_v14  ;;  %v659_v21 = vrot.slane %v4852_v38, 2 }
  0x4b   :  { %3971 = vmatmul.mubr.msk.bf16.gmra.mxu0 %vm235_vm2, %v208_v26  ;;  %3988 = vmatmul.mubr.msk.bf16.gmra.mxu1 %vm235_vm2, %v79_v27  ;;  %v82_v26 = vpack.c.bf16 %v5118_v55, %v5102_v44  ;;  %v4413_v27 = vld [vmem:[%s6665_s1 + $0x90] ss:$8 sps:$4 sm:$0x3f]  }
  0x4c   :  { %401 = vmatprep.mubr.bf16.mxu0 %v6677_v1  ;;  %614 = vmatprep.mubr.bf16.mxu1 %v6677_v1 }
  0x53   :  { %3972 = vmatmul.mubr.msk.bf16.gmra.mxu0 %vm235_vm2, %v209_v45  ;;  %3989 = vmatmul.mubr.msk.bf16.gmra.mxu1 %vm235_vm2, %v80_v49  ;;  %v1012_v45 = vrot.slane %v4812_v19, 3  ;;  %v1515_v49 = vsel %vm272_vm0, %v4413_v27, 0  ;;  %v1018_v27 = vrot.slane %v4852_v38, 3 }
  0x54   :  { %411 = vmatprep.mubr.bf16.mxu0 %v6677_v1  ;;  %624 = vmatprep.mubr.bf16.mxu1 %v6677_v1 }
  0x55   :  { %v1013_v0 = vsel %vm1003_vm3, %v1011_v39, %v1012_v45  ;;  %v1020_v39 = vsel %vm1003_vm3, %v1018_v27, %v1019_v28 }
  0x56   :  { %v1085_v57 = vpack.c.bf16 %v1013_v0, %v1010_v63  ;;  %v667_v63 = vrot.slane %v4931_v5, 2  ;;  %v1023_v0 = vrot.slane %v4921_v3, 3 }
  0x5b   :  { %3973 = vmatmul.mubr.msk.bf16.gmra.mxu0 %vm235_vm2, %v210_v60  ;;  %3990 = vmatmul.mubr.msk.bf16.gmra.mxu1 %vm235_vm2, %v81_v62  ;;  %v1015_v62 = vsel %vm1003_vm3, %v1012_v45, %v1014_v53  ;;  %v1022_v45 = vsel %vm1003_vm3, %v1019_v28, %v1021_v29 }
  0x5c   :  { %421 = vmatprep.mubr.bf16.mxu0 %v6677_v1  ;;  %634 = vmatprep.mubr.bf16.mxu1 %v6677_v1  ;;  %v1086_v14 = vpack.c.bf16 %v1017_v2, %v1015_v62  ;;  %v671_v62 = vrot.slane %v4966_v24, 2  ;;  %v1028_v2 = vrot.slane %v4961_v23, 3 }
  0x63   :  { %3974 = vmatmul.mubr.msk.bf16.gmra.mxu0 %vm235_vm2, %v211_v22  ;;  %3991 = vmatmul.mubr.msk.bf16.gmra.mxu1 %vm235_vm2, %v82_v26  ;;  %v660_v22 = vrot.slane %v4866_v42, 2  ;;  %v662_v26 = vrot.slane %v4871_v43, 2 }
  0x64   :  { %834 = vmatprep.mubr.bf16.mxu0 %v6677_v1  ;;  %1193 = vmatprep.mubr.bf16.mxu1 %v6677_v1 }
  0x65   :  { %v661_v32 = vsel %vm272_vm0, %v659_v21, %v660_v22  ;;  %v663_v37 = vsel %vm272_vm0, %v660_v22, %v662_v26 }
  0x6b   :  { %4001 = vmatmul.mubr.msk.bf16.vlgmr.msra.gmra.mxu0 %vm235_vm2, %v725_v6  ;;  %4022 = vmatmul.mubr.msk.bf16.vlgmr.msra.gmra.mxu1 %vm235_vm2, %v1084_v9  ;;  %v4414_v6 = vld [vmem:[%s6665_s1 + $0x80] ss:$8 sps:$4 sm:$0xff]   ;;  %v657_v9 = vrot.slane %v4838_v31, 2 }
  0x6c   :  { %844 = vmatprep.mubr.bf16.mxu0 %v6677_v1  ;;  %1203 = vmatprep.mubr.bf16.mxu1 %v6677_v1 }
  0x6d   :  { %1533 = vmatpush1.bf16.msra.mxu0 %v1515_v49  ;;  %v658_v60 = vsel %vm272_vm0, %v655_v8, %v657_v9  ;;  %v728_v49 = vpack.c.bf16 %v663_v37, %v661_v32  ;;  %v668_v8 = vsel %vm272_vm0, %v666_v52, %v667_v63  ;;  %v1024_v9 = vsel %vm1003_vm3, %v1021_v29, %v1023_v0 }
  0x6e   :  { %1534 = vmatprep.subr.bf16.mxu0 %v4416_v50  ;;  %v727_v10 = vpack.c.bf16 %v658_v60, %v656_v61  ;;  %v1087_v50 = vpack.c.bf16 %v1022_v45, %v1020_v39  ;;  %v669_v60 = vrot.slane %v4961_v23, 2  ;;  %v673_v29 = vrot.slane %v4981_v33, 2 }
  0x6f   :  { %v674_v32 = vrot.slane %v4986_v34, 2  ;;  %v676_v37 = vrot.slane %v4991_v35, 2  ;;  %v1032_v39 = vrot.slane %v4981_v33, 3  ;;  %v1033_v45 = vrot.slane %v4986_v34, 3 }
  0x70   :  { %v672_v21 = vsel %vm272_vm0, %v669_v60, %v671_v62 }
  0x71   :  { %1535 = vmatpush1.bf16.msra.mxu0 %v4414_v6  ;;  %v1025_v6 = vrot.slane %v4926_v4, 3  ;;  %v1034_v52 = vsel %vm1003_vm3, %v1032_v39, %v1033_v45 }
  0x73   :  { %4002 = vmatmul.mubr.msk.bf16.gmra.mxu0 %vm235_vm2, %v726_v7  ;;  %4023 = vmatmul.mubr.msk.bf16.gmra.mxu1 %vm235_vm2, %v1085_v57  ;;  %v1026_v7 = vrot.slane %v4931_v5, 3  ;;  %v665_v57 = vsel %vm272_vm0, %v662_v26, %v664_v51  ;;  %v677_v51 = vsel %vm272_vm0, %v674_v32, %v676_v37 }
  0x74   :  { %854 = vmatprep.mubr.bf16.mxu0 %v6677_v1  ;;  %1213 = vmatprep.mubr.bf16.mxu1 %v6677_v1  ;;  %v729_v54 = vpack.c.bf16 %v668_v8, %v665_v57  ;;  %v680_v57 = vrot.slane %v5012_v47, 2  ;;  %v681_v8 = vrot.slane %v5017_v48, 2 }
  0x75   :  { %v1027_v53 = vsel %vm1003_vm3, %v1025_v6, %v1026_v7  ;;  %v1029_v22 = vsel %vm1003_vm3, %v1026_v7, %v1028_v2  ;;  %v678_v7 = vrot.slane %v5007_v46, 2 }
  0x76   :  { %v1088_v61 = vpack.c.bf16 %v1027_v53, %v1024_v9  ;;  %v1037_v9 = vrot.slane %v5007_v46, 3  ;;  %v1039_v53 = vrot.slane %v5012_v47, 3 }
  0x7b   :  { %4003 = vmatmul.mubr.msk.bf16.gmra.mxu0 %vm235_vm2, %v727_v10  ;;  %4024 = vmatmul.mubr.msk.bf16.gmra.mxu1 %vm235_vm2, %v1086_v14  ;;  %v1030_v10 = vrot.slane %v4966_v24, 3  ;;  %v670_v14 = vsel %vm272_vm0, %v667_v63, %v669_v60  ;;  %v682_v60 = vsel %vm272_vm0, %v680_v57, %v681_v8 }
  0x7c   :  { %864 = vmatprep.mubr.bf16.mxu0 %v6677_v1  ;;  %1223 = vmatprep.mubr.bf16.mxu1 %v6677_v1  ;;  %v730_v27 = vpack.c.bf16 %v672_v21, %v670_v14  ;;  %v683_v21 = vrot.slane %v5033_v56, 2 }
  0x7d   :  { %v1031_v26 = vsel %vm1003_vm3, %v1028_v2, %v1030_v10 }
  0x7e   :  { %v1089_v28 = vpack.c.bf16 %v1031_v26, %v1029_v22  ;;  %v685_v22 = vrot.slane %v5038_v58, 2  ;;  %v1042_v26 = vrot.slane %v5033_v56, 3 }
  0x83   :  { %4004 = vmatmul.mubr.msk.bf16.gmra.mxu0 %vm235_vm2, %v728_v49  ;;  %4025 = vmatmul.mubr.msk.bf16.gmra.mxu1 %vm235_vm2, %v1087_v50  ;;  %v1035_v49 = vrot.slane %v4991_v35, 3  ;;  %v675_v50 = vsel %vm272_vm0, %v673_v29, %v674_v32  ;;  %v686_v29 = vsel %vm272_vm0, %v683_v21, %v685_v22 }
  0x84   :  { %874 = vmatprep.mubr.bf16.mxu0 %v6677_v1  ;;  %1233 = vmatprep.mubr.bf16.mxu1 %v6677_v1  ;;  %v731_v0 = vpack.c.bf16 %v677_v51, %v675_v50  ;;  %v688_v50 = vrot.slane %v5058_v17, 2  ;;  %v690_v51 = vrot.slane %v5063_v20, 2 }
  0x85   :  { %v1036_v63 = vsel %vm1003_vm3, %v1033_v45, %v1035_v49  ;;  %v1038_v62 = vsel %vm1003_vm3, %v1035_v49, %v1037_v9  ;;  %v687_v49 = vrot.slane %v5053_v16, 2 }
  0x86   :  { %v1090_v6 = vpack.c.bf16 %v1036_v63, %v1034_v52  ;;  %v1046_v52 = vrot.slane %v5053_v16, 3  ;;  %v1047_v63 = vrot.slane %v5058_v17, 3 }
  0x88   :  { %v1048_v57 = vsel %vm1003_vm3, %v1046_v52, %v1047_v63 }
  0x8b   :  { %4005 = vmatmul.mubr.msk.bf16.gmra.mxu0 %vm235_vm2, %v729_v54  ;;  %4026 = vmatmul.mubr.msk.bf16.gmra.mxu1 %vm235_vm2, %v1088_v61  ;;  %v1040_v54 = vrot.slane %v5017_v48, 3  ;;  %v679_v61 = vsel %vm272_vm0, %v676_v37, %v678_v7  ;;  %v691_v7 = vsel %vm272_vm0, %v688_v50, %v690_v51 }
  0x8c   :  { %884 = vmatprep.mubr.bf16.mxu0 %v6677_v1  ;;  %1243 = vmatprep.mubr.bf16.mxu1 %v6677_v1  ;;  %v732_v10 = vpack.c.bf16 %v682_v60, %v679_v61  ;;  %v694_v61 = vrot.slane %v5097_v41, 2  ;;  %v695_v60 = vrot.slane %v5102_v44, 2 }
  0x8d   :  { %v1041_v2 = vsel %vm1003_vm3, %v1039_v53, %v1040_v54  ;;  %v1043_v32 = vsel %vm1003_vm3, %v1040_v54, %v1042_v26  ;;  %v692_v54 = vrot.slane %v5092_v40, 2 }
  0x8e   :  { %v1091_v14 = vpack.c.bf16 %v1041_v2, %v1038_v62  ;;  %v1051_v62 = vrot.slane %v5092_v40, 3  ;;  %v1053_v2 = vrot.slane %v5097_v41, 3 }
  0x93   :  { %4006 = vmatmul.mubr.msk.bf16.gmra.mxu0 %vm235_vm2, %v730_v27  ;;  %4027 = vmatmul.mubr.msk.bf16.gmra.mxu1 %vm235_vm2, %v1089_v28  ;;  %v1044_v27 = vrot.slane %v5038_v58, 3  ;;  %v684_v28 = vsel %vm272_vm0, %v681_v8, %v683_v21  ;;  %v696_v21 = vsel %vm272_vm0, %v694_v61, %v695_v60 }
  0x94   :  { %894 = vmatprep.mubr.bf16.mxu0 %v6677_v1  ;;  %1253 = vmatprep.mubr.bf16.mxu1 %v6677_v1  ;;  %v733_v39 = vpack.c.bf16 %v686_v29, %v684_v28  ;;  %v697_v29 = vrot.slane %v5118_v55, 2 }
  0x95   :  { %v1045_v37 = vsel %vm1003_vm3, %v1042_v26, %v1044_v27 }
  0x96   :  { %v1092_v45 = vpack.c.bf16 %v1045_v37, %v1043_v32  ;;  %v699_v32 = vrot.slane %v5123_v59, 2  ;;  %v1056_v37 = vrot.slane %v5118_v55, 3 }
  0x9b   :  { %4007 = vmatmul.mubr.msk.bf16.gmra.mxu0 %vm235_vm2, %v731_v0  ;;  %4028 = vmatmul.mubr.msk.bf16.gmra.mxu1 %vm235_vm2, %v1090_v6  ;;  %v1049_v0 = vrot.slane %v5063_v20, 3  ;;  %v689_v6 = vsel %vm272_vm0, %v687_v49, %v688_v50  ;;  %v700_v49 = vsel %vm272_vm0, %v697_v29, %v699_v32 }
  0x9c   :  { %904 = vmatprep.mubr.bf16.mxu0 %v6677_v1  ;;  %1263 = vmatprep.mubr.bf16.mxu1 %v6677_v1  ;;  %v734_v9 = vpack.c.bf16 %v691_v7, %v689_v6  ;;  %v1370_v6 = vrot.slane %v4807_v18, 4  ;;  %v1371_v7 = vrot.slane %v4812_v19, 4 }
  0x9d   :  { %v1050_v8 = vsel %vm1003_vm3, %v1047_v63, %v1049_v0  ;;  %v1052_v22 = vsel %vm1003_vm3, %v1049_v0, %v1051_v62  ;;  %v1368_v0 = vrot.slane %v4800_v15, 4 }
  0x9e   :  { %v1093_v53 = vpack.c.bf16 %v1050_v8, %v1048_v57  ;;  %v1372_v15 = vsel %vm1362_vm4, %v1370_v6, %v1371_v7 }
  0xa3   :  { %4008 = vmatmul.mubr.msk.bf16.gmra.mxu0 %vm235_vm2, %v732_v10  ;;  %4029 = vmatmul.mubr.msk.bf16.gmra.mxu1 %vm235_vm2, %v1091_v14  ;;  %v1054_v10 = vrot.slane %v5102_v44, 3  ;;  %v693_v14 = vsel %vm272_vm0, %v690_v51, %v692_v54 }
  0xa4   :  { %914 = vmatprep.mubr.bf16.mxu0 %v6677_v1  ;;  %1273 = vmatprep.mubr.bf16.mxu1 %v6677_v1  ;;  %v735_v27 = vpack.c.bf16 %v696_v21, %v693_v14  ;;  %v1374_v21 = vsel %vm1362_vm4, %v1371_v7, %v1373_v11 }
  0xa5   :  { %v1055_v26 = vsel %vm1003_vm3, %v1053_v2, %v1054_v10  ;;  %v1057_v50 = vsel %vm1003_vm3, %v1054_v10, %v1056_v37 }
  0xa6   :  { %v1094_v28 = vpack.c.bf16 %v1055_v26, %v1052_v22 }
  0xab   :  { %4009 = vmatmul.mubr.msk.bf16.gmra.mxu0 %vm235_vm2, %v733_v39  ;;  %4030 = vmatmul.mubr.msk.bf16.gmra.mxu1 %vm235_vm2, %v1092_v45  ;;  %v1058_v39 = vrot.slane %v5123_v59, 3  ;;  %v698_v45 = vsel %vm272_vm0, %v695_v60, %v697_v29 }
  0xac   :  { %924 = vmatprep.mubr.bf16.mxu0 %v6677_v1  ;;  %1283 = vmatprep.mubr.bf16.mxu1 %v6677_v1  ;;  %v736_v52 = vpack.c.bf16 %v700_v49, %v698_v45  ;;  %v1380_v45 = vrot.slane %v4871_v43, 4 }
  0xad   :  { %v1059_v51 = vsel %vm1003_vm3, %v1056_v37, %v1058_v39  ;;  %v1377_v37 = vrot.slane %v4852_v38, 4  ;;  %v1378_v39 = vrot.slane %v4866_v42, 4 }
  0xae   :  { %v1095_v63 = vpack.c.bf16 %v1059_v51, %v1057_v50 }
  0xaf   :  { %v1381_v38 = vsel %vm1362_vm4, %v1378_v39, %v1380_v45 }
  0xb3   :  { %4010 = vmatmul.mubr.msk.bf16.gmra.mxu0 %vm235_vm2, %v734_v9  ;;  %4031 = vmatmul.mubr.msk.bf16.gmra.mxu1 %vm235_vm2, %v1093_v53  ;;  %v1369_v53 = vsel %vm1362_vm4, %v1366_v25, %v1368_v0  ;;  %v1379_v0 = vsel %vm1362_vm4, %v1377_v37, %v1378_v39 }
  0xb4   :  { %934 = vmatprep.mubr.bf16.mxu0 %v6677_v1  ;;  %1293 = vmatprep.mubr.bf16.mxu1 %v6677_v1  ;;  %v1444_v62 = vpack.c.bf16 %v1372_v15, %v1369_v53  ;;  %v1382_v15 = vrot.slane %v4921_v3, 4 }
  0xbb   :  { %4011 = vmatmul.mubr.msk.bf16.gmra.mxu0 %vm235_vm2, %v735_v27  ;;  %4032 = vmatmul.mubr.msk.bf16.gmra.mxu1 %vm235_vm2, %v1094_v28 }
  0xbc   :  { %944 = vmatprep.mubr.bf16.mxu0 %v6677_v1  ;;  %1303 = vmatprep.mubr.bf16.mxu1 %v6677_v1 }
  0xc3   :  { %4012 = vmatmul.mubr.msk.bf16.gmra.mxu0 %vm235_vm2, %v736_v52  ;;  %4033 = vmatmul.mubr.msk.bf16.gmra.mxu1 %vm235_vm2, %v1095_v63 }
  0xc4   :  { %1552 = vmatprep.mubr.bf16.mxu0 %v6677_v1 }
  0xcb   :  { %v313_v57 = vpop.f32.mrf.mxu0  ;;  %v526_v8 = vpop.f32.mrf.mxu1  ;;  %4043 = vmatmul.mubr.msk.bf16.vlgmr.msra.gmra.mxu0 %vm235_vm2, %v1443_v12  ;;  %v1375_v12 = vrot.slane %v4838_v31, 4 }
  0xcc   :  { %v5317_v9 = vadd.f32 %v526_v8, %v313_v57  ;;  %1562 = vmatprep.mubr.bf16.mxu0 %v6677_v1  ;;  %v1446_v8 = vpack.c.bf16 %v1381_v38, %v1379_v0 }
  0xcd   :  { %v315_v18 = vpop.f32.mrf.mxu0  ;;  %v528_v54 = vpop.f32.mrf.mxu1  ;;  %v1376_v22 = vsel %vm1362_vm4, %v1373_v11, %v1375_v12 }
  0xce   :  { %v5324_v19 = vadd.f32 %v528_v54, %v315_v18  ;;  %v1445_v29 = vpack.c.bf16 %v1376_v22, %v1374_v21  ;;  %v1384_v18 = vrot.slane %v4926_v4, 4  ;;  %v1385_v54 = vrot.slane %v4931_v5, 4 }
  0xcf   :  { %v317_v61 = vpop.f32.mrf.mxu0  ;;  %v530_v60 = vpop.f32.mrf.mxu1 }
  0xd0   :  { %v5326_v36 = vadd.f32 %v530_v60, %v317_v61  ;;  %v1386_v3 = vsel %vm1362_vm4, %v1384_v18, %v1385_v54  ;;  %v1394_v18 = vrot.slane %v4991_v35, 4 }
  0xd1   :  { %v5330_v2 = vpop.f32.mrf.mxu0  ;;  %v5332_v13 = vpop.f32.mrf.mxu1 }
  0xd3   :  { %v323_v25 = vpop.f32.mrf.mxu0  ;;  %v536_v10 = vpop.f32.mrf.mxu1  ;;  %4044 = vmatmul.mubr.msk.bf16.gmra.mxu0 %vm235_vm2, %v1444_v62 }
  0xd4   :  { %v5335_v14 = vadd.f32 %v536_v10, %v323_v25  ;;  %1572 = vmatprep.mubr.bf16.mxu0 %v6677_v1  ;;  %v1383_v25 = vsel %vm1362_vm4, %v1380_v45, %v1382_v15  ;;  %v1392_v15 = vrot.slane %v4986_v34, 4 }
  0xd5   :  { %v325_v26 = vpop.f32.mrf.mxu0  ;;  %v538_v30 = vpop.f32.mrf.mxu1 }
  0xd6   :  { %v5340_v27 = vadd.f32 %v538_v30, %v325_v26  ;;  %v1447_v26 = vpack.c.bf16 %v1386_v3, %v1383_v25 }
  0xd7   :  { %v327_v31 = vpop.f32.mrf.mxu0  ;;  %v540_v28 = vpop.f32.mrf.mxu1 }
  0xd8   :  { %v5342_v32 = vadd.f32 %v540_v28, %v327_v31  ;;  %v1387_v31 = vrot.slane %v4961_v23, 4  ;;  %v1389_v28 = vrot.slane %v4966_v24, 4 }
  0xd9   :  { %v5347_v49 = vpop.f32.mrf.mxu0  ;;  %v5349_v50 = vpop.f32.mrf.mxu1 }
  0xda   :  { %v1390_v0 = vsel %vm1362_vm4, %v1387_v31, %v1389_v28  ;;  %v1396_v28 = vrot.slane %v5007_v46, 4 }
  0xdb   :  { %v333_v51 = vpop.f32.mrf.mxu0  ;;  %v546_v52 = vpop.f32.mrf.mxu1  ;;  %4045 = vmatmul.mubr.msk.bf16.gmra.mxu0 %vm235_vm2, %v1445_v29 }
  0xdc   :  { %v5352_v63 = vadd.f32 %v546_v52, %v333_v51  ;;  %1582 = vmatprep.mubr.bf16.mxu0 %v6677_v1  ;;  %v1388_v52 = vsel %vm1362_vm4, %v1385_v54, %v1387_v31 }
  0xdd   :  { %v335_v6 = vpop.f32.mrf.mxu0  ;;  %v548_v42 = vpop.f32.mrf.mxu1 }
  0xde   :  { %v5357_v7 = vadd.f32 %v548_v42, %v335_v6 }
  0xdf   :  { %v337_v43 = vpop.f32.mrf.mxu0  ;;  %v550_v57 = vpop.f32.mrf.mxu1 }
  0xe0   :  { %v5359_v53 = vadd.f32 %v550_v57, %v337_v43  ;;  %v1448_v43 = vpack.c.bf16 %v1390_v0, %v1388_v52 }
  0xe1   :  { %v5364_v61 = vpop.f32.mrf.mxu0  ;;  %v5366_v60 = vpop.f32.mrf.mxu1 }
  0xe2   :  { %6680 = vst [vmem:[#allocation2_spill] sm:$0xff] %v5366_v60 }
  0xe3   :  { %v343_v62 = vpop.f32.mrf.mxu0  ;;  %v556_v11 = vpop.f32.mrf.mxu1  ;;  %4046 = vmatmul.mubr.msk.bf16.gmra.mxu0 %vm235_vm2, %v1446_v8  ;;  %v1391_v8 = vrot.slane %v4981_v33, 4  ;;  %v1395_v33 = vsel %vm1362_vm4, %v1392_v15, %v1394_v18 }
  0xe4   :  { %v5369_v12 = vadd.f32 %v556_v11, %v343_v62  ;;  %1592 = vmatprep.mubr.bf16.mxu0 %v6677_v1 }
  0xe5   :  { %v345_v10 = vpop.f32.mrf.mxu0  ;;  %v558_v4 = vpop.f32.mrf.mxu1 }
  0xe6   :  { %v5374_v21 = vadd.f32 %v558_v4, %v345_v10  ;;  %v1393_v10 = vsel %vm1362_vm4, %v1391_v8, %v1392_v15 }
  0xe7   :  { %v347_v5 = vpop.f32.mrf.mxu0  ;;  %v560_v22 = vpop.f32.mrf.mxu1 }
  0xe8   :  { %v5376_v30 = vadd.f32 %v560_v22, %v347_v5 }
  0xe9   :  { %v5380_v29 = vpop.f32.mrf.mxu0  ;;  %v5382_v37 = vpop.f32.mrf.mxu1 }
  0xea   :  { %6681 = vst [vmem:[#allocation3_spill] sm:$0xff] %v5380_v29  ;;  %6682 = vst [vmem:[#allocation4_spill] sm:$0xff] %v5382_v37 }
  0xeb   :  { %v353_v39 = vpop.f32.mrf.mxu0  ;;  %v566_v45 = vpop.f32.mrf.mxu1  ;;  %4047 = vmatmul.mubr.msk.bf16.gmra.mxu0 %vm235_vm2, %v1447_v26  ;;  %v1449_v26 = vpack.c.bf16 %v1395_v33, %v1393_v10  ;;  %v1401_v10 = vrot.slane %v5033_v56, 4  ;;  %v1403_v33 = vrot.slane %v5038_v58, 4 }
  0xec   :  { %v5385_v51 = vadd.f32 %v566_v45, %v353_v39  ;;  %1602 = vmatprep.mubr.bf16.mxu0 %v6677_v1  ;;  %v1398_v39 = vrot.slane %v5012_v47, 4  ;;  %v1399_v45 = vrot.slane %v5017_v48, 4 }
  0xed   :  { %v355_v38 = vpop.f32.mrf.mxu0  ;;  %v568_v23 = vpop.f32.mrf.mxu1 }
  0xee   :  { %v5390_v6 = vadd.f32 %v568_v23, %v355_v38  ;;  %v1400_v46 = vsel %vm1362_vm4, %v1398_v39, %v1399_v45 }
  0xef   :  { %v357_v24 = vpop.f32.mrf.mxu0  ;;  %v570_v42 = vpop.f32.mrf.mxu1 }
  0xf0   :  { %v5392_v57 = vadd.f32 %v570_v42, %v357_v24  ;;  %v1397_v42 = vsel %vm1362_vm4, %v1394_v18, %v1396_v28  ;;  %v1404_v28 = vsel %vm1362_vm4, %v1401_v10, %v1403_v33 }
  0xf1   :  { %v5397_v62 = vpop.f32.mrf.mxu0  ;;  %v5399_v54 = vpop.f32.mrf.mxu1 }
  0xf2   :  { %6683 = vst [vmem:[#allocation5_spill] sm:$0xff] %v5397_v62  ;;  %6684 = vst [vmem:[#allocation6_spill] sm:$0xff] %v5399_v54 }
  0xf3   :  { %v363_v11 = vpop.f32.mrf.mxu0  ;;  %v576_v25 = vpop.f32.mrf.mxu1  ;;  %4048 = vmatmul.mubr.msk.bf16.gmra.mxu0 %vm235_vm2, %v1448_v43 }
  0xf4   :  { %v5402_v3 = vadd.f32 %v576_v25, %v363_v11  ;;  %1612 = vmatprep.mubr.bf16.mxu0 %v6677_v1  ;;  %v1450_v11 = vpack.c.bf16 %v1400_v46, %v1397_v42 }
  0xf5   :  { %v365_v4 = vpop.f32.mrf.mxu0  ;;  %v578_v34 = vpop.f32.mrf.mxu1 }
  0xf6   :  { %v5407_v5 = vadd.f32 %v578_v34, %v365_v4 }
  0xf7   :  { %v367_v35 = vpop.f32.mrf.mxu0  ;;  %v580_v22 = vpop.f32.mrf.mxu1 }
  0xf8   :  { %v5409_v31 = vadd.f32 %v580_v22, %v367_v35 }
  0xf9   :  { %v5414_v52 = vpop.f32.mrf.mxu0  ;;  %v5416_v0 = vpop.f32.mrf.mxu1 }
  0xfa   :  { %6685 = vst [vmem:[#allocation7_spill] sm:$0xff] %v5414_v52  ;;  %6686 = vst [vmem:[#allocation8_spill] sm:$0xff] %v5416_v0 }
  0xfb   :  { %v373_v38 = vpop.f32.mrf.mxu0  ;;  %v586_v23 = vpop.f32.mrf.mxu1  ;;  %4049 = vmatmul.mubr.msk.bf16.gmra.mxu0 %vm235_vm2, %v1449_v26  ;;  %v1402_v26 = vsel %vm1362_vm4, %v1399_v45, %v1401_v10 }
  0xfc   :  { %v5419_v24 = vadd.f32 %v586_v23, %v373_v38  ;;  %1622 = vmatprep.mubr.bf16.mxu0 %v6677_v1  ;;  %v1451_v42 = vpack.c.bf16 %v1404_v28, %v1402_v26 }
  0xfd   :  { %v375_v43 = vpop.f32.mrf.mxu0  ;;  %v588_v47 = vpop.f32.mrf.mxu1 }
  0xfe   :  { %v5424_v8 = vadd.f32 %v588_v47, %v375_v43  ;;  %v1405_v43 = vrot.slane %v5053_v16, 4  ;;  %v1406_v47 = vrot.slane %v5058_v17, 4 }
  0xff   :  { %v377_v48 = vpop.f32.mrf.mxu0  ;;  %v590_v15 = vpop.f32.mrf.mxu1 }
 0x100   :  { %v5426_v25 = vadd.f32 %v590_v15, %v377_v48  ;;  %v1408_v48 = vrot.slane %v5063_v20, 4 }
 0x101   :  { %v5430_v4 = vpop.f32.mrf.mxu0  ;;  %v5432_v34 = vpop.f32.mrf.mxu1 }
 0x102   :  { %v1409_v16 = vsel %vm1362_vm4, %v1406_v47, %v1408_v48 }
 0x103   :  { %v383_v18 = vpop.f32.mrf.mxu0  ;;  %v596_v35 = vpop.f32.mrf.mxu1  ;;  %4050 = vmatmul.mubr.msk.bf16.gmra.mxu0 %vm235_vm2, %v1450_v11 }
 0x104   :  { %v5435_v22 = vadd.f32 %v596_v35, %v383_v18  ;;  %1632 = vmatprep.mubr.bf16.mxu0 %v6677_v1  ;;  %v1407_v18 = vsel %vm1362_vm4, %v1405_v43, %v1406_v47 }
 0x105   :  { %v385_v39 = vpop.f32.mrf.mxu0  ;;  %v598_v56 = vpop.f32.mrf.mxu1 }
 0x106   :  { %v5440_v38 = vadd.f32 %v598_v56, %v385_v39  ;;  %v1452_v39 = vpack.c.bf16 %v1409_v16, %v1407_v18 }
 0x107   :  { %v387_v58 = vpop.f32.mrf.mxu0  ;;  %v600_v23 = vpop.f32.mrf.mxu1 }
 0x108   :  { %v5442_v46 = vadd.f32 %v600_v23, %v387_v58  ;;  %v1410_v58 = vrot.slane %v5092_v40, 4  ;;  %v1412_v23 = vrot.slane %v5097_v41, 4 }
 0x109   :  { %v5447_v15 = vpop.f32.mrf.mxu0  ;;  %v5449_v45 = vpop.f32.mrf.mxu1 }
 0x10a   :  { %v1411_v18 = vsel %vm1362_vm4, %v1408_v48, %v1410_v58 }
 0x10b   :  { %v393_v11 = vpop.f32.mrf.mxu0  ;;  %v606_v10 = vpop.f32.mrf.mxu1  ;;  %4051 = vmatmul.mubr.msk.bf16.gmra.mxu0 %vm235_vm2, %v1451_v42  ;;  %v1413_v42 = vrot.slane %v5102_v44, 4 }
 0x10c   :  { %v5452_v33 = vadd.f32 %v606_v10, %v393_v11  ;;  %1642 = vmatprep.mubr.bf16.mxu0 %v6677_v1 }
 0x10d   :  { %v395_v35 = vpop.f32.mrf.mxu0  ;;  %v608_v17 = vpop.f32.mrf.mxu1  ;;  %v1414_v40 = vsel %vm1362_vm4, %v1412_v23, %v1413_v42 }
 0x10e   :  { %v5457_v26 = vadd.f32 %v608_v17, %v395_v35 }
 0x10f   :  { %v397_v20 = vpop.f32.mrf.mxu0  ;;  %v610_v28 = vpop.f32.mrf.mxu1 }
 0x110   :  { %v5459_v56 = vadd.f32 %v610_v28, %v397_v20  ;;  %v1453_v28 = vpack.c.bf16 %v1414_v40, %v1411_v18 }
 0x111   :  { %v5464_v11 = vpop.f32.mrf.mxu0  ;;  %v5466_v43 = vpop.f32.mrf.mxu1 }
 0x112   :  { %6687 = vst [vmem:[#allocation9_spill] sm:$0xff] %v5464_v11  ;;  %6688 = vst [vmem:[#allocation10_spill] sm:$0xff] %v5466_v43  ;;  %v1415_v11 = vrot.slane %v5118_v55, 4 }
 0x113   :  { %v403_v47 = vpop.f32.mrf.mxu0  ;;  %v616_v10 = vpop.f32.mrf.mxu1  ;;  %4052 = vmatmul.mubr.msk.bf16.gmra.mxu0 %vm235_vm2, %v1452_v39  ;;  %v1417_v39 = vrot.slane %v5123_v59, 4 }
 0x114   :  { %v5469_v35 = vadd.f32 %v616_v10, %v403_v47  ;;  %1652 = vmatprep.mubr.bf16.mxu0 %v6677_v1  ;;  %v1416_v18 = vsel %vm1362_vm4, %v1413_v42, %v1415_v11 }
 0x115   :  { %v405_v16 = vpop.f32.mrf.mxu0  ;;  %v618_v41 = vpop.f32.mrf.mxu1  ;;  %v1418_v40 = vsel %vm1362_vm4, %v1415_v11, %v1417_v39 }
 0x116   :  { %v5474_v17 = vadd.f32 %v618_v41, %v405_v16 }
 0x117   :  { %v407_v44 = vpop.f32.mrf.mxu0  ;;  %v620_v20 = vpop.f32.mrf.mxu1 }
 0x118   :  { %v5476_v43 = vadd.f32 %v620_v20, %v407_v44  ;;  %v1454_v20 = vpack.c.bf16 %v1418_v40, %v1416_v18 }
 0x119   :  { %v5480_v47 = vpop.f32.mrf.mxu0  ;;  %v5482_v10 = vpop.f32.mrf.mxu1 }
 0x11a   :  { %6689 = vst [vmem:[#allocation11_spill] sm:$0xff] %v5480_v47  ;;  %6690 = vst [vmem:[#allocation12_spill] sm:$0xff] %v5482_v10 }
 0x11b   :  { %v413_v48 = vpop.f32.mrf.mxu0  ;;  %v626_v58 = vpop.f32.mrf.mxu1  ;;  %4053 = vmatmul.mubr.msk.bf16.gmra.mxu0 %vm235_vm2, %v1453_v28 }
 0x11c   :  { %v5485_v23 = vadd.f32 %v626_v58, %v413_v48  ;;  %1662 = vmatprep.mubr.bf16.mxu0 %v6677_v1 }
 0x11d   :  { %v415_v16 = vpop.f32.mrf.mxu0  ;;  %v628_v55 = vpop.f32.mrf.mxu1 }
 0x11e   :  { %v5490_v41 = vadd.f32 %v628_v55, %v415_v16 }
 0x11f   :  { %v417_v59 = vpop.f32.mrf.mxu0  ;;  %v630_v44 = vpop.f32.mrf.mxu1 }
 0x120   :  { %v5492_v10 = vadd.f32 %v630_v44, %v417_v59 }
 0x121   :  { %v5494_v47 = vpop.f32.mrf.mxu0  ;;  %v5496_v28 = vpop.f32.mrf.mxu1 }
 0x122   :  { %6691 = vst [vmem:[#allocation13_spill] sm:$0xff] %v5494_v47  ;;  %6692 = vst [vmem:[#allocation14_spill] sm:$0xff] %v5496_v28 }
 0x123   :  { %v423_v48 = vpop.f32.mrf.mxu0  ;;  %v636_v58 = vpop.f32.mrf.mxu1  ;;  %4054 = vmatmul.mubr.msk.bf16.gmra.mxu0 %vm235_vm2, %v1454_v20 }
 0x124   :  { %v5499_v42 = vadd.f32 %v636_v58, %v423_v48  ;;  %2605 = vmatprep.mubr.bf16.mxu0 %v6677_v1 }
 0x125   :  { %v425_v11 = vpop.f32.mrf.mxu0  ;;  %v638_v39 = vpop.f32.mrf.mxu1 }
 0x126   :  { %v5502_v16 = vadd.f32 %v638_v39, %v425_v11 }
 0x127   :  { %v427_v55 = vpop.f32.mrf.mxu0  ;;  %v640_v18 = vpop.f32.mrf.mxu1 }
 0x128   :  { %v5504_v40 = vadd.f32 %v640_v18, %v427_v55 }
 0x129   :  { %v5506_v59 = vpop.f32.mrf.mxu0  ;;  %v5508_v44 = vpop.f32.mrf.mxu1 }
 0x12a   :  { %6693 = vst [vmem:[#allocation15_spill] sm:$0xff] %v5506_v59  ;;  %6694 = vst [vmem:[#allocation16_spill] sm:$0xff] %v5508_v44 }
 0x12b   :  { %v836_v28 = vpop.f32.mrf.mxu0  ;;  %v1195_v47 = vpop.f32.mrf.mxu1 }
 0x12c   :  { %v955_v20 = vadd.f32 %v836_v28, %v5317_v9 }
 0x12d   :  { %v838_v48 = vpop.f32.mrf.mxu0  ;;  %v1197_v58 = vpop.f32.mrf.mxu1 }
 0x12e   :  { %v956_v1 = vadd.f32 %v838_v48, %v5324_v19  ;;  %v5512_v0 = vadd.f32 %v1195_v47, %v955_v20 }
 0x12f   :  { %v840_v11 = vpop.f32.mrf.mxu0  ;;  %v1199_v39 = vpop.f32.mrf.mxu1 }
 0x130   :  { %v957_v52 = vadd.f32 %v840_v11, %v5326_v36  ;;  %v5515_v55 = vadd.f32 %v1197_v58, %v956_v1 }
 0x131   :  { %v5517_v18 = vpop.f32.mrf.mxu0  ;;  %v5519_v59 = vpop.f32.mrf.mxu1 }
 0x132   :  { %v5521_v44 = vadd.f32 %v1199_v39, %v957_v52 }
 0x133   :  { %v846_v54 = vpop.f32.mrf.mxu0  ;;  %v1205_v9 = vpop.f32.mrf.mxu1 }
 0x134   :  { %v959_v28 = vadd.f32 %v846_v54, %v5335_v14 }
 0x135   :  { %v848_v62 = vpop.f32.mrf.mxu0  ;;  %v1207_v19 = vpop.f32.mrf.mxu1 }
 0x136   :  { %v960_v47 = vadd.f32 %v848_v62, %v5340_v27  ;;  %v5525_v20 = vadd.f32 %v1205_v9, %v959_v28 }
 0x137   :  { %v850_v48 = vpop.f32.mrf.mxu0  ;;  %v1209_v36 = vpop.f32.mrf.mxu1 }
 0x138   :  { %v961_v1 = vadd.f32 %v850_v48, %v5342_v32  ;;  %v5528_v58 = vadd.f32 %v1207_v19, %v960_v47 }
 0x139   :  { %v5530_v11 = vpop.f32.mrf.mxu0  ;;  %v5532_v52 = vpop.f32.mrf.mxu1 }
 0x13a   :  { %v5534_v39 = vadd.f32 %v1209_v36, %v961_v1 }
 0x13b   :  { %v856_v37 = vpop.f32.mrf.mxu0  ;;  %v1215_v14 = vpop.f32.mrf.mxu1 }
 0x13c   :  { %v963_v54 = vadd.f32 %v856_v37, %v5352_v63 }
 0x13d   :  { %v858_v29 = vpop.f32.mrf.mxu0  ;;  %v1217_v27 = vpop.f32.mrf.mxu1 }
 0x13e   :  { %v964_v62 = vadd.f32 %v858_v29, %v5357_v7  ;;  %v5538_v9 = vadd.f32 %v1215_v14, %v963_v54 }
 0x13f   :  { %v860_v28 = vpop.f32.mrf.mxu0  ;;  %v1219_v32 = vpop.f32.mrf.mxu1 }
 0x140   :  { %v965_v19 = vadd.f32 %v860_v28, %v5359_v53  ;;  %v5541_v47 = vadd.f32 %v1217_v27, %v964_v62 }
 0x141   :  { %v5543_v48 = vpop.f32.mrf.mxu0 }
 0x142   :  { %v5545_v36 = vadd.f32 %v1219_v32, %v965_v19  ;;  %v5572_v19 = vpop.f32.mrf.mxu1 }
 0x143   :  { %v866_v1 = vpop.f32.mrf.mxu0 }
 0x144   :  { %v5548_v60 = vadd.f32 %v866_v1, %v5369_v12 }
 0x145   :  { %v868_v63 = vpop.f32.mrf.mxu0 }
 0x146   :  { %v5551_v37 = vadd.f32 %v868_v63, %v5374_v21 }
 0x147   :  { %v870_v7 = vpop.f32.mrf.mxu0 }
 0x148   :  { %v5554_v29 = vadd.f32 %v870_v7, %v5376_v30  ;;  %v5580_v7 = vpop.f32.mrf.mxu1 }
 0x149   :  { %v5556_v14 = vpop.f32.mrf.mxu0 }
 0x14b   :  { %v876_v53 = vpop.f32.mrf.mxu0 }
 0x14c   :  { %v5559_v54 = vadd.f32 %v876_v53, %v5385_v51 }
 0x14d   :  { %v878_v27 = vpop.f32.mrf.mxu0 }
 0x14e   :  { %v5562_v62 = vadd.f32 %v878_v27, %v5390_v6 }
 0x14f   :  { %v880_v12 = vpop.f32.mrf.mxu0 }
 0x150   :  { %v5565_v28 = vadd.f32 %v880_v12, %v5392_v57 }
 0x151   :  { %v5567_v21 = vpop.f32.mrf.mxu0 }
 0x153   :  { %v886_v32 = vpop.f32.mrf.mxu0 }
 0x154   :  { %v5570_v30 = vadd.f32 %v886_v32, %v5402_v3  ;;  %v5587_v3 = vpop.f32.mrf.mxu1 }
 0x155   :  { %v888_v1 = vpop.f32.mrf.mxu0 }
 0x156   :  { %v5575_v51 = vadd.f32 %v888_v1, %v5407_v5  ;;  %v593_v1 = vadd.f32 %v5432_v34, %v5430_v4 }
 0x157   :  { %v890_v63 = vpop.f32.mrf.mxu0 }
 0x158   :  { %v5578_v6 = vadd.f32 %v890_v63, %v5409_v31  ;;  %v5597_v63 = vpop.f32.mrf.mxu1 }
 0x159   :  { %v5582_v57 = vpop.f32.mrf.mxu0 }
 0x15a   :  { %6695 = vst [vmem:[#allocation17_spill] sm:$0xff] %v5578_v6  ;;  %6696 = vst [vmem:[#allocation18_spill] sm:$0xff] %v5582_v57 }
 0x15b   :  { %v896_v53 = vpop.f32.mrf.mxu0 }
 0x15c   :  { %v5585_v27 = vadd.f32 %v896_v53, %v5419_v24 }
 0x15d   :  { %v898_v12 = vpop.f32.mrf.mxu0 }
 0x15e   :  { %6697 = vst [vmem:[#allocation19_spill] sm:$0xff] %v5585_v27  ;;  %v5590_v32 = vadd.f32 %v898_v12, %v5424_v8  ;;  %v5604_v27 = vpop.f32.mrf.mxu1 }
 0x15f   :  { %v900_v5 = vpop.f32.mrf.mxu0 }
 0x160   :  { %6698 = vst [vmem:[#allocation20_spill] sm:$0xff] %v5590_v32  ;;  %v5595_v31 = vadd.f32 %v900_v5, %v5426_v25  ;;  %v603_v25 = vadd.f32 %v5449_v45, %v5447_v15  ;;  %v5614_v34 = vpop.f32.mrf.mxu1 }
 0x161   :  { %v902_v6 = vpop.f32.mrf.mxu0 }
 0x162   :  { %v5599_v57 = vadd.f32 %v902_v6, %v593_v1 }
 0x163   :  { %v906_v24 = vpop.f32.mrf.mxu0 }
 0x164   :  { %v5602_v53 = vadd.f32 %v906_v24, %v5435_v22  ;;  %v5621_v24 = vpop.f32.mrf.mxu1 }
 0x165   :  { %v908_v8 = vpop.f32.mrf.mxu0 }
 0x166   :  { %v5607_v12 = vadd.f32 %v908_v8, %v5440_v38 }
 0x167   :  { %v910_v32 = vpop.f32.mrf.mxu0 }
 0x168   :  { %6699 = vst [vmem:[#allocation21_spill] sm:$0xff] %v5607_v12  ;;  %v5612_v4 = vadd.f32 %v910_v32, %v5442_v46  ;;  %v5629_v46 = vpop.f32.mrf.mxu1 }
 0x169   :  { %v912_v6 = vpop.f32.mrf.mxu0 }
 0x16a   :  { %v5616_v5 = vadd.f32 %v912_v6, %v603_v25 }
 0x16b   :  { %v916_v22 = vpop.f32.mrf.mxu0 }
 0x16c   :  { %v5619_v1 = vadd.f32 %v916_v22, %v5452_v33  ;;  %v5636_v33 = vpop.f32.mrf.mxu1 }
 0x16d   :  { %v918_v38 = vpop.f32.mrf.mxu0 }
 0x16e   :  { %v5624_v8 = vadd.f32 %v918_v38, %v5457_v26 }
 0x16f   :  { %v920_v12 = vpop.f32.mrf.mxu0 }
 0x170   :  { %v5627_v15 = vadd.f32 %v920_v12, %v5459_v56  ;;  %v5644_v56 = vpop.f32.mrf.mxu1 }
 0x171   :  { %v5631_v45 = vpop.f32.mrf.mxu0 }
 0x172   :  { %6700 = vst [vmem:[#allocation22_spill] sm:$0xff] %v5627_v15  ;;  %6701 = vst [vmem:[#allocation23_spill] sm:$0xff] %v5631_v45 }
 0x173   :  { %v926_v32 = vpop.f32.mrf.mxu0 }
 0x174   :  { %v5634_v25 = vadd.f32 %v926_v32, %v5469_v35  ;;  %v5651_v35 = vpop.f32.mrf.mxu1 }
 0x175   :  { %v928_v6 = vpop.f32.mrf.mxu0 }
 0x176   :  { %6702 = vst [vmem:[#allocation24_spill] sm:$0xff] %v5634_v25  ;;  %v5639_v22 = vadd.f32 %v928_v6, %v5474_v17 }
 0x177   :  { %v930_v26 = vpop.f32.mrf.mxu0 }
 0x178   :  { %v5642_v38 = vadd.f32 %v930_v26, %v5476_v43  ;;  %v5659_v43 = vpop.f32.mrf.mxu1 }
 0x179   :  { %v5646_v12 = vpop.f32.mrf.mxu0 }
 0x17a   :  { %6703 = vst [vmem:[#allocation25_spill] sm:$0xff] %v5642_v38  ;;  %6704 = vst [vmem:[#allocation26_spill] sm:$0xff] %v5646_v12 }
 0x17b   :  { %v936_v15 = vpop.f32.mrf.mxu0 }
 0x17c   :  { %v5649_v45 = vadd.f32 %v936_v15, %v5485_v23  ;;  %v5666_v23 = vpop.f32.mrf.mxu1 }
 0x17d   :  { %v938_v32 = vpop.f32.mrf.mxu0 }
 0x17e   :  { %6705 = vst [vmem:[#allocation27_spill] sm:$0xff] %v5649_v45  ;;  %v5654_v25 = vadd.f32 %v938_v32, %v5490_v41 }
 0x17f   :  { %v940_v17 = vpop.f32.mrf.mxu0 }
 0x180   :  { %6706 = vst [vmem:[#allocation28_spill] sm:$0xff] %v5654_v25  ;;  %v5657_v6 = vadd.f32 %v940_v17, %v5492_v10  ;;  %v4419_v10 = vld [vmem:[%s6667_s5 + $0x4] ss:$8 sps:$4 sm:$0xff]   ;;  %v5677_v17 = vpop.f32.mrf.mxu1 }
 0x181   :  { %v5661_v26 = vpop.f32.mrf.mxu0  ;;  %4072 = vmatprep.mubr.msk.bf16.mxu1 %vm1995_vm5, %v4419_v10 }
 0x182   :  { %6707 = vst [vmem:[#allocation29_spill] sm:$0xff] %v5657_v6  ;;  %6708 = vst [vmem:[#allocation30_spill] sm:$0xff] %v5661_v26 }
 0x183   :  { %v946_v38 = vpop.f32.mrf.mxu0 }
 0x184   :  { %v5664_v12 = vadd.f32 %v946_v38, %v5499_v42  ;;  %v533_v42 = vadd.f32 %v5332_v13, %v5330_v2  ;;  %v543_v2 = vadd.f32 %v5349_v50, %v5347_v49 }
 0x185   :  { %v948_v15 = vpop.f32.mrf.mxu0 }
 0x186   :  { %6709 = vst [vmem:[#allocation31_spill] sm:$0xff] %v5664_v12  ;;  %v5669_v45 = vadd.f32 %v948_v15, %v5502_v16  ;;  %v958_v38 = vadd.f32 %v5517_v18, %v533_v42 }
 0x187   :  { %v950_v41 = vpop.f32.mrf.mxu0 }
 0x188   :  { %6710 = vst [vmem:[#allocation32_spill] sm:$0xff] %v5669_v45  ;;  %v5672_v32 = vadd.f32 %v950_v41, %v5504_v40  ;;  %v5686_v40 = vpop.f32.mrf.mxu1  ;;  %v1317_v12 = vadd.f32 %v5519_v59, %v958_v38 }
 0x189   :  { %v5679_v6 = vpop.f32.mrf.mxu0 }
 0x18a   :  { %6711 = vst [vmem:[#allocation33_spill] sm:$0xff] %v5672_v32  ;;  %6712 = vst [vmem:[#allocation34_spill] sm:$0xff] %v5679_v6  ;;  %v5693_v13 = vpop.f32.mrf.mxu1 }
 0x18b   :  { %v1554_v16 = vpop.f32.mrf.mxu0 }
 0x18c   :  { %v1673_v15 = vadd.f32 %v1554_v16, %v5512_v0  ;;  %v5698_v0 = vld [vmem:[%s6668_s2] ss:$0 sm:$0xff] }
 0x18d   :  { %v1556_v41 = vpop.f32.mrf.mxu0 }
 0x18e   :  { %v1674_v32 = vadd.f32 %v1556_v41, %v5515_v55  ;;  %v962_v55 = vadd.f32 %v5530_v11, %v543_v2 }
 0x18f   :  { %v1558_v45 = vpop.f32.mrf.mxu0 }
 0x190   :  { %v1721_v26 = vmax.f32 %v1673_v15, %v1674_v32  ;;  %v1675_v6 = vadd.f32 %v1558_v45, %v5521_v44  ;;  %v5703_v45 = vpop.f32.mrf.mxu1  ;;  %v1321_v38 = vadd.f32 %v5532_v52, %v962_v55 }
 0x191   :  { %v1560_v18 = vpop.f32.mrf.mxu0 }
 0x192   :  { %v1676_v10 = vadd.f32 %v1560_v18, %v1317_v12  ;;  %v1752_v59 = vadd.f32 %v5698_v0, %v1721_v26  ;;  %v5709_v2 = vpop.f32.mrf.mxu1 }
 0x193   :  { %v1564_v42 = vpop.f32.mrf.mxu0 }
 0x194   :  { %v1722_v32 = vmax.f32 %v1675_v6, %v1676_v10  ;;  %v1677_v44 = vadd.f32 %v1564_v42, %v5525_v20  ;;  %v1800_v41 = vrot.slane %v1752_v59, 1  ;;  %v6713_v20 = vld [vmem:[#allocation2_spill] sm:$0xff] }
 0x195   :  { %v1566_v49 = vpop.f32.mrf.mxu0  ;;  %v553_v26 = vadd.f32 %v6713_v20, %v5364_v61 }
 0x196   :  { %v1753_v50 = vadd.f32 %v5698_v0, %v1722_v32  ;;  %v1678_v16 = vadd.f32 %v1566_v49, %v5528_v58 }
 0x197   :  { %v1568_v15 = vpop.f32.mrf.mxu0  ;;  %v966_v52 = vadd.f32 %v5543_v48, %v553_v26 }
 0x198   :  { %v1801_v12 = vrot.slane %v1753_v50, 1  ;;  %v1723_v18 = vmax.f32 %v1677_v44, %v1678_v16  ;;  %v1679_v11 = vadd.f32 %v1568_v15, %v5534_v39  ;;  %v5717_v39 = vpop.f32.mrf.mxu1 }
 0x199   :  { %v1570_v6 = vpop.f32.mrf.mxu0 }
 0x19a   :  { %v1754_v10 = vadd.f32 %v5698_v0, %v1723_v18  ;;  %v1680_v42 = vadd.f32 %v1570_v6, %v1321_v38  ;;  %v1802_v32 = vsel %vm119_vm1, %v1800_v41, %v1801_v12  ;;  %v1325_v41 = vadd.f32 %v5572_v19, %v966_v52 }
 0x19b   :  { %v1574_v58 = vpop.f32.mrf.mxu0  ;;  %v1871_v49 = vmax.f32 %v1752_v59, %v1802_v32  ;;  %v6715_v32 = vld [vmem:[#allocation4_spill] sm:$0xff]  ;;  %v1326_v19 = vadd.f32 %v5580_v7, %v5548_v60  ;;  %v1328_v7 = vadd.f32 %v5597_v63, %v5554_v29  ;;  %v1330_v29 = vadd.f32 %v5614_v34, %v5559_v54 }
 0x19c   :  { %v1803_v55 = vrot.slane %v1754_v10, 1  ;;  %v1724_v25 = vmax.f32 %v1679_v11, %v1680_v42  ;;  %v1681_v44 = vadd.f32 %v1574_v58, %v5538_v9  ;;  %v5724_v11 = vpop.f32.mrf.mxu1  ;;  %v6714_v42 = vld [vmem:[#allocation3_spill] sm:$0xff]  ;;  %v1332_v34 = vadd.f32 %v5629_v46, %v5565_v28 }
 0x19d   :  { %v1576_v16 = vpop.f32.mrf.mxu0  ;;  %v1334_v28 = vadd.f32 %v5644_v56, %v5570_v30  ;;  %v6721_v56 = vld [vmem:[#allocation17_spill] sm:$0xff] }
 0x19e   :  { %v1755_v15 = vadd.f32 %v5698_v0, %v1724_v25  ;;  %v1682_v61 = vadd.f32 %v1576_v16, %v5541_v47  ;;  %v1804_v18 = vsel %vm119_vm1, %v1801_v12, %v1803_v55  ;;  %v563_v25 = vadd.f32 %v6715_v32, %v6714_v42 }
 0x19f   :  { %v1578_v38 = vpop.f32.mrf.mxu0  ;;  %v1872_v6 = vmax.f32 %v1753_v50, %v1804_v18 }
 0x1a0   :  { %v1805_v59 = vrot.slane %v1755_v15, 1  ;;  %v1725_v20 = vmax.f32 %v1681_v44, %v1682_v61  ;;  %v1683_v48 = vadd.f32 %v1578_v38, %v5545_v36  ;;  %v1327_v36 = vadd.f32 %v5587_v3, %v5551_v37  ;;  %v5737_v61 = vpop.f32.mrf.mxu1 }
 0x1a1   :  { %v1580_v9 = vpop.f32.mrf.mxu0  ;;  %v5726_v26 = vpack.c.bf16 %v1872_v6, %v1871_v49  ;;  %v970_v44 = vadd.f32 %v5556_v14, %v563_v25 }
 0x1a2   :  { %v1756_v47 = vadd.f32 %v5698_v0, %v1725_v20  ;;  %v1684_v58 = vadd.f32 %v1580_v9, %v1325_v41  ;;  %v1806_v12 = vsel %vm119_vm1, %v1803_v55, %v1805_v59  ;;  %v5746_v42 = vpop.f32.mrf.mxu1 }
 0x1a3   :  { %v1584_v50 = vpop.f32.mrf.mxu0  ;;  %v1873_v52 = vmax.f32 %v1754_v10, %v1806_v12  ;;  %v1329_v37 = vadd.f32 %v5604_v27, %v970_v44  ;;  %v6716_v10 = vld [vmem:[#allocation5_spill] sm:$0xff] }
 0x1a4   :  { %v1807_v49 = vrot.slane %v1756_v47, 1  ;;  %v1726_v16 = vmax.f32 %v1683_v48, %v1684_v58  ;;  %v1685_v6 = vadd.f32 %v1584_v50, %v1326_v19  ;;  %v6717_v48 = vld [vmem:[#allocation6_spill] sm:$0xff]  ;;  %v1331_v19 = vadd.f32 %v5621_v24, %v5562_v62 }
 0x1a5   :  { %v1586_v18 = vpop.f32.mrf.mxu0  ;;  %v573_v9 = vadd.f32 %v6717_v48, %v6716_v10 }
 0x1a6   :  { %v1757_v38 = vadd.f32 %v5698_v0, %v1726_v16  ;;  %v1686_v41 = vadd.f32 %v1586_v18, %v1327_v36  ;;  %v1808_v55 = vsel %vm119_vm1, %v1805_v59, %v1807_v49 }
 0x1a7   :  { %v1588_v20 = vpop.f32.mrf.mxu0  ;;  %v1874_v60 = vmax.f32 %v1755_v15, %v1808_v55  ;;  %v974_v50 = vadd.f32 %v5567_v21, %v573_v9  ;;  %v1335_v9 = vadd.f32 %v5651_v35, %v5575_v51 }
 0x1a8   :  { %v1809_v3 = vrot.slane %v1757_v38, 1  ;;  %v1727_v14 = vmax.f32 %v1685_v6, %v1686_v41  ;;  %v1687_v59 = vadd.f32 %v1588_v20, %v1328_v7  ;;  %v6719_v20 = vld [vmem:[#allocation8_spill] sm:$0xff] }
 0x1a9   :  { %v1590_v32 = vpop.f32.mrf.mxu0  ;;  %v5748_v25 = vpack.c.bf16 %v1874_v60, %v1873_v52  ;;  %v5757_v52 = vpop.f32.mrf.mxu1  ;;  %v1333_v62 = vadd.f32 %v5636_v33, %v974_v50 }
 0x1aa   :  { %v1758_v58 = vadd.f32 %v5698_v0, %v1727_v14  ;;  %v1688_v12 = vadd.f32 %v1590_v32, %v1329_v37  ;;  %v1810_v15 = vsel %vm119_vm1, %v1807_v49, %v1809_v3  ;;  %v6720_v32 = vld [vmem:[#allocation18_spill] sm:$0xff] }
 0x1ab   :  { %v1594_v27 = vpop.f32.mrf.mxu0  ;;  %v1875_v63 = vmax.f32 %v1756_v47, %v1810_v15  ;;  %v6718_v47 = vld [vmem:[#allocation7_spill] sm:$0xff]  ;;  %v5766_v7 = vpop.f32.mrf.mxu1 }
 0x1ac   :  { %v1811_v36 = vrot.slane %v1758_v58, 1  ;;  %v1728_v44 = vmax.f32 %v1687_v59, %v1688_v12  ;;  %v1689_v6 = vadd.f32 %v1594_v27, %v1330_v29  ;;  %v583_v60 = vadd.f32 %v6719_v20, %v6718_v47  ;;  %v6723_v47 = vld [vmem:[#allocation20_spill] sm:$0xff] }
 0x1ad   :  { %v1596_v16 = vpop.f32.mrf.mxu0  ;;  %v5777_v29 = vpop.f32.mrf.mxu1 }
 0x1ae   :  { %v1759_v18 = vadd.f32 %v5698_v0, %v1728_v44  ;;  %v1690_v41 = vadd.f32 %v1596_v16, %v1331_v19  ;;  %v1812_v49 = vsel %vm119_vm1, %v1809_v3, %v1811_v36  ;;  %v978_v59 = vadd.f32 %v6720_v32, %v583_v60 }
 0x1af   :  { %v1598_v55 = vpop.f32.mrf.mxu0  ;;  %v1876_v54 = vmax.f32 %v1757_v38, %v1812_v49 }
 0x1b0   :  { %v1813_v24 = vrot.slane %v1759_v18, 1  ;;  %v1729_v21 = vmax.f32 %v1689_v6, %v1690_v41  ;;  %v1691_v3 = vadd.f32 %v1598_v55, %v1332_v34  ;;  %v1337_v51 = vadd.f32 %v5666_v23, %v978_v59  ;;  %v5784_v6 = vpop.f32.mrf.mxu1 }
 0x1b1   :  { %v1600_v37 = vpop.f32.mrf.mxu0  ;;  %v5768_v14 = vpack.c.bf16 %v1876_v54, %v1875_v63  ;;  %v1339_v23 = vadd.f32 %v5686_v40, %v6723_v47 }
 0x1b2   :  { %v1760_v10 = vadd.f32 %v5698_v0, %v1729_v21  ;;  %v1692_v48 = vadd.f32 %v1600_v37, %v1333_v62  ;;  %v1814_v38 = vsel %vm119_vm1, %v1811_v36, %v1813_v24  ;;  %v6722_v21 = vld [vmem:[#allocation19_spill] sm:$0xff]  ;;  %v5794_v37 = vpop.f32.mrf.mxu1 }
 0x1b3   :  { %v1604_v46 = vpop.f32.mrf.mxu0  ;;  %v1877_v33 = vmax.f32 %v1758_v58, %v1814_v38  ;;  %v1336_v58 = vadd.f32 %v5659_v43, %v6721_v56  ;;  %v1338_v43 = vadd.f32 %v5677_v17, %v6722_v21  ;;  %v1341_v17 = vadd.f32 %v5703_v45, %v5599_v57 }
 0x1b4   :  { %v1815_v12 = vrot.slane %v1760_v10, 1  ;;  %v1730_v15 = vmax.f32 %v1691_v3, %v1692_v48  ;;  %v1693_v19 = vadd.f32 %v1604_v46, %v1334_v28  ;;  %v5802_v59 = vpop.f32.mrf.mxu1 }
 0x1b5   :  { %v1606_v27 = vpop.f32.mrf.mxu0 }
 0x1b6   :  { %v1761_v63 = vadd.f32 %v5698_v0, %v1730_v15  ;;  %v1694_v50 = vadd.f32 %v1606_v27, %v1335_v9  ;;  %v1816_v36 = vsel %vm119_vm1, %v1813_v24, %v1815_v12  ;;  %v5812_v56 = vpop.f32.mrf.mxu1 }
 0x1b7   :  { %v1608_v44 = vpop.f32.mrf.mxu0  ;;  %v1878_v30 = vmax.f32 %v1759_v18, %v1816_v36 }
 0x1b8   :  { %v1817_v35 = vrot.slane %v1761_v63, 1  ;;  %v1731_v16 = vmax.f32 %v1693_v19, %v1694_v50  ;;  %v1695_v54 = vadd.f32 %v1608_v44, %v1336_v58  ;;  %v1295_v21 = vpop.f32.mrf.mxu1 }
 0x1b9   :  { %v1610_v41 = vpop.f32.mrf.mxu0  ;;  %v5786_v49 = vpack.c.bf16 %v1878_v30, %v1877_v33 }
 0x1ba   :  { %v1762_v55 = vadd.f32 %v5698_v0, %v1731_v16  ;;  %v1696_v34 = vadd.f32 %v1610_v41, %v1337_v51  ;;  %v1818_v62 = vsel %vm119_vm1, %v1815_v12, %v1817_v35 }
 0x1bb   :  { %v1614_v24 = vpop.f32.mrf.mxu0  ;;  %v1879_v18 = vmax.f32 %v1760_v10, %v1818_v62  ;;  %v1340_v10 = vadd.f32 %v5693_v13, %v5595_v31  ;;  %v1342_v31 = vadd.f32 %v5709_v2, %v5602_v53  ;;  %v6724_v13 = vld [vmem:[#allocation21_spill] sm:$0xff]  ;;  %v1345_v53 = vadd.f32 %v5737_v61, %v5616_v5 }
 0x1bc   :  { %v1819_v20 = vrot.slane %v1762_v55, 1  ;;  %v1732_v60 = vmax.f32 %v1695_v54, %v1696_v34  ;;  %v1697_v38 = vadd.f32 %v1614_v24, %v1338_v43  ;;  %v1343_v57 = vadd.f32 %v5717_v39, %v6724_v13  ;;  %v6725_v62 = vld [vmem:[#allocation9_spill] sm:$0xff]  ;;  %v6726_v24 = vld [vmem:[#allocation10_spill] sm:$0xff] }
 0x1bd   :  { %v1616_v3 = vpop.f32.mrf.mxu0  ;;  %v1347_v61 = vadd.f32 %v5757_v52, %v5624_v8 }
 0x1be   :  { %v1763_v48 = vadd.f32 %v5698_v0, %v1732_v60  ;;  %v1698_v28 = vadd.f32 %v1616_v3, %v1339_v23  ;;  %v1820_v46 = vsel %vm119_vm1, %v1817_v35, %v1819_v20 }
 0x1bf   :  { %v1618_v33 = vpop.f32.mrf.mxu0  ;;  %v1880_v9 = vmax.f32 %v1761_v63, %v1820_v46 }
 0x1c0   :  { %v1821_v40 = vrot.slane %v1763_v48, 1  ;;  %v1733_v32 = vmax.f32 %v1697_v38, %v1698_v28  ;;  %v1699_v19 = vadd.f32 %v1618_v33, %v1340_v10  ;;  %v1297_v33 = vpop.f32.mrf.mxu1 }
 0x1c1   :  { %v1620_v12 = vpop.f32.mrf.mxu0  ;;  %v5804_v15 = vpack.c.bf16 %v1880_v9, %v1879_v18  ;;  %v613_v18 = vadd.f32 %v6726_v24, %v6725_v62 }
 0x1c2   :  { %v1764_v27 = vadd.f32 %v5698_v0, %v1733_v32  ;;  %v1700_v50 = vadd.f32 %v1620_v12, %v1341_v17  ;;  %v1822_v36 = vsel %vm119_vm1, %v1819_v20, %v1821_v40 }
 0x1c3   :  { %v1624_v63 = vpop.f32.mrf.mxu0  ;;  %v1881_v44 = vmax.f32 %v1762_v55, %v1822_v36  ;;  %v1344_v55 = vadd.f32 %v5724_v11, %v5612_v4  ;;  %v1346_v4 = vadd.f32 %v5746_v42, %v5619_v1  ;;  %v6728_v1 = vld [vmem:[#allocation22_spill] sm:$0xff]  ;;  %v6730_v36 = vld [vmem:[#allocation12_spill] sm:$0xff] }
 0x1c4   :  { %v1823_v45 = vrot.slane %v1764_v27, 1  ;;  %v1734_v30 = vmax.f32 %v1699_v19, %v1700_v50  ;;  %v1701_v35 = vadd.f32 %v1624_v63, %v1342_v31  ;;  %v1348_v42 = vadd.f32 %v5766_v7, %v6728_v1  ;;  %v6729_v50 = vld [vmem:[#allocation11_spill] sm:$0xff] }
 0x1c5   :  { %v1626_v58 = vpop.f32.mrf.mxu0  ;;  %v623_v63 = vadd.f32 %v6730_v36, %v6729_v50 }
 0x1c6   :  { %v1765_v51 = vadd.f32 %v5698_v0, %v1734_v30  ;;  %v1702_v16 = vadd.f32 %v1626_v58, %v1343_v57  ;;  %v1824_v41 = vsel %vm119_vm1, %v1821_v40, %v1823_v45 }
 0x1c7   :  { %v1628_v54 = vpop.f32.mrf.mxu0  ;;  %v1882_v34 = vmax.f32 %v1763_v48, %v1824_v41  ;;  %v6727_v48 = vld [vmem:[#allocation23_spill] sm:$0xff]  ;;  %v6732_v41 = vld [vmem:[#allocation26_spill] sm:$0xff] }
 0x1c8   :  { %v1825_v2 = vrot.slane %v1765_v51, 1  ;;  %v1735_v39 = vmax.f32 %v1701_v35, %v1702_v16  ;;  %v1703_v20 = vadd.f32 %v1628_v54, %v1344_v55  ;;  %v990_v38 = vadd.f32 %v6727_v48, %v613_v18 }
 0x1c9   :  { %v1630_v43 = vpop.f32.mrf.mxu0  ;;  %v5822_v47 = vpack.c.bf16 %v1882_v34, %v1881_v44  ;;  %v1299_v44 = vpop.f32.mrf.mxu1  ;;  %v994_v54 = vadd.f32 %v6732_v41, %v623_v63 }
 0x1ca   :  { %v1766_v23 = vadd.f32 %v5698_v0, %v1735_v39  ;;  %v1704_v60 = vadd.f32 %v1630_v43, %v1345_v53  ;;  %v1826_v3 = vsel %vm119_vm1, %v1823_v45, %v1825_v2 }
 0x1cb   :  { %v1634_v11 = vpop.f32.mrf.mxu0  ;;  %v1883_v5 = vmax.f32 %v1764_v27, %v1826_v3  ;;  %v1349_v27 = vadd.f32 %v5777_v29, %v990_v38  ;;  %v1351_v29 = vadd.f32 %v5794_v37, %v5639_v22  ;;  %v1301_v53 = vpop.f32.mrf.mxu1  ;;  %v6734_v3 = vld [vmem:[#allocation13_spill] sm:$0xff] }
 0x1cc   :  { %v1827_v28 = vrot.slane %v1766_v23, 1  ;;  %v1736_v46 = vmax.f32 %v1703_v20, %v1704_v60  ;;  %v1705_v17 = vadd.f32 %v1634_v11, %v1346_v4  ;;  %v1353_v60 = vadd.f32 %v5812_v56, %v994_v54  ;;  %v6735_v4 = vld [vmem:[#allocation14_spill] sm:$0xff]  ;;  %v6737_v56 = vld [vmem:[#allocation28_spill] sm:$0xff] }
 0x1cd   :  { %v1636_v9 = vpop.f32.mrf.mxu0  ;;  %v633_v11 = vadd.f32 %v6735_v4, %v6734_v3 }
 0x1ce   :  { %v1767_v10 = vadd.f32 %v5698_v0, %v1736_v46  ;;  %v1706_v40 = vadd.f32 %v1636_v9, %v1347_v61  ;;  %v1828_v32 = vsel %vm119_vm1, %v1825_v2, %v1827_v28 }
 0x1cf   :  { %v1638_v12 = vpop.f32.mrf.mxu0  ;;  %v1884_v19 = vmax.f32 %v1765_v51, %v1828_v32  ;;  %v6731_v51 = vld [vmem:[#allocation24_spill] sm:$0xff]  ;;  %v1355_v32 = vadd.f32 %v1297_v33, %v6737_v56 }
 0x1d0   :  { %v1829_v8 = vrot.slane %v1767_v10, 1  ;;  %v1737_v52 = vmax.f32 %v1705_v17, %v1706_v40  ;;  %v1707_v45 = vadd.f32 %v1638_v12, %v1348_v42  ;;  %v1350_v35 = vadd.f32 %v5784_v6, %v6731_v51  ;;  %v6733_v6 = vld [vmem:[#allocation25_spill] sm:$0xff]  ;;  %v6738_v12 = vld [vmem:[#allocation30_spill] sm:$0xff] }
 0x1d1   :  { %v1640_v31 = vpop.f32.mrf.mxu0  ;;  %v1917_v13 = vpack.c.bf16 %v1884_v19, %v1883_v5  ;;  %v1305_v5 = vpop.f32.mrf.mxu1  ;;  %v998_v19 = vadd.f32 %v6738_v12, %v633_v11 }
 0x1d2   :  { %v1768_v57 = vadd.f32 %v5698_v0, %v1737_v52  ;;  %v1708_v30 = vadd.f32 %v1640_v31, %v1349_v27  ;;  %v1830_v58 = vsel %vm119_vm1, %v1827_v28, %v1829_v8  ;;  %v6739_v27 = vmov 0  }
 0x1d3   :  { %v1644_v7 = vpop.f32.mrf.mxu0  ;;  %v1885_v16 = vmax.f32 %v1766_v23, %v1830_v58  ;;  %v1352_v23 = vadd.f32 %v5802_v59, %v6733_v6  ;;  %v1357_v33 = vadd.f32 %v1301_v53, %v998_v19 }
 0x1d4   :  { %v1831_v34 = vrot.slane %v1768_v57, 1  ;;  %v1738_v55 = vmax.f32 %v1707_v45, %v1708_v30  ;;  %v1709_v62 = vadd.f32 %v1644_v7, %v1350_v35  ;;  %v6741_v35 = vld [vmem:[#allocation15_spill] sm:$0xff]  ;;  %v6742_v7 = vld [vmem:[#allocation16_spill] sm:$0xff] }
 0x1d5   :  { %v1646_v2 = vpop.f32.mrf.mxu0 }
 0x1d6   :  { %v1769_v39 = vadd.f32 %v5698_v0, %v1738_v55  ;;  %v1710_v24 = vadd.f32 %v1646_v2, %v1351_v29  ;;  %v1832_v18 = vsel %vm119_vm1, %v1829_v8, %v1831_v34  ;;  %v1307_v8 = vpop.f32.mrf.mxu1 }
 0x1d7   :  { %v1648_v43 = vpop.f32.mrf.mxu0  ;;  %v1886_v20 = vmax.f32 %v1767_v10, %v1832_v18  ;;  %v6736_v10 = vld [vmem:[#allocation27_spill] sm:$0xff] }
 0x1d8   :  { %v1833_v22 = vrot.slane %v1769_v39, 1  ;;  %v1739_v37 = vmax.f32 %v1709_v62, %v1710_v24  ;;  %v1711_v28 = vadd.f32 %v1648_v43, %v1352_v23  ;;  %v1354_v17 = vadd.f32 %v1295_v21, %v6736_v10  ;;  %v1309_v29 = vpop.f32.mrf.mxu1  ;;  %v6744_v24 = vld [vmem:[#allocation32_spill] sm:$0xff]  ;;  %v6745_v43 = vld [vmem:[#allocation34_spill] sm:$0xff] }
 0x1d9   :  { %v1650_v61 = vpop.f32.mrf.mxu0  ;;  %v1918_v48 = vpack.c.bf16 %v1886_v20, %v1885_v16  ;;  %v643_v16 = vadd.f32 %v6742_v7, %v6741_v35  ;;  %v1359_v18 = vadd.f32 %v1307_v8, %v6744_v24  ;;  %v4431_v35 = vld [vmem:[%s6667_s5 + $0x40] ss:$8 sps:$4 sm:$0xff]   ;;  %v4432_v7 = vld [vmem:[%s6667_s5 + $0x54] ss:$8 sps:$4 sm:$0xff]   ;;  %v4450_v24 = vld [vmem:[%s6669_s3 + $0x50] ss:$8 sps:$4 sm:$0xff]  }
 0x1da   :  { %v1770_v38 = vadd.f32 %v5698_v0, %v1739_v37  ;;  %v1712_v46 = vadd.f32 %v1650_v61, %v1353_v60  ;;  %v1834_v9 = vsel %vm119_vm1, %v1831_v34, %v1833_v22  ;;  %v1311_v60 = vpop.f32.mrf.mxu1  ;;  %v6746_v61 = vld [vmem:[#allocation33_spill] sm:$0xff] }
 0x1db   :  { %v1654_v40 = vpop.f32.mrf.mxu0  ;;  %2027 = vmatpush1.bf16.msra.mxu1 %v1918_v48  ;;  %v1887_v59 = vmax.f32 %v1768_v57, %v1834_v9  ;;  %v6740_v57 = vld [vmem:[#allocation29_spill] sm:$0xff]  ;;  %v1002_v20 = vadd.f32 %v6745_v43, %v643_v16  ;;  %v1360_v48 = vadd.f32 %v1309_v29, %v6746_v61  ;;  %v4435_v29 = vld [vmem:[%s6667_s5 + $0x64] ss:$8 sps:$4 sm:$0xff]   ;;  %v4453_v43 = vld [vmem:[%s6669_s3 + $0xe0] ss:$8 sps:$4 sm:$0xff]  }
 0x1dc   :  { %v1835_v1 = vrot.slane %v1770_v38, 1  ;;  %v1740_v42 = vmax.f32 %v1711_v28, %v1712_v46  ;;  %2028 = vmatprep.subr.bf16.mxu1 %v6739_v27  ;;  %v1713_v36 = vadd.f32 %v1654_v40, %v1354_v17  ;;  %v1356_v30 = vadd.f32 %v1299_v44, %v6740_v57  ;;  %v4423_v57 = vld [vmem:[%s6667_s5 + $0x24] ss:$8 sps:$4 sm:$0xff]   ;;  %v4434_v16 = vld [vmem:[%s6667_s5 + $0x50] ss:$8 sps:$4 sm:$0xff]  }
 0x1dd   :  { %v1656_v52 = vpop.f32.mrf.mxu0  ;;  %v4471_v61 = vld [vmem:[%s6669_s3 + $0xb0] ss:$8 sps:$4 sm:$0xff]  }
 0x1de   :  { %v1771_v50 = vadd.f32 %v5698_v0, %v1740_v42  ;;  %v1714_v63 = vadd.f32 %v1656_v52, %v1355_v32  ;;  %v1836_v31 = vsel %vm119_vm1, %v1833_v22, %v1835_v1 }
 0x1df   :  { %v1658_v21 = vpop.f32.mrf.mxu0  ;;  %2029 = vmatpush1.bf16.msra.mxu1 %v1917_v13  ;;  %v1888_v45 = vmax.f32 %v1769_v39, %v1836_v31  ;;  %v6743_v39 = vld [vmem:[#allocation31_spill] sm:$0xff] }
 0x1e0   :  { %v1837_v58 = vrot.slane %v1771_v50, 1  ;;  %v1741_v51 = vmax.f32 %v1713_v36, %v1714_v63  ;;  %2030 = vmatprep.subr.bf16.mxu1 %v6739_v27  ;;  %v1715_v55 = vadd.f32 %v1658_v21, %v1356_v30  ;;  %v1358_v44 = vadd.f32 %v1305_v5, %v6743_v39  ;;  %v4425_v30 = vld [vmem:[%s6667_s5 + $0x20] ss:$8 sps:$4 sm:$0xff]  }
 0x1e1   :  { %v1660_v41 = vpop.f32.mrf.mxu0  ;;  %v5864_v54 = vpack.c.bf16 %v1888_v45, %v1887_v59  ;;  %v4688_v63 = vmov 65535   ;;  %v4422_v45 = vld [vmem:[%s6667_s5 + $0x10] ss:$8 sps:$4 sm:$0xff]   ;;  %v4444_v39 = vld [vmem:[%s6669_s3 + $0x60] ss:$8 sps:$4 sm:$0xff]  }
 0x1e2   :  { %v1772_v34 = vadd.f32 %v5698_v0, %v1741_v51  ;;  %v1716_v2 = vadd.f32 %v1660_v41, %v1357_v33  ;;  %v1838_v13 = vsel %vm119_vm1, %v1835_v1, %v1837_v58  ;;  %v2021_v31 = vsel %vm119_vm1, 4294967295, %v4688_v63  ;;  %v4426_v33 = vld [vmem:[%s6667_s5 + $0x34] ss:$8 sps:$4 sm:$0xff]   ;;  %v4429_v51 = vld [vmem:[%s6667_s5 + $0x44] ss:$8 sps:$4 sm:$0xff]  }
 0x1e3   :  { %v1664_v53 = vpop.f32.mrf.mxu0  ;;  %2031 = vmatpush1.bf16.msra.mxu1 %v5822_v47  ;;  %v1889_v62 = vmax.f32 %v1770_v38, %v1838_v13  ;;  %v1361_v38 = vadd.f32 %v1311_v60, %v1002_v20  ;;  %v5890_v21 = vsel %vm2020_vm6, %v2021_v31, 0  ;;  %v4437_v41 = vld [vmem:[%s6667_s5 + $0x60] ss:$8 sps:$4 sm:$0xff]   ;;  %v4446_v13 = vld [vmem:[%s6669_s3 + $0x64] ss:$8 sps:$4 sm:$0xff]  }
 0x1e4   :  { %v1839_v6 = vrot.slane %v1772_v34, 1  ;;  %v1742_v23 = vmax.f32 %v1715_v55, %v1716_v2  ;;  %2032 = vmatprep.subr.bf16.mxu1 %v6739_v27  ;;  %v1717_v3 = vadd.f32 %v1664_v53, %v1358_v44  ;;  %6747 = vst [vmem:[#allocation2_spill] sm:$0xff] %v5890_v21  ;;  %v4443_v55 = vld [vmem:[%s6669_s3 + $0x74] ss:$8 sps:$4 sm:$0xff]   ;;  %v4441_v2 = vld [vmem:[%s6669_s3 + $0x70] ss:$8 sps:$4 sm:$0xff]  }
 0x1e5   :  { %v1666_v22 = vpop.f32.mrf.mxu0  ;;  %2573 = vmatprep.subr.bf16.mxu0 %v4443_v55  ;;  %v4449_v44 = vld [vmem:[%s6669_s3 + $0xf4] ss:$8 sps:$4 sm:$0xff]   ;;  %v4447_v53 = vld [vmem:[%s6669_s3 + $0xf0] ss:$8 sps:$4 sm:$0xff]   ;;  %v4458_v20 = vld [vmem:[%s6669_s3 + $0x44] ss:$8 sps:$4 sm:$0xff]  }
 0x1e6   :  { %v1773_v37 = vadd.f32 %v5698_v0, %v1742_v23  ;;  %v1718_v4 = vadd.f32 %v1666_v22, %v1359_v18  ;;  %v1840_v11 = vsel %vm119_vm1, %v1837_v58, %v1839_v6  ;;  %v4428_v58 = vld [vmem:[%s6667_s5 + $0x30] ss:$8 sps:$4 sm:$0xff]   ;;  %2574 = vmatpush1.bf16.msra.mxu0 %v4441_v2  ;;  %v4455_v18 = vld [vmem:[%s6669_s3 + $0xe4] ss:$8 sps:$4 sm:$0xff]   ;;  %v4461_v23 = vld [vmem:[%s6669_s3 + $0xd4] ss:$8 sps:$4 sm:$0xff]  }
 0x1e7   :  { %v1668_v5 = vpop.f32.mrf.mxu0  ;;  %2033 = vmatpush1.bf16.msra.mxu1 %v5804_v15  ;;  %v1890_v47 = vmax.f32 %v1771_v50, %v1840_v11  ;;  %2575 = vmatprep.subr.bf16.mxu0 %v4446_v13  ;;  %v4459_v60 = vld [vmem:[%s6669_s3 + $0xd0] ss:$8 sps:$4 sm:$0xff]   ;;  %v4464_v22 = vld [vmem:[%s6669_s3 + $0x34] ss:$8 sps:$4 sm:$0xff]   ;;  %v4470_v11 = vld [vmem:[%s6669_s3 + $0x24] ss:$8 sps:$4 sm:$0xff]  }
 0x1e8   :  { %v1841_v28 = vrot.slane %v1773_v37, 1  ;;  %v1743_v46 = vmax.f32 %v1717_v3, %v1718_v4  ;;  %2034 = vmatprep.subr.bf16.mxu1 %v6739_v27  ;;  %v1719_v40 = vadd.f32 %v1668_v5, %v1360_v48  ;;  %v4467_v3 = vld [vmem:[%s6669_s3 + $0xc4] ss:$8 sps:$4 sm:$0xff]   ;;  %v4465_v4 = vld [vmem:[%s6669_s3 + $0xc0] ss:$8 sps:$4 sm:$0xff]  }
 0x1e9   :  { %v1670_v9 = vpop.f32.mrf.mxu0  ;;  %v1920_v10 = vpack.c.bf16 %v1890_v47, %v1889_v62  ;;  %v4452_v62 = vld [vmem:[%s6669_s3 + $0x54] ss:$8 sps:$4 sm:$0xff]   ;;  %v4468_v5 = vld [vmem:[%s6669_s3 + $0x20] ss:$8 sps:$4 sm:$0xff]  }
 0x1ea   :  { %v1774_v17 = vadd.f32 %v5698_v0, %v1743_v46  ;;  %v1720_v59 = vadd.f32 %v1670_v9, %v1361_v38  ;;  %v1842_v56 = vsel %vm119_vm1, %v1839_v6, %v1841_v28  ;;  %2576 = vmatpush1.bf16.msra.mxu0 %v4444_v39  ;;  %v4456_v6 = vld [vmem:[%s6669_s3 + $0x40] ss:$8 sps:$4 sm:$0xff]   ;;  %v4473_v47 = vld [vmem:[%s6669_s3 + $0xb4] ss:$8 sps:$4 sm:$0xff]   ;;  %v4474_v38 = vld [vmem:[%s6669_s3 + $0x10] ss:$8 sps:$4 sm:$0xff]  }
 0x1eb   :  { %2035 = vmatpush1.bf16.msra.mxu1 %v5786_v49  ;;  %v1891_v32 = vmax.f32 %v1772_v34, %v1842_v56  ;;  %v4440_v34 = vld [vmem:[%s6667_s5 + $0x70] ss:$8 sps:$4 sm:$0xff]   ;;  %2577 = vmatprep.subr.bf16.mxu0 %v4452_v62  ;;  %v4476_v48 = vld [vmem:[%s6669_s3 + $0x14] ss:$8 sps:$4 sm:$0xff]   ;;  %v4477_v46 = vld [vmem:[%s6669_s3 + $0xa0] ss:$8 sps:$4 sm:$0xff]  }
 0x1ec   :  { %v1843_v15 = vrot.slane %v1774_v17, 1  ;;  %v1744_v12 = vmax.f32 %v1719_v40, %v1720_v59  ;;  %2036 = vmatprep.subr.bf16.mxu1 %v6739_v27  ;;  %v4482_v9 = vld [vmem:[%s6669_s3 + $0x4] ss:$8 sps:$4 sm:$0xff]   ;;  %v4483_v40 = vld [vmem:[%s6669_s3 + $0x90] ss:$8 sps:$4 sm:$0xff]  }
 0x1ed   :  { %v4488_v59 = vld [vmem:[%s6669_s3 + $0x84] ss:$8 sps:$4 sm:$0xff]   ;;  %v4486_v56 = vld [vmem:[%s6669_s3 + $0x80] ss:$8 sps:$4 sm:$0xff]  }
 0x1ee   :  { %v1775_v19 = vadd.f32 %v5698_v0, %v1744_v12  ;;  %v1844_v1 = vsel %vm119_vm1, %v1841_v28, %v1843_v15  ;;  %2578 = vmatpush1.bf16.msra.mxu0 %v4450_v24  ;;  %v4479_v28 = vld [vmem:[%s6669_s3 + $0xa4] ss:$8 sps:$4 sm:$0xff]  }
 0x1ef   :  { %2037 = vmatpush1.bf16.msra.mxu1 %v5768_v14  ;;  %v1892_v42 = vmax.f32 %v1773_v37, %v1844_v1  ;;  %2579 = vmatprep.subr.bf16.mxu0 %v4458_v20  ;;  %v4462_v37 = vld [vmem:[%s6669_s3 + $0x30] ss:$8 sps:$4 sm:$0xff]  }
 0x1f0   :  { %v1845_v8 = vrot.slane %v1775_v19, 1  ;;  %2038 = vmatprep.subr.bf16.mxu1 %v6739_v27 }
 0x1f1   :  { %v1921_v52 = vpack.c.bf16 %v1892_v42, %v1891_v32  ;;  %v4491_v32 = vld [vmem:[%s6669_s3 + $0x1f4] ss:$8 sps:$4 sm:$0xff]  }
 0x1f2   :  { %v1846_v50 = vsel %vm119_vm1, %v1843_v15, %v1845_v8  ;;  %v1894_v36 = vmax.f32 %v1775_v19, %v1845_v8  ;;  %2580 = vmatpush1.bf16.msra.mxu0 %v4456_v6  ;;  %v4497_v15 = vld [vmem:[%s6669_s3 + $0x174] ss:$8 sps:$4 sm:$0xff]  }
 0x1f3   :  { %v1893_v49 = vmax.f32 %v1774_v17, %v1846_v50  ;;  %2039 = vmatpush1.bf16.msra.mxu1 %v5748_v25  ;;  %v4417_v25 = vld [vmem:[%s6667_s5] ss:$8 sps:$4 sm:$0xff]   ;;  %2581 = vmatprep.subr.bf16.mxu0 %v4464_v22  ;;  %v4485_v17 = vld [vmem:[%s6669_s3 + $0x94] ss:$8 sps:$4 sm:$0xff]  }
 0x1f4   :  { %2040 = vmatprep.subr.bf16.mxu1 %v6739_v27 }
 0x1f5   :  { %v1922_v0 = vpack.c.bf16 %v1894_v36, %v1893_v49 }
 0x1f6   :  { %2582 = vmatpush1.bf16.msra.mxu0 %v4462_v37 }
 0x1f7   :  { %2041 = vmatpush1.bf16.msra.mxu1 %v5726_v26  ;;  %v2024_v14 = vand.u32 %v5890_v21, %v1922_v0  ;;  %v4420_v26 = vld [vmem:[%s6667_s5 + $0x14] ss:$8 sps:$4 sm:$0xff]   ;;  %2583 = vmatprep.subr.bf16.mxu0 %v4470_v11 }
 0x1f8   :  { %2050 = vmatprep.subr.bf16.mxu1 %v6739_v27 }
 0x1fa   :  { %2584 = vmatpush1.bf16.msra.mxu0 %v4468_v5 }
 0x1fb   :  { %2051 = vmatpush2.bf16.msra.mxu1 %v2024_v14  ;;  %2585 = vmatprep.subr.bf16.mxu0 %v4476_v48 }
 0x1fc   :  { %2052 = vmatprep.subr.bf16.mxu1 %v6739_v27 }
 0x1fe   :  { %2586 = vmatpush1.bf16.msra.mxu0 %v4474_v38 }
 0x1ff   :  { %2053 = vmatpush2.bf16.msra.mxu1 %v1921_v52  ;;  %2587 = vmatprep.subr.bf16.mxu0 %v4482_v9 }
 0x200   :  { %2054 = vmatprep.subr.bf16.mxu1 %v6739_v27 }
 0x203   :  { %2055 = vmatpush2.bf16.msra.mxu1 %v1920_v10  ;;  %v4480_v10 = vld [vmem:[%s6669_s3] ss:$8 sps:$4 sm:$0xff]  }
 0x204   :  { %2056 = vmatprep.subr.bf16.mxu1 %v6739_v27  ;;  %2588 = vmatpush1.bf16.msra.mxu0 %v4480_v10 }
 0x205   :  { %3001 = vmatprep.subr.bf16.mxu0 %v4491_v32 }
 0x207   :  { %2057 = vmatpush2.bf16.msra.mxu1 %v5864_v54  ;;  %v4438_v54 = vld [vmem:[%s6667_s5 + $0x74] ss:$8 sps:$4 sm:$0xff]  }
 0x208   :  { %2420 = vmatprep.subr.bf16.mxu1 %v4449_v44 }
 0x20a   :  { %2059 = vmatmul.mubr.bf16.vlgmr.msra.gmra.mxu1 %v4417_v25 }
 0x20b   :  { %4073 = vmatprep.mubr.msk.bf16.mxu1 %vm1995_vm5, %v4420_v26  ;;  %2421 = vmatpush1.bf16.msra.mxu1 %v4447_v53 }
 0x20c   :  { %2422 = vmatprep.subr.bf16.mxu1 %v4455_v18 }
 0x20f   :  { %2423 = vmatpush1.bf16.msra.mxu1 %v4453_v43 }
 0x210   :  { %2424 = vmatprep.subr.bf16.mxu1 %v4461_v23 }
 0x212   :  { %2067 = vmatmul.mubr.bf16.gmra.mxu1 %v4422_v45 }
 0x213   :  { %4074 = vmatprep.mubr.msk.bf16.mxu1 %vm1995_vm5, %v4423_v57  ;;  %2425 = vmatpush1.bf16.msra.mxu1 %v4459_v60 }
 0x214   :  { %2426 = vmatprep.subr.bf16.mxu1 %v4467_v3 }
 0x217   :  { %2427 = vmatpush1.bf16.msra.mxu1 %v4465_v4 }
 0x218   :  { %2428 = vmatprep.subr.bf16.mxu1 %v4473_v47 }
 0x21a   :  { %2075 = vmatmul.mubr.bf16.gmra.mxu1 %v4425_v30 }
 0x21b   :  { %4075 = vmatprep.mubr.msk.bf16.mxu1 %vm1995_vm5, %v4426_v33  ;;  %2429 = vmatpush1.bf16.msra.mxu1 %v4471_v61 }
 0x21c   :  { %2430 = vmatprep.subr.bf16.mxu1 %v4479_v28 }
 0x21f   :  { %2431 = vmatpush1.bf16.msra.mxu1 %v4477_v46 }
 0x220   :  { %2432 = vmatprep.subr.bf16.mxu1 %v4485_v17 }
 0x222   :  { %2083 = vmatmul.mubr.bf16.gmra.mxu1 %v4428_v58 }
 0x223   :  { %4076 = vmatprep.mubr.msk.bf16.mxu1 %vm1995_vm5, %v4429_v51  ;;  %2433 = vmatpush1.bf16.msra.mxu1 %v4483_v40 }
 0x224   :  { %2434 = vmatprep.subr.bf16.mxu1 %v4488_v59 }
 0x227   :  { %2435 = vmatpush1.bf16.msra.mxu1 %v4486_v56 }
 0x228   :  { %2779 = vmatprep.subr.bf16.mxu1 %v4497_v15 }
 0x22a   :  { %2091 = vmatmul.mubr.bf16.gmra.mxu1 %v4431_v35 }
 0x22b   :  { %4077 = vmatprep.mubr.msk.bf16.mxu1 %vm1995_vm5, %v4432_v7 }
 0x232   :  { %2099 = vmatmul.mubr.bf16.gmra.mxu1 %v4434_v16 }
 0x233   :  { %4078 = vmatprep.mubr.msk.bf16.mxu1 %vm1995_vm5, %v4435_v29 }
 0x23a   :  { %2107 = vmatmul.mubr.bf16.gmra.mxu1 %v4437_v41 }
 0x23b   :  { %4079 = vmatprep.mubr.msk.bf16.mxu1 %vm1995_vm5, %v4438_v54 }
 0x242   :  { %2115 = vmatmul.mubr.bf16.gmra.mxu1 %v4440_v34 }
 0x243   :  { %2452 = vmatprep.mubr.bf16.mxu1 %v6739_v27 }
 0x2ca   :  { %v2060_v12 = vpop.f32.mrf.mxu1 }
 0x2cb   :  { %v4080_v19 = vmul.f32 -1.702, %v2060_v12 }
 0x2cc   :  { %v2062_v1 = vpop.f32.mrf.mxu1 }
 0x2cd   :  { %v2155_v42 = vmul.f32 1.442695, %v4080_v19 }
 0x2ce   :  { %v2063_v8 = vpop.f32.mrf.mxu1 }
 0x2cf   :  { %4603 = vpow2.f32 %v2155_v42  ;;  %v4081_v52 = vmul.f32 -1.702, %v2063_v8 }
 0x2d0   :  { %v2065_v50 = vpop.f32.mrf.mxu1 }
 0x2d1   :  { %v2157_v36 = vmul.f32 1.442695, %v4081_v52 }
 0x2d2   :  { %v6054_v49 = vpop.f32.mrf.mxu1 }
 0x2d3   :  { %4605 = vpow2.f32 %v2157_v36  ;;  %v4082_v63 = vmul.f32 -1.702, %v6054_v49  ;;  %v4489_v36 = vld [vmem:[%s6669_s3 + $0x1f0] ss:$8 sps:$4 sm:$0xff]  }
 0x2d4   :  { %v2070_v31 = vpop.f32.mrf.mxu1 }
 0x2d5   :  { %v2159_v0 = vmul.f32 1.442695, %v4082_v63 }
 0x2d6   :  { %v6057_v14 = vpop.f32.mrf.mxu1 }
 0x2d7   :  { %4607 = vpow2.f32 %v2159_v0  ;;  %v4083_v25 = vmul.f32 -1.702, %v6057_v14 }
 0x2d8   :  { %v2073_v26 = vpop.f32.mrf.mxu1 }
 0x2d9   :  { %v2161_v45 = vmul.f32 1.442695, %v4083_v25 }
 0x2da   :  { %v6060_v57 = vpop.f32.mrf.mxu1 }
 0x2db   :  { %4609 = vpow2.f32 %v2161_v45  ;;  %v4084_v30 = vmul.f32 -1.702, %v6060_v57 }
 0x2dc   :  { %v4604_v33 = vpop.eup %4603  ;;  %v2078_v58 = vpop.f32.mrf.mxu1 }
 0x2dd   :  { %v2187_v51 = vadd.f32 1.0, %v4604_v33  ;;  %v2163_v35 = vmul.f32 1.442695, %v4084_v30 }
 0x2de   :  { %v6063_v7 = vpop.f32.mrf.mxu1 }
 0x2df   :  { %4611 = vrcp.f32 %v2187_v51  ;;  %v4085_v16 = vmul.f32 -1.702, %v6063_v7 }
 0x2e0   :  { %v4606_v29 = vpop.eup %4605  ;;  %4613 = vpow2.f32 %v2163_v35  ;;  %v2081_v41 = vpop.f32.mrf.mxu1  ;;  %v4492_v35 = vld [vmem:[%s6669_s3 + $0x1e0] ss:$8 sps:$4 sm:$0xff]  }
 0x2e1   :  { %v2188_v54 = vadd.f32 1.0, %v4606_v29  ;;  %v2165_v34 = vmul.f32 1.442695, %v4085_v16 }
 0x2e2   :  { %v6066_v55 = vpop.f32.mrf.mxu1 }
 0x2e3   :  { %4615 = vrcp.f32 %v2188_v54  ;;  %v4086_v2 = vmul.f32 -1.702, %v6066_v55 }
 0x2e4   :  { %v4608_v13 = vpop.eup %4607  ;;  %4617 = vpow2.f32 %v2165_v34  ;;  %v2086_v39 = vpop.f32.mrf.mxu1 }
 0x2e5   :  { %v2189_v44 = vadd.f32 1.0, %v4608_v13  ;;  %v2167_v53 = vmul.f32 1.442695, %v4086_v2  ;;  %v4500_v2 = vld [vmem:[%s6669_s3 + $0x1d4] ss:$8 sps:$4 sm:$0xff]  }
 0x2e6   :  { %v6069_v62 = vpop.f32.mrf.mxu1 }
 0x2e7   :  { %4619 = vrcp.f32 %v2189_v44  ;;  %v4087_v24 = vmul.f32 -1.702, %v6069_v62 }
 0x2e8   :  { %v4610_v18 = vpop.eup %4609  ;;  %4621 = vpow2.f32 %v2167_v53  ;;  %v2089_v43 = vpop.f32.mrf.mxu1 }
 0x2e9   :  { %v2190_v20 = vadd.f32 1.0, %v4610_v18  ;;  %v2169_v6 = vmul.f32 1.442695, %v4087_v24  ;;  %v4495_v24 = vld [vmem:[%s6669_s3 + $0x170] ss:$8 sps:$4 sm:$0xff]  }
 0x2ea   :  { %v6072_v23 = vpop.f32.mrf.mxu1 }
 0x2eb   :  { %4623 = vrcp.f32 %v2190_v20  ;;  %v4088_v60 = vmul.f32 -1.702, %v6072_v23 }
 0x2ec   :  { %v4612_v22 = vpop.eup %4611  ;;  %4625 = vpow2.f32 %v2169_v6  ;;  %v2094_v37 = vpop.f32.mrf.mxu1 }
 0x2ed   :  { %v4614_v3 = vpop.eup %4613  ;;  %v2171_v4 = vmul.f32 1.442695, %v4088_v60  ;;  %v6077_v47 = vmul.f32 %v4612_v22, %v2060_v12  ;;  %v4503_v60 = vld [vmem:[%s6669_s3 + $0x164] ss:$8 sps:$4 sm:$0xff]   ;;  %v4498_v37 = vld [vmem:[%s6669_s3 + $0x1d0] ss:$8 sps:$4 sm:$0xff]  }
 0x2ee   :  { %v2191_v11 = vadd.f32 1.0, %v4614_v3  ;;  %v6075_v5 = vpop.f32.mrf.mxu1 }
 0x2ef   :  { %v4089_v48 = vmul.f32 -1.702, %v6075_v5  ;;  %v3090_v40 = vrot.slane %v6077_v47, 4  ;;  %v2287_v30 = vrot.slane %v6077_v47, 1 }
 0x2f0   :  { %v4616_v61 = vpop.eup %4615  ;;  %4627 = vrcp.f32 %v2191_v11  ;;  %v2097_v38 = vpop.f32.mrf.mxu1 }
 0x2f1   :  { %v4618_v28 = vpop.eup %4617  ;;  %v6080_v46 = vmul.f32 %v4616_v61, %v2063_v8  ;;  %4629 = vpow2.f32 %v2171_v4  ;;  %v2173_v10 = vmul.f32 1.442695, %v4089_v48  ;;  %v4506_v48 = vld [vmem:[%s6669_s3 + $0x1c4] ss:$8 sps:$4 sm:$0xff]  }
 0x2f2   :  { %v2192_v9 = vadd.f32 1.0, %v4618_v28  ;;  %v6082_v17 = vpop.f32.mrf.mxu1  ;;  %v4501_v28 = vld [vmem:[%s6669_s3 + $0x160] ss:$8 sps:$4 sm:$0xff]  }
 0x2f3   :  { %v3091_v59 = vrot.slane %v6080_v46, 4  ;;  %v4090_v32 = vmul.f32 -1.702, %v6082_v17  ;;  %v2288_v26 = vrot.slane %v6080_v46, 1 }
 0x2f4   :  { %v4620_v56 = vpop.eup %4619  ;;  %4631 = vrcp.f32 %v2192_v9  ;;  %v2102_v15 = vpop.f32.mrf.mxu1 }
 0x2f5   :  { %v4622_v12 = vpop.eup %4621  ;;  %v6088_v19 = vsel %vm1362_vm4, %v3090_v40, %v3091_v59  ;;  %v6091_v1 = vmul.f32 %v4620_v56, %v6054_v49  ;;  %4633 = vpow2.f32 %v2173_v10  ;;  %v2175_v8 = vmul.f32 1.442695, %v4090_v32  ;;  %v4494_v49 = vld [vmem:[%s6669_s3 + $0x1e4] ss:$8 sps:$4 sm:$0xff]   ;;  %v4509_v40 = vld [vmem:[%s6669_s3 + $0x154] ss:$8 sps:$4 sm:$0xff]  }
 0x2f6   :  { %v2193_v42 = vadd.f32 1.0, %v4622_v12  ;;  %v6093_v52 = vpop.f32.mrf.mxu1  ;;  %v2289_v39 = vsel %vm119_vm1, %v2287_v30, %v2288_v26  ;;  %v4504_v32 = vld [vmem:[%s6669_s3 + $0x1c0] ss:$8 sps:$4 sm:$0xff]   ;;  %v4512_v12 = vld [vmem:[%s6669_s3 + $0x1b4] ss:$8 sps:$4 sm:$0xff]  }
 0x2f7   :  { %v4091_v50 = vmul.f32 -1.702, %v6093_v52  ;;  %v2251_v31 = vpack.c.bf16 %v6091_v1, %v6077_v47  ;;  %v2290_v33 = vrot.slane %v6091_v1, 1  ;;  %v3093_v16 = vrot.slane %v6091_v1, 4 }
 0x2f8   :  { %v4624_v63 = vpop.eup %4623  ;;  %v2105_v0 = vpop.f32.mrf.mxu1  ;;  %4635 = vrcp.f32 %v2193_v42 }
 0x2f9   :  { %v4626_v25 = vpop.eup %4625  ;;  %v6106_v45 = vmul.f32 %v4624_v63, %v6057_v14  ;;  %4637 = vpow2.f32 %v2175_v8  ;;  %2606 = vmatmul.mubr.bf16.vlgmr.msra.gmra.mxu0 %v2251_v31  ;;  %v2177_v41 = vmul.f32 1.442695, %v4091_v50  ;;  %v4515_v0 = vld [vmem:[%s6669_s3 + $0x144] ss:$8 sps:$4 sm:$0xff]  }
 0x2fa   :  { %v2194_v58 = vadd.f32 1.0, %v4626_v25  ;;  %v6110_v51 = vpop.f32.mrf.mxu1  ;;  %2615 = vmatprep.mubr.bf16.mxu0 %v6739_v27  ;;  %3002 = vmatpush1.bf16.msra.mxu0 %v4489_v36  ;;  %v4507_v36 = vld [vmem:[%s6669_s3 + $0x150] ss:$8 sps:$4 sm:$0xff]  }
 0x2fb   :  { %v2291_v29 = vrot.slane %v6106_v45, 1  ;;  %v3094_v14 = vrot.slane %v6106_v45, 4  ;;  %v4092_v54 = vmul.f32 -1.702, %v6110_v51  ;;  %3003 = vmatprep.subr.bf16.mxu0 %v4494_v49 }
 0x2fc   :  { %4639 = vrcp.f32 %v2194_v58  ;;  %v2110_v34 = vpop.f32.mrf.mxu1  ;;  %v4510_v58 = vld [vmem:[%s6669_s3 + $0x1b0] ss:$8 sps:$4 sm:$0xff]  }
 0x2fd   :  { %v4628_v13 = vpop.eup %4627  ;;  %v2292_v44 = vsel %vm119_vm1, %v2290_v33, %v2291_v29  ;;  %v6126_v53 = vsel %vm1362_vm4, %v3093_v16, %v3094_v14  ;;  %4641 = vpow2.f32 %v2177_v41  ;;  %v2179_v22 = vmul.f32 1.442695, %v4092_v54  ;;  %v4518_v41 = vld [vmem:[%s6669_s3 + $0x1a4] ss:$8 sps:$4 sm:$0xff]  }
 0x2fe   :  { %v4630_v18 = vpop.eup %4629  ;;  %v2319_v43 = vpack.c.bf16 %v2292_v44, %v2289_v39  ;;  %v3122_v20 = vpack.c.bf16 %v6126_v53, %v6088_v19  ;;  %v6133_v6 = vpop.f32.mrf.mxu1  ;;  %3004 = vmatpush1.bf16.msra.mxu0 %v4492_v35  ;;  %v6142_v3 = vmul.f32 %v4628_v13, %v6060_v57 }
 0x2ff   :  { %v2195_v4 = vadd.f32 1.0, %v4630_v18  ;;  %v4093_v11 = vmul.f32 -1.702, %v6133_v6  ;;  %3005 = vmatprep.subr.bf16.mxu0 %v4500_v2  ;;  %4643 = vpow2.f32 %v2179_v22  ;;  %v4521_v2 = vld [vmem:[%s6669_s3 + $0x134] ss:$8 sps:$4 sm:$0xff]  }
 0x300   :  { %v2113_v61 = vpop.f32.mrf.mxu1  ;;  %2453 = vmatmul.mubr.bf16.vlgmr.msra.gmra.mxu1 %v2319_v43  ;;  %v3096_v42 = vrot.slane %v6142_v3, 4  ;;  %v2293_v13 = vrot.slane %v6142_v3, 1  ;;  %v4524_v22 = vld [vmem:[%s6669_s3 + $0x194] ss:$8 sps:$4 sm:$0xff]  }
 0x301   :  { %v4632_v38 = vpop.eup %4631  ;;  %2462 = vmatprep.mubr.bf16.mxu1 %v6739_v27  ;;  %2780 = vmatpush1.bf16.msra.mxu1 %v4495_v24  ;;  %v2181_v9 = vmul.f32 1.442695, %v4093_v11  ;;  %4645 = vrcp.f32 %v2195_v4  ;;  %v4519_v11 = vld [vmem:[%s6669_s3 + $0x130] ss:$8 sps:$4 sm:$0xff]  }
 0x302   :  { %v6153_v57 = vmul.f32 %v4632_v38, %v6063_v7  ;;  %v6155_v10 = vpop.f32.mrf.mxu1  ;;  %2781 = vmatprep.subr.bf16.mxu1 %v4503_v60  ;;  %v4634_v59 = vpop.eup %4633  ;;  %3006 = vmatpush1.bf16.msra.mxu0 %v4498_v37 }
 0x303   :  { %v4094_v56 = vmul.f32 -1.702, %v6155_v10  ;;  %3007 = vmatprep.subr.bf16.mxu0 %v4506_v48  ;;  %v2196_v8 = vadd.f32 1.0, %v4634_v59  ;;  %4647 = vpow2.f32 %v2181_v9 }
 0x304   :  { %v3097_v7 = vrot.slane %v6153_v57, 4  ;;  %v2118_v15 = vpop.f32.mrf.mxu1  ;;  %v2294_v54 = vrot.slane %v6153_v57, 1 }
 0x305   :  { %v2183_v50 = vmul.f32 1.442695, %v4094_v56  ;;  %2782 = vmatpush1.bf16.msra.mxu1 %v4501_v28  ;;  %v4636_v63 = vpop.eup %4635  ;;  %4649 = vrcp.f32 %v2196_v8  ;;  %v4527_v28 = vld [vmem:[%s6669_s3 + $0x124] ss:$8 sps:$4 sm:$0xff]   ;;  %v4525_v15 = vld [vmem:[%s6669_s3 + $0x120] ss:$8 sps:$4 sm:$0xff]  }
 0x306   :  { %v6172_v31 = vpop.f32.mrf.mxu1  ;;  %2783 = vmatprep.subr.bf16.mxu1 %v4509_v40  ;;  %v6178_v49 = vsel %vm1362_vm4, %v3096_v42, %v3097_v7  ;;  %v4638_v25 = vpop.eup %4637  ;;  %v6181_v26 = vmul.f32 %v4636_v63, %v6066_v55  ;;  %3008 = vmatpush1.bf16.msra.mxu0 %v4504_v32  ;;  %v4513_v55 = vld [vmem:[%s6669_s3 + $0x140] ss:$8 sps:$4 sm:$0xff]   ;;  %v2295_v37 = vsel %vm119_vm1, %v2293_v13, %v2294_v54  ;;  %v4522_v40 = vld [vmem:[%s6669_s3 + $0x190] ss:$8 sps:$4 sm:$0xff]   ;;  %v4530_v32 = vld [vmem:[%s6669_s3 + $0x184] ss:$8 sps:$4 sm:$0xff]  }
 0x307   :  { %v4095_v30 = vmul.f32 -1.702, %v6172_v31  ;;  %v2197_v33 = vadd.f32 1.0, %v4638_v25  ;;  %4651 = vpow2.f32 %v2183_v50  ;;  %3009 = vmatprep.subr.bf16.mxu0 %v4512_v12  ;;  %v4533_v42 = vld [vmem:[%s6669_s3 + $0x114] ss:$8 sps:$4 sm:$0xff]  }
 0x308   :  { %v2121_v35 = vpop.f32.mrf.mxu1  ;;  %v2252_v14 = vpack.c.bf16 %v6181_v26, %v6142_v3  ;;  %v2296_v18 = vrot.slane %v6181_v26, 1  ;;  %v3099_v43 = vrot.slane %v6181_v26, 4  ;;  %v4528_v50 = vld [vmem:[%s6669_s3 + $0x180] ss:$8 sps:$4 sm:$0xff]  }
 0x309   :  { %v4640_v16 = vpop.eup %4639  ;;  %v2185_v29 = vmul.f32 1.442695, %v4095_v30  ;;  %2784 = vmatpush1.bf16.msra.mxu1 %v4507_v36  ;;  %4653 = vrcp.f32 %v2197_v33  ;;  %v4531_v30 = vld [vmem:[%s6669_s3 + $0x110] ss:$8 sps:$4 sm:$0xff]  }
 0x30a   :  { %v6197_v34 = vmul.f32 %v4640_v16, %v6069_v62  ;;  %2785 = vmatprep.subr.bf16.mxu1 %v4515_v0  ;;  %2616 = vmatmul.mubr.bf16.gmra.mxu0 %v2252_v14  ;;  %v4642_v39 = vpop.eup %4641  ;;  %v4516_v62 = vld [vmem:[%s6669_s3 + $0x1a0] ss:$8 sps:$4 sm:$0xff]  }
 0x30b   :  { %4655 = vpow2.f32 %v2185_v29  ;;  %2625 = vmatprep.mubr.bf16.mxu0 %v6739_v27  ;;  %3010 = vmatpush1.bf16.msra.mxu0 %v4510_v58  ;;  %v2198_v60 = vadd.f32 1.0, %v4642_v39 }
 0x30c   :  { %v2297_v44 = vrot.slane %v6197_v34, 1  ;;  %v3100_v24 = vrot.slane %v6197_v34, 4  ;;  %3011 = vmatprep.subr.bf16.mxu0 %v4518_v41  ;;  %v4644_v48 = vpop.eup %4643 }
 0x30d   :  { %2786 = vmatpush1.bf16.msra.mxu1 %v4513_v55  ;;  %4657 = vrcp.f32 %v2198_v60  ;;  %v2199_v9 = vadd.f32 1.0, %v4644_v48  ;;  %v4534_v55 = vld [vmem:[%s6669_s3 + $0x100] ss:$8 sps:$4 sm:$0xff]  }
 0x30e   :  { %v2298_v4 = vsel %vm119_vm1, %v2296_v18, %v2297_v44  ;;  %2787 = vmatprep.subr.bf16.mxu1 %v4521_v2  ;;  %v6220_v61 = vsel %vm1362_vm4, %v3099_v43, %v3100_v24  ;;  %v4646_v56 = vpop.eup %4645 }
 0x30f   :  { %v2320_v38 = vpack.c.bf16 %v2298_v4, %v2295_v37  ;;  %3012 = vmatpush1.bf16.msra.mxu0 %v4516_v62  ;;  %v3123_v59 = vpack.c.bf16 %v6220_v61, %v6178_v49  ;;  %4659 = vrcp.f32 %v2199_v9  ;;  %v6244_v63 = vmul.f32 %v4646_v56, %v6072_v23  ;;  %v4536_v23 = vld [vmem:[%s6669_s3 + $0x104] ss:$8 sps:$4 sm:$0xff]  }
 0x310   :  { %3013 = vmatprep.subr.bf16.mxu0 %v4524_v22  ;;  %v4648_v7 = vpop.eup %4647 }
 0x311   :  { %2463 = vmatmul.mubr.bf16.gmra.mxu1 %v2320_v38  ;;  %v2200_v12 = vadd.f32 1.0, %v4648_v7  ;;  %v3102_v29 = vrot.slane %v6244_v63, 4  ;;  %v2299_v39 = vrot.slane %v6244_v63, 1  ;;  %v2872_v7 = vrot.slane %v6106_v45, 3 }
 0x312   :  { %2472 = vmatprep.mubr.bf16.mxu1 %v6739_v27  ;;  %2788 = vmatpush1.bf16.msra.mxu1 %v4519_v11  ;;  %v4650_v8 = vpop.eup %4649 }
 0x313   :  { %2789 = vmatprep.subr.bf16.mxu1 %v4527_v28  ;;  %3014 = vmatpush1.bf16.msra.mxu0 %v4522_v40  ;;  %v6247_v0 = vmul.f32 %v4650_v8, %v6075_v5  ;;  %4661 = vrcp.f32 %v2200_v12  ;;  %v2871_v8 = vrot.slane %v6091_v1, 3 }
 0x314   :  { %v4652_v36 = vpop.eup %4651  ;;  %3015 = vmatprep.subr.bf16.mxu0 %v4530_v32 }
 0x315   :  { %v2201_v25 = vadd.f32 1.0, %v4652_v36  ;;  %v3103_v58 = vrot.slane %v6247_v0, 4  ;;  %v2300_v2 = vrot.slane %v6247_v0, 1 }
 0x316   :  { %2790 = vmatpush1.bf16.msra.mxu1 %v4525_v15  ;;  %v4654_v33 = vpop.eup %4653 }
 0x317   :  { %2791 = vmatprep.subr.bf16.mxu1 %v4533_v42  ;;  %v6257_v5 = vmul.f32 %v4654_v33, %v6082_v17  ;;  %4663 = vrcp.f32 %v2201_v25  ;;  %3016 = vmatpush1.bf16.msra.mxu0 %v4528_v50  ;;  %v4539_v17 = vld [vmem:[%s6669_s3 + $0x274] ss:$8 sps:$4 sm:$0xff]   ;;  %v6269_v41 = vsel %vm1362_vm4, %v3102_v29, %v3103_v58  ;;  %v2869_v42 = vrot.slane %v6080_v46, 3 }
 0x318   :  { %v4656_v35 = vpop.eup %4655  ;;  %v2873_v33 = vsel %vm1003_vm3, %v2871_v8, %v2872_v7  ;;  %v2880_v8 = vrot.slane %v6244_v63, 3 }
 0x319   :  { %v2202_v16 = vadd.f32 1.0, %v4656_v35  ;;  %v2253_v14 = vpack.c.bf16 %v6257_v5, %v6244_v63  ;;  %v2302_v62 = vrot.slane %v6257_v5, 1  ;;  %v3105_v43 = vrot.slane %v6257_v5, 4 }
 0x31a   :  { %2792 = vmatpush1.bf16.msra.mxu1 %v4531_v30  ;;  %v4658_v54 = vpop.eup %4657 }
 0x31b   :  { %4665 = vrcp.f32 %v2202_v16  ;;  %2793 = vmatprep.subr.bf16.mxu1 %v4536_v23  ;;  %2626 = vmatmul.mubr.bf16.gmra.mxu0 %v2253_v14  ;;  %v6273_v13 = vmul.f32 %v4658_v54, %v6093_v52  ;;  %v2301_v52 = vsel %vm119_vm1, %v2299_v39, %v2300_v2  ;;  %v2647_v54 = vrot.slane %v6080_v46, 2  ;;  %v4537_v46 = vld [vmem:[%s6669_s3 + $0x270] ss:$8 sps:$4 sm:$0xff]  }
 0x31c   :  { %2635 = vmatprep.mubr.bf16.mxu0 %v6739_v27  ;;  %v4660_v44 = vpop.eup %4659  ;;  %v2649_v2 = vrot.slane %v6091_v1, 2  ;;  %v2878_v39 = vrot.slane %v6197_v34, 3  ;;  %v2874_v1 = vrot.slane %v6142_v3, 3 }
 0x31d   :  { %v2303_v24 = vrot.slane %v6273_v13, 1  ;;  %v3106_v18 = vrot.slane %v6273_v13, 4  ;;  %v6282_v60 = vmul.f32 %v4660_v44, %v6110_v51  ;;  %v2646_v44 = vrot.slane %v6077_v47, 2 }
 0x31e   :  { %2794 = vmatpush1.bf16.msra.mxu1 %v4534_v55  ;;  %v2650_v55 = vrot.slane %v6106_v45, 2  ;;  %v2877_v45 = vrot.slane %v6181_v26, 3 }
 0x31f   :  { %3223 = vmatprep.subr.bf16.mxu1 %v4539_v17  ;;  %v2304_v22 = vsel %vm119_vm1, %v2302_v62, %v2303_v24  ;;  %v6287_v37 = vsel %vm1362_vm4, %v3105_v43, %v3106_v18  ;;  %v3108_v9 = vrot.slane %v6282_v60, 4  ;;  %v2875_v18 = vrot.slane %v6153_v57, 3 }
 0x320   :  { %v4662_v4 = vpop.eup %4661  ;;  %v2321_v11 = vpack.c.bf16 %v2304_v22, %v2301_v52  ;;  %v3124_v38 = vpack.c.bf16 %v6287_v37, %v6269_v41  ;;  %v2651_v24 = vsel %vm272_vm0, %v2649_v2, %v2650_v55  ;;  %v2648_v62 = vsel %vm272_vm0, %v2646_v44, %v2647_v54 }
 0x321   :  { %v6290_v48 = vmul.f32 %v4662_v4, %v6133_v6  ;;  %v2879_v43 = vsel %vm1003_vm3, %v2877_v45, %v2878_v39  ;;  %v2678_v52 = vpack.c.bf16 %v2651_v24, %v2648_v62  ;;  %v2656_v22 = vrot.slane %v6197_v34, 2  ;;  %v4545_v34 = vld [vmem:[%s6669_s3 + $0x254] ss:$8 sps:$4 sm:$0xff]   ;;  %v4552_v62 = vld [vmem:[%s6669_s3 + $0x220] ss:$8 sps:$4 sm:$0xff]  }
 0x322   :  { %2473 = vmatmul.mubr.bf16.gmra.mxu1 %v2321_v11  ;;  %v2876_v4 = vsel %vm1003_vm3, %v2874_v1, %v2875_v18  ;;  %v2886_v54 = vrot.slane %v6282_v60, 3  ;;  %v2664_v1 = vrot.slane %v6282_v60, 2 }
 0x323   :  { %v3109_v51 = vrot.slane %v6290_v48, 4  ;;  %2482 = vmatprep.mubr.bf16.mxu1 %v6739_v27  ;;  %v2306_v15 = vrot.slane %v6290_v48, 1  ;;  %v2901_v11 = vpack.c.bf16 %v2879_v43, %v2876_v4  ;;  %v2665_v45 = vrot.slane %v6290_v48, 2 }
 0x324   :  { %v4664_v28 = vpop.eup %4663 }
 0x325   :  { %v6298_v40 = vmul.f32 %v4664_v28, %v6155_v10  ;;  %v6301_v56 = vsel %vm1362_vm4, %v3108_v9, %v3109_v51  ;;  %v2305_v10 = vrot.slane %v6282_v60, 1  ;;  %v2653_v28 = vrot.slane %v6153_v57, 2  ;;  %v4540_v9 = vld [vmem:[%s6669_s3 + $0x260] ss:$8 sps:$4 sm:$0xff]  }
 0x326   :  { %v2884_v51 = vrot.slane %v6273_v13, 3  ;;  %v2652_v57 = vrot.slane %v6142_v3, 2  ;;  %v4548_v3 = vld [vmem:[%s6669_s3 + $0x244] ss:$8 sps:$4 sm:$0xff]  }
 0x327   :  { %v2254_v6 = vpack.c.bf16 %v6298_v40, %v6282_v60  ;;  %v2308_v25 = vrot.slane %v6298_v40, 1  ;;  %v3111_v30 = vrot.slane %v6298_v40, 4  ;;  %v2307_v58 = vsel %vm119_vm1, %v2305_v10, %v2306_v15  ;;  %v4558_v60 = vld [vmem:[%s6669_s3 + $0x200] ss:$8 sps:$4 sm:$0xff]  }
 0x328   :  { %v4666_v32 = vpop.eup %4665  ;;  %v2883_v15 = vrot.slane %v6257_v5, 3  ;;  %v2889_v55 = vrot.slane %v6298_v40, 3 }
 0x329   :  { %v6308_v12 = vmul.f32 %v4666_v32, %v6172_v31  ;;  %2636 = vmatmul.mubr.bf16.gmra.mxu0 %v2254_v6  ;;  %v2868_v31 = vrot.slane %v6077_v47, 3  ;;  %v4542_v47 = vld [vmem:[%s6669_s3 + $0x264] ss:$8 sps:$4 sm:$0xff]   ;;  %v2655_v32 = vrot.slane %v6181_v26, 2  ;;  %v2881_v6 = vrot.slane %v6247_v0, 3 }
 0x32a   :  { %3033 = vmatprep.mubr.bf16.mxu0 %v6739_v27  ;;  %v4543_v26 = vld [vmem:[%s6669_s3 + $0x250] ss:$8 sps:$4 sm:$0xff]   ;;  %v2885_v10 = vsel %vm1003_vm3, %v2883_v15, %v2884_v51 }
 0x32b   :  { %v2309_v50 = vrot.slane %v6308_v12, 1  ;;  %v3112_v36 = vrot.slane %v6308_v12, 4  ;;  %v2870_v14 = vsel %vm1003_vm3, %v2868_v31, %v2869_v42  ;;  %v2657_v7 = vsel %vm272_vm0, %v2655_v32, %v2656_v22 }
 0x32c   :  { %v2900_v17 = vpack.c.bf16 %v2873_v33, %v2870_v14  ;;  %v2654_v42 = vsel %vm272_vm0, %v2652_v57, %v2653_v28  ;;  %v2659_v31 = vrot.slane %v6247_v0, 2  ;;  %v2890_v33 = vrot.slane %v6308_v12, 3 }
 0x32d   :  { %v2310_v23 = vsel %vm119_vm1, %v2308_v25, %v2309_v50  ;;  %v6323_v35 = vsel %vm1362_vm4, %v3111_v30, %v3112_v36  ;;  %v2679_v50 = vpack.c.bf16 %v2657_v7, %v2654_v42  ;;  %v2662_v36 = vrot.slane %v6273_v13, 2  ;;  %v4551_v13 = vld [vmem:[%s6669_s3 + $0x234] ss:$8 sps:$4 sm:$0xff]  }
 0x32e   :  { %v2322_v16 = vpack.c.bf16 %v2310_v23, %v2307_v58  ;;  %v3125_v29 = vpack.c.bf16 %v6323_v35, %v6301_v56  ;;  %v2882_v25 = vsel %vm1003_vm3, %v2880_v8, %v2881_v6  ;;  %v4546_v58 = vld [vmem:[%s6669_s3 + $0x240] ss:$8 sps:$4 sm:$0xff]   ;;  %v2661_v23 = vrot.slane %v6257_v5, 2  ;;  %v4549_v5 = vld [vmem:[%s6669_s3 + $0x230] ss:$8 sps:$4 sm:$0xff]  }
 0x32f   :  { %v2902_v30 = vpack.c.bf16 %v2885_v10, %v2882_v25  ;;  %v2658_v0 = vrot.slane %v6244_v63, 2  ;;  %v2891_v2 = vsel %vm1003_vm3, %v2889_v55, %v2890_v33  ;;  %v4554_v63 = vld [vmem:[%s6669_s3 + $0x224] ss:$8 sps:$4 sm:$0xff]   ;;  %v2668_v44 = vrot.slane %v6308_v12, 2  ;;  %v4557_v12 = vld [vmem:[%s6669_s3 + $0x214] ss:$8 sps:$4 sm:$0xff]  }
 0x330   :  { %2483 = vmatmul.mubr.bf16.gmra.mxu1 %v2322_v16  ;;  %v2887_v16 = vrot.slane %v6290_v48, 3  ;;  %v2663_v14 = vsel %vm272_vm0, %v2661_v23, %v2662_v36  ;;  %v2666_v48 = vsel %vm272_vm0, %v2664_v1, %v2665_v45 }
 0x331   :  { %2811 = vmatprep.mubr.bf16.mxu1 %v6739_v27  ;;  %3034 = vmatmul.mubr.bf16.vlgmr.msra.gmra.mxu0 %v2900_v17  ;;  %v2660_v17 = vsel %vm272_vm0, %v2658_v0, %v2659_v31 }
 0x332   :  { %3043 = vmatprep.mubr.bf16.mxu0 %v6739_v27  ;;  %v2680_v39 = vpack.c.bf16 %v2663_v14, %v2660_v17  ;;  %v2888_v24 = vsel %vm1003_vm3, %v2886_v54, %v2887_v16 }
 0x333   :  { %v2903_v18 = vpack.c.bf16 %v2891_v2, %v2888_v24 }
 0x338   :  { %2812 = vmatmul.mubr.bf16.vlgmr.msra.gmra.mxu1 %v2678_v52  ;;  %v4555_v52 = vld [vmem:[%s6669_s3 + $0x210] ss:$8 sps:$4 sm:$0xff]  }
 0x339   :  { %3224 = vmatpush1.bf16.msra.mxu1 %v4537_v46  ;;  %2821 = vmatprep.mubr.bf16.mxu1 %v6739_v27  ;;  %v2667_v46 = vrot.slane %v6298_v40, 2  ;;  %v4560_v40 = vld [vmem:[%s6669_s3 + $0x204] ss:$8 sps:$4 sm:$0xff]  }
 0x33a   :  { %3044 = vmatmul.mubr.bf16.gmra.mxu0 %v2901_v11  ;;  %3225 = vmatprep.subr.bf16.mxu1 %v4542_v47 }
 0x33b   :  { %3053 = vmatprep.mubr.bf16.mxu0 %v6739_v27  ;;  %v2669_v43 = vsel %vm272_vm0, %v2667_v46, %v2668_v44 }
 0x33c   :  { %v2681_v47 = vpack.c.bf16 %v2669_v43, %v2666_v48 }
 0x33d   :  { %3226 = vmatpush1.bf16.msra.mxu1 %v4540_v9 }
 0x33e   :  { %3227 = vmatprep.subr.bf16.mxu1 %v4545_v34 }
 0x340   :  { %2822 = vmatmul.mubr.bf16.gmra.mxu1 %v2679_v50 }
 0x341   :  { %3228 = vmatpush1.bf16.msra.mxu1 %v4543_v26  ;;  %2831 = vmatprep.mubr.bf16.mxu1 %v6739_v27 }
 0x342   :  { %3054 = vmatmul.mubr.bf16.gmra.mxu0 %v2902_v30  ;;  %3229 = vmatprep.subr.bf16.mxu1 %v4548_v3 }
 0x343   :  { %3063 = vmatprep.mubr.bf16.mxu0 %v6739_v27 }
 0x345   :  { %3230 = vmatpush1.bf16.msra.mxu1 %v4546_v58 }
 0x346   :  { %3231 = vmatprep.subr.bf16.mxu1 %v4551_v13 }
 0x348   :  { %2832 = vmatmul.mubr.bf16.gmra.mxu1 %v2680_v39 }
 0x349   :  { %3232 = vmatpush1.bf16.msra.mxu1 %v4549_v5  ;;  %2841 = vmatprep.mubr.bf16.mxu1 %v6739_v27 }
 0x34a   :  { %3064 = vmatmul.mubr.bf16.gmra.mxu0 %v2903_v18  ;;  %3233 = vmatprep.subr.bf16.mxu1 %v4554_v63 }
 0x34d   :  { %3234 = vmatpush1.bf16.msra.mxu1 %v4552_v62 }
 0x34e   :  { %3235 = vmatprep.subr.bf16.mxu1 %v4557_v12 }
 0x350   :  { %2842 = vmatmul.mubr.bf16.gmra.mxu1 %v2681_v47 }
 0x351   :  { %3236 = vmatpush1.bf16.msra.mxu1 %v4555_v52  ;;  %3255 = vmatprep.mubr.bf16.mxu1 %v6739_v27 }
 0x352   :  { %3237 = vmatprep.subr.bf16.mxu1 %v4560_v40 }
 0x355   :  { %3238 = vmatpush1.bf16.msra.mxu1 %v4558_v60 }
 0x358   :  { %3256 = vmatmul.mubr.bf16.vlgmr.msra.gmra.mxu1 %v3122_v20 }
 0x359   :  { %3265 = vmatprep.mubr.bf16.mxu1 %v6739_v27 }
 0x360   :  { %3266 = vmatmul.mubr.bf16.gmra.mxu1 %v3123_v59 }
 0x361   :  { %3275 = vmatprep.mubr.bf16.mxu1 %v6739_v27 }
 0x368   :  { %3276 = vmatmul.mubr.bf16.gmra.mxu1 %v3124_v38 }
 0x369   :  { %3285 = vmatprep.mubr.bf16.mxu1 %v6739_v27  ;;  %v4561_v27 = vld [vmem:[%s6670_s6] sm:$0xff]  }
 0x36a   :  { %4359 = vmatprep.mubr.msk.bf16.mxu0 %vm1995_vm5, %v4561_v27 }
 0x370   :  { %3286 = vmatmul.mubr.bf16.gmra.mxu1 %v3125_v29 }
 0x3b9   :  { %v2607_v19 = vpop.f32.mrf.mxu0 }
 0x3bb   :  { %v2609_v53 = vpop.f32.mrf.mxu0 }
 0x3bd   :  { %v2611_v4 = vpop.f32.mrf.mxu0 }
 0x3bf   :  { %v2613_v28 = vpop.f32.mrf.mxu0 }
 0x3c0   :  { %v2454_v20 = vpop.f32.mrf.mxu1 }
 0x3c1   :  { %v2608_v22 = vadd.f32 %v2607_v19, %v2454_v20 }
 0x3c2   :  { %v2456_v11 = vpop.f32.mrf.mxu1 }
 0x3c3   :  { %v2610_v49 = vadd.f32 %v2609_v53, %v2456_v11 }
 0x3c4   :  { %v2458_v61 = vpop.f32.mrf.mxu1 }
 0x3c5   :  { %v2612_v59 = vadd.f32 %v2611_v4, %v2458_v61 }
 0x3c6   :  { %v2460_v51 = vpop.f32.mrf.mxu1 }
 0x3c7   :  { %v2614_v9 = vadd.f32 %v2613_v28, %v2460_v51 }
 0x3ca   :  { %v2617_v41 = vpop.f32.mrf.mxu0 }
 0x3cc   :  { %v2619_v37 = vpop.f32.mrf.mxu0 }
 0x3ce   :  { %v6441_v38 = vpop.f32.mrf.mxu0 }
 0x3d0   :  { %v6444_v35 = vpop.f32.mrf.mxu0 }
 0x3d1   :  { %v2464_v56 = vpop.f32.mrf.mxu1 }
 0x3d2   :  { %v2618_v61 = vadd.f32 %v2617_v41, %v2464_v56 }
 0x3d3   :  { %v2466_v29 = vpop.f32.mrf.mxu1 }
 0x3d5   :  { %v2468_v34 = vpop.f32.mrf.mxu1 }
 0x3d7   :  { %v2470_v57 = vpop.f32.mrf.mxu1 }
 0x3db   :  { %v6446_v32 = vpop.f32.mrf.mxu0 }
 0x3dd   :  { %v6448_v6 = vpop.f32.mrf.mxu0 }
 0x3df   :  { %v6450_v7 = vpop.f32.mrf.mxu0 }
 0x3e1   :  { %v6456_v26 = vpop.f32.mrf.mxu0 }
 0x3e2   :  { %v6452_v15 = vpop.f32.mrf.mxu1 }
 0x3e4   :  { %v6454_v42 = vpop.f32.mrf.mxu1 }
 0x3e6   :  { %v6458_v8 = vpop.f32.mrf.mxu1 }
 0x3e8   :  { %v6464_v3 = vpop.f32.mrf.mxu1 }
 0x3e9   :  { %v6460_v10 = vpop.f32.mrf.mxu0 }
 0x3eb   :  { %v6462_v50 = vpop.f32.mrf.mxu0 }
 0x3ed   :  { %v6466_v36 = vpop.f32.mrf.mxu0 }
 0x3ef   :  { %v6472_v31 = vpop.f32.mrf.mxu0 }
 0x3f0   :  { %v6468_v25 = vpop.f32.mrf.mxu1 }
 0x3f1   :  { %v3035_v23 = vpop.f32.mrf.mxu0 }
 0x3f2   :  { %v6470_v30 = vpop.f32.mrf.mxu1 }
 0x3f3   :  { %v3037_v55 = vpop.f32.mrf.mxu0 }
 0x3f4   :  { %v6474_v33 = vpop.f32.mrf.mxu1 }
 0x3f5   :  { %v3039_v39 = vpop.f32.mrf.mxu0 }
 0x3f6   :  { %v6476_v58 = vpop.f32.mrf.mxu1 }
 0x3f7   :  { %v3041_v24 = vpop.f32.mrf.mxu0 }
 0x3f8   :  { %v2813_v13 = vpop.f32.mrf.mxu1 }
 0x3f9   :  { %v2852_v16 = vadd.f32 %v2813_v13, %v2608_v22 }
 0x3fa   :  { %v2815_v0 = vpop.f32.mrf.mxu1  ;;  %v3045_v62 = vpop.f32.mrf.mxu0 }
 0x3fb   :  { %v2853_v14 = vadd.f32 %v2815_v0, %v2610_v49  ;;  %v3074_v4 = vadd.f32 %v3035_v23, %v2852_v16  ;;  %v6493_v23 = vld [vmem:[%s6671_s4] ss:$0 sm:$0xff] }
 0x3fc   :  { %v2817_v17 = vpop.f32.mrf.mxu1  ;;  %v3047_v1 = vpop.f32.mrf.mxu0 }
 0x3fd   :  { %v2854_v5 = vadd.f32 %v2817_v17, %v2612_v59  ;;  %v3075_v11 = vadd.f32 %v3037_v55, %v2853_v14  ;;  %v2620_v59 = vadd.f32 %v2619_v37, %v2466_v29 }
 0x3fe   :  { %v2819_v54 = vpop.f32.mrf.mxu1  ;;  %v3049_v52 = vpop.f32.mrf.mxu0 }
 0x3ff   :  { %v2855_v2 = vadd.f32 %v2819_v54, %v2614_v9  ;;  %v3076_v27 = vadd.f32 %v3039_v39, %v2854_v5 }
 0x400   :  { %v2823_v63 = vpop.f32.mrf.mxu1  ;;  %v3051_v60 = vpop.f32.mrf.mxu0 }
 0x401   :  { %v2856_v0 = vadd.f32 %v2823_v63, %v2618_v61  ;;  %v3077_v21 = vadd.f32 %v3041_v24, %v2855_v2 }
 0x402   :  { %v2825_v44 = vpop.f32.mrf.mxu1  ;;  %v3055_v20 = vpop.f32.mrf.mxu0 }
 0x403   :  { %v2857_v17 = vadd.f32 %v2825_v44, %v2620_v59  ;;  %v3078_v2 = vadd.f32 %v3045_v62, %v2856_v0 }
 0x404   :  { %v2827_v18 = vpop.f32.mrf.mxu1  ;;  %v3057_v9 = vpop.f32.mrf.mxu0 }
 0x405   :  { %v3079_v63 = vadd.f32 %v3047_v1, %v2857_v17 }
 0x406   :  { %v2829_v45 = vpop.f32.mrf.mxu1  ;;  %v3059_v16 = vpop.f32.mrf.mxu0 }
 0x408   :  { %v2833_v46 = vpop.f32.mrf.mxu1  ;;  %v3061_v24 = vpop.f32.mrf.mxu0 }
 0x40a   :  { %v2835_v12 = vpop.f32.mrf.mxu1 }
 0x40c   :  { %v2837_v43 = vpop.f32.mrf.mxu1 }
 0x40e   :  { %v6478_v48 = vpop.f32.mrf.mxu1 }
 0x410   :  { %v6480_v47 = vpop.f32.mrf.mxu1 }
 0x412   :  { %v6482_v40 = vpop.f32.mrf.mxu1 }
 0x414   :  { %v6484_v19 = vpop.f32.mrf.mxu1 }
 0x415   :  { %6748 = vst [vmem:[#allocation3_spill] sm:$0xff] %v6484_v19  ;;  %v2622_v19 = vadd.f32 %v6441_v38, %v2468_v34  ;;  %v2628_v38 = vadd.f32 %v6446_v32, %v6452_v15  ;;  %v2630_v34 = vadd.f32 %v6448_v6, %v6454_v42  ;;  %v2632_v32 = vadd.f32 %v6450_v7, %v6458_v8 }
 0x416   :  { %v6486_v53 = vpop.f32.mrf.mxu1  ;;  %v2634_v15 = vadd.f32 %v6456_v26, %v6464_v3  ;;  %v2638_v26 = vadd.f32 %v6460_v10, %v6468_v25  ;;  %v2640_v8 = vadd.f32 %v6462_v50, %v6470_v30  ;;  %v2642_v50 = vadd.f32 %v6466_v36, %v6474_v33 }
 0x417   :  { %6749 = vst [vmem:[#allocation4_spill] sm:$0xff] %v6486_v53  ;;  %v2624_v53 = vadd.f32 %v6444_v35, %v2470_v57  ;;  %v2858_v29 = vadd.f32 %v2827_v18, %v2622_v19  ;;  %v2860_v18 = vadd.f32 %v2833_v46, %v2628_v38  ;;  %v2862_v61 = vadd.f32 %v2837_v43, %v2632_v32 }
 0x418   :  { %v3257_v22 = vpop.f32.mrf.mxu1  ;;  %v2644_v30 = vadd.f32 %v6472_v31, %v6476_v58 }
 0x419   :  { %v3296_v28 = vadd.f32 %v3257_v22, %v3074_v4  ;;  %v2859_v14 = vadd.f32 %v2829_v45, %v2624_v53  ;;  %v3080_v45 = vadd.f32 %v3049_v52, %v2858_v29  ;;  %v2861_v22 = vadd.f32 %v2835_v12, %v2630_v34  ;;  %v3065_v52 = vpop.f32.mrf.mxu0 }
 0x41a   :  { %v3259_v49 = vpop.f32.mrf.mxu1 }
 0x41b   :  { %v3297_v51 = vadd.f32 %v3259_v49, %v3075_v11  ;;  %v3081_v53 = vadd.f32 %v3051_v60, %v2859_v14  ;;  %v3082_v60 = vadd.f32 %v3055_v20, %v2860_v18  ;;  %v3083_v7 = vadd.f32 %v3057_v9, %v2861_v22  ;;  %v3067_v20 = vpop.f32.mrf.mxu0 }
 0x41c   :  { %v3261_v13 = vpop.f32.mrf.mxu1  ;;  %v2865_v9 = vadd.f32 %v6482_v40, %v2640_v8 }
 0x41d   :  { %v3312_v54 = vmax.f32 %v3296_v28, %v3297_v51  ;;  %v3298_v37 = vadd.f32 %v3261_v13, %v3076_v27  ;;  %v2863_v28 = vadd.f32 %v6478_v48, %v2634_v15  ;;  %v3084_v48 = vadd.f32 %v3059_v16, %v2862_v61 }
 0x41e   :  { %v3263_v41 = vpop.f32.mrf.mxu1  ;;  %v6751_v34 = vld [vmem:[#allocation4_spill] sm:$0xff] }
 0x41f   :  { %v3299_v56 = vadd.f32 %v3263_v41, %v3077_v21  ;;  %v3327_v5 = vadd.f32 %v6493_v23, %v3312_v54  ;;  %v2864_v54 = vadd.f32 %v6480_v47, %v2638_v26  ;;  %v3085_v25 = vadd.f32 %v3061_v24, %v2863_v28 }
 0x420   :  { %v3267_v55 = vpop.f32.mrf.mxu1 }
 0x421   :  { %v3313_v39 = vmax.f32 %v3298_v37, %v3299_v56  ;;  %v3300_v44 = vadd.f32 %v3267_v55, %v3078_v2  ;;  %v3343_v4 = vrot.slane %v3327_v5, 1  ;;  %v6750_v2 = vld [vmem:[#allocation3_spill] sm:$0xff] }
 0x422   :  { %v3269_v35 = vpop.f32.mrf.mxu1  ;;  %v2866_v40 = vadd.f32 %v6750_v2, %v2642_v50  ;;  %v4575_v50 = vld [vmem:[%s6672_s7 + $0x60] sm:$0xff]   ;;  %v4585_v2 = vld [vmem:[%s6672_s7 + $0xd0] sm:$0xff]  }
 0x423   :  { %v3328_v57 = vadd.f32 %v6493_v23, %v3313_v39  ;;  %v3301_v21 = vadd.f32 %v3269_v35, %v3079_v63  ;;  %v3069_v39 = vpop.f32.mrf.mxu0  ;;  %v3086_v63 = vadd.f32 %v3065_v52, %v2864_v54  ;;  %v4567_v54 = vld [vmem:[%s6672_s7 + $0x70] sm:$0xff]  }
 0x424   :  { %v3271_v19 = vpop.f32.mrf.mxu1 }
 0x425   :  { %v3344_v62 = vrot.slane %v3328_v57, 1  ;;  %v3314_v1 = vmax.f32 %v3300_v44, %v3301_v21  ;;  %v3302_v11 = vadd.f32 %v3271_v19, %v3080_v45  ;;  %v3087_v44 = vadd.f32 %v3067_v20, %v2865_v9  ;;  %v3071_v45 = vpop.f32.mrf.mxu0  ;;  %v4566_v20 = vld [vmem:[%s6672_s7 + $0xb8] sm:$0xff]   ;;  %v4571_v9 = vld [vmem:[%s6672_s7 + $0x68] sm:$0xff]  }
 0x426   :  { %v3273_v6 = vpop.f32.mrf.mxu1 }
 0x427   :  { %v3329_v42 = vadd.f32 %v6493_v23, %v3314_v1  ;;  %v3303_v49 = vadd.f32 %v3273_v6, %v3081_v53  ;;  %v3345_v46 = vsel %vm119_vm1, %v3343_v4, %v3344_v62 }
 0x428   :  { %v3277_v12 = vpop.f32.mrf.mxu1  ;;  %v3366_v59 = vmax.f32 %v3327_v5, %v3345_v46 }
 0x429   :  { %v3346_v51 = vrot.slane %v3329_v42, 1  ;;  %v3315_v27 = vmax.f32 %v3302_v11, %v3303_v49  ;;  %v3304_v0 = vadd.f32 %v3277_v12, %v3082_v60 }
 0x42a   :  { %v3279_v3 = vpop.f32.mrf.mxu1 }
 0x42b   :  { %v3330_v13 = vadd.f32 %v6493_v23, %v3315_v27  ;;  %v3305_v17 = vadd.f32 %v3279_v3, %v3083_v7  ;;  %v3347_v43 = vsel %vm119_vm1, %v3344_v62, %v3346_v51  ;;  %v3088_v62 = vadd.f32 %v3069_v39, %v2866_v40  ;;  %v6752_v3 = vld [vmem:[#allocation2_spill] sm:$0xff]  ;;  %v4583_v39 = vld [vmem:[%s6672_s7 + $0x50] sm:$0xff]  }
 0x42c   :  { %v3281_v41 = vpop.f32.mrf.mxu1  ;;  %v3367_v37 = vmax.f32 %v3328_v57, %v3347_v43  ;;  %v2867_v57 = vadd.f32 %v6751_v34, %v2644_v30  ;;  %v4564_v43 = vld [vmem:[%s6672_s7 + $0x38] sm:$0xff]   ;;  %v4577_v30 = vld [vmem:[%s6672_s7 + $0xe0] sm:$0xff]   ;;  %v4584_v40 = vld [vmem:[%s6672_s7 + $0x10] sm:$0xff]  }
 0x42d   :  { %v3348_v56 = vrot.slane %v3330_v13, 1  ;;  %v3316_v10 = vmax.f32 %v3304_v0, %v3305_v17  ;;  %v3306_v5 = vadd.f32 %v3281_v41, %v3084_v48  ;;  %v4563_v0 = vld [vmem:[%s6672_s7 + $0x78] sm:$0xff]   ;;  %v4569_v48 = vld [vmem:[%s6672_s7 + $0xf0] sm:$0xff]   ;;  %v4588_v34 = vld [vmem:[%s6672_s7 + $0x8] sm:$0xff]  }
 0x42e   :  { %v3283_v29 = vpop.f32.mrf.mxu1  ;;  %v3378_v14 = vpack.c.bf16 %v3367_v37, %v3366_v59  ;;  %v3089_v1 = vadd.f32 %v3071_v45, %v2867_v57  ;;  %v4565_v17 = vld [vmem:[%s6672_s7 + $0xf8] sm:$0xff]   ;;  %4298 = vmatprep.subr.bf16.mxu1 %v4563_v0  ;;  %v4568_v41 = vld [vmem:[%s6672_s7 + $0x30] sm:$0xff]   ;;  %v4590_v57 = vld [vmem:[%s6672_s7 + $0x88] sm:$0xff]  }
 0x42f   :  { %v3331_v55 = vadd.f32 %v6493_v23, %v3316_v10  ;;  %v3307_v47 = vadd.f32 %v3283_v29, %v3085_v25  ;;  %v3349_v16 = vsel %vm119_vm1, %v3346_v51, %v3348_v56  ;;  %4299 = vmatpush3.bf16.msra.mxu1 %v4564_v43  ;;  %v4570_v37 = vld [vmem:[%s6672_s7 + $0xb0] sm:$0xff]   ;;  %v4572_v10 = vld [vmem:[%s6672_s7 + $0x28] sm:$0xff]   ;;  %v4576_v29 = vld [vmem:[%s6672_s7 + $0x20] sm:$0xff]  }
 0x430   :  { %v3287_v38 = vpop.f32.mrf.mxu1  ;;  %v3368_v35 = vmax.f32 %v3329_v42, %v3349_v16  ;;  %4300 = vmatprep.subr.bf16.mxu1 %v4567_v54  ;;  %v4574_v25 = vld [vmem:[%s6672_s7 + $0xa8] sm:$0xff]   ;;  %v4582_v16 = vld [vmem:[%s6672_s7 + $0x98] sm:$0xff]   ;;  %v4596_v43 = vld [vmem:[%s6673_s9 + $0x30] sm:$0xff]  }
 0x431   :  { %v3350_v36 = vrot.slane %v3331_v55, 1  ;;  %v3317_v33 = vmax.f32 %v3306_v5, %v3307_v47  ;;  %v3308_v21 = vadd.f32 %v3287_v38, %v3086_v63  ;;  %v4581_v5 = vld [vmem:[%s6672_s7 + $0xd8] sm:$0xff]   ;;  %v4586_v63 = vld [vmem:[%s6672_s7 + $0x90] sm:$0xff]   ;;  %v4587_v38 = vld [vmem:[%s6672_s7 + $0x48] sm:$0xff]  }
 0x432   :  { %v3289_v31 = vpop.f32.mrf.mxu1  ;;  %v4580_v47 = vld [vmem:[%s6672_s7 + $0x18] sm:$0xff]   ;;  %v4598_v54 = vld [vmem:[%s6673_s9 + $0x20] sm:$0xff]  }
 0x433   :  { %v3332_v58 = vadd.f32 %v6493_v23, %v3317_v33  ;;  %v3309_v24 = vadd.f32 %v3289_v31, %v3087_v44  ;;  %v3351_v18 = vsel %vm119_vm1, %v3348_v56, %v3350_v36  ;;  %4301 = vmatpush3.bf16.msra.mxu1 %v4568_v41  ;;  %v4573_v56 = vld [vmem:[%s6672_s7 + $0xe8] sm:$0xff]   ;;  %v4592_v33 = vld [vmem:[%s6672_s7] sm:$0xff]   ;;  %v4595_v0 = vld [vmem:[%s6673_s9 + $0x38] sm:$0xff]  }
 0x434   :  { %v3291_v19 = vpop.f32.mrf.mxu1  ;;  %v3369_v53 = vmax.f32 %v3330_v13, %v3351_v18  ;;  %4302 = vmatprep.subr.bf16.mxu1 %v4571_v9  ;;  %v4593_v44 = vld [vmem:[%s6672_s7 + $0xc0] sm:$0xff]   ;;  %v4600_v41 = vld [vmem:[%s6673_s9 + $0x10] sm:$0xff]  }
 0x435   :  { %v3352_v22 = vrot.slane %v3332_v58, 1  ;;  %v3318_v4 = vmax.f32 %v3308_v21, %v3309_v24  ;;  %v3310_v42 = vadd.f32 %v3291_v19, %v3088_v62  ;;  %v4594_v31 = vld [vmem:[%s6672_s7 + $0x80] sm:$0xff]  }
 0x436   :  { %v3293_v32 = vpop.f32.mrf.mxu1  ;;  %v3379_v15 = vpack.c.bf16 %v3369_v53, %v3368_v35  ;;  %v4589_v35 = vld [vmem:[%s6672_s7 + $0xc8] sm:$0xff]   ;;  %v4602_v9 = vld [vmem:[%s6673_s9] sm:$0xff]  }
 0x437   :  { %v3333_v6 = vadd.f32 %v6493_v23, %v3318_v4  ;;  %v3311_v11 = vadd.f32 %v3293_v32, %v3089_v1  ;;  %v3353_v49 = vsel %vm119_vm1, %v3350_v36, %v3352_v22  ;;  %4303 = vmatpush3.bf16.msra.mxu1 %v4572_v10  ;;  %v4591_v36 = vld [vmem:[%s6672_s7 + $0x40] sm:$0xff]  }
 0x438   :  { %v3370_v46 = vmax.f32 %v3331_v55, %v3353_v49  ;;  %4304 = vmatprep.subr.bf16.mxu1 %v4575_v50  ;;  %v4579_v55 = vld [vmem:[%s6672_s7 + $0x58] sm:$0xff]   ;;  %v4249_v50 = vld [vmem:[%s6674_s8] ss:$0 sm:$0xff] }
 0x439   :  { %v3354_v52 = vrot.slane %v3333_v6, 1  ;;  %v3319_v61 = vmax.f32 %v3310_v42, %v3311_v11 }
 0x43b   :  { %v3334_v60 = vadd.f32 %v6493_v23, %v3319_v61  ;;  %v3355_v12 = vsel %vm119_vm1, %v3352_v22, %v3354_v52  ;;  %v4562_v23 = vld [vmem:[%s6670_s6 + $0x8] sm:$0xff]   ;;  %4305 = vmatpush3.bf16.msra.mxu1 %v4576_v29 }
 0x43c   :  { %v3371_v59 = vmax.f32 %v3332_v58, %v3355_v12  ;;  %4306 = vmatprep.subr.bf16.mxu1 %v4579_v55 }
 0x43d   :  { %v3356_v28 = vrot.slane %v3334_v60, 1 }
 0x43e   :  { %v3380_v51 = vpack.c.bf16 %v3371_v59, %v3370_v46 }
 0x43f   :  { %v3373_v27 = vmax.f32 %v3334_v60, %v3356_v28  ;;  %v3357_v7 = vsel %vm119_vm1, %v3354_v52, %v3356_v28  ;;  %4307 = vmatpush3.bf16.msra.mxu1 %v4580_v47 }
 0x440   :  { %v3372_v26 = vmax.f32 %v3333_v6, %v3357_v7  ;;  %4308 = vmatprep.subr.bf16.mxu1 %v4583_v39 }
 0x442   :  { %v3381_v8 = vpack.c.bf16 %v3373_v27, %v3372_v26 }
 0x443   :  { %4309 = vmatpush3.bf16.msra.mxu1 %v4584_v40 }
 0x444   :  { %v3399_v13 = vand.u32 %v3381_v8, %v6752_v3  ;;  %4310 = vmatprep.subr.bf16.mxu1 %v4587_v38 }
 0x446   :  { %4351 = vmatprep.subr.bf16.mxu0 %v3399_v13 }
 0x447   :  { %4352 = vmatpush3.bf16.msra.mxu0 %v3399_v13  ;;  %4311 = vmatpush3.bf16.msra.mxu1 %v4588_v34 }
 0x448   :  { %4353 = vmatprep.subr.bf16.mxu0 %v3380_v51  ;;  %4312 = vmatprep.subr.bf16.mxu1 %v4591_v36 }
 0x44b   :  { %4354 = vmatpush3.bf16.msra.mxu0 %v3380_v51  ;;  %4313 = vmatpush3.bf16.msra.mxu1 %v4592_v33  ;;  %v4283_v33 = vld [vmem:[%s6675_s10] ss:$0 sm:$0xff] }
 0x44c   :  { %4355 = vmatprep.subr.bf16.mxu0 %v3379_v15 }
 0x44f   :  { %4356 = vmatpush3.bf16.msra.mxu0 %v3379_v15 }
 0x450   :  { %4357 = vmatprep.subr.bf16.mxu0 %v3378_v14 }
 0x453   :  { %4358 = vmatpush3.bf16.msra.mxu0 %v3378_v14  ;;  %v4578_v14 = vld [vmem:[%s6672_s7 + $0xa0] sm:$0xff]  }
 0x454   :  { %4320 = vmatprep.subr.bf16.mxu0 %v4565_v17  ;;  %v4689_v17 = vmov 0.0  }
 0x455   :  { %4363 = vmatprep.subr.bf16.mxu1 %v4689_v17 }
 0x456   :  { %4360 = vmatmul.mubr.msk.bf16.vlgmr.msra.gmra.mxu0 %vm1995_vm5, %v4562_v23 }
 0x457   :  { %4321 = vmatpush3.bf16.msra.mxu0 %v4566_v20  ;;  %v4597_v20 = vld [vmem:[%s6673_s9 + $0x28] sm:$0xff]  }
 0x458   :  { %4322 = vmatprep.subr.bf16.mxu0 %v4569_v48  ;;  %v4599_v48 = vld [vmem:[%s6673_s9 + $0x18] sm:$0xff]  }
 0x45b   :  { %4323 = vmatpush3.bf16.msra.mxu0 %v4570_v37  ;;  %v4601_v37 = vld [vmem:[%s6673_s9 + $0x8] sm:$0xff]  }
 0x45c   :  { %4324 = vmatprep.subr.bf16.mxu0 %v4573_v56 }
 0x45f   :  { %4325 = vmatpush3.bf16.msra.mxu0 %v4574_v25 }
 0x460   :  { %4326 = vmatprep.subr.bf16.mxu0 %v4577_v30 }
 0x463   :  { %4327 = vmatpush3.bf16.msra.mxu0 %v4578_v14 }
 0x464   :  { %4328 = vmatprep.subr.bf16.mxu0 %v4581_v5 }
 0x467   :  { %4329 = vmatpush3.bf16.msra.mxu0 %v4582_v16 }
 0x468   :  { %4330 = vmatprep.subr.bf16.mxu0 %v4585_v2 }
 0x46b   :  { %4331 = vmatpush3.bf16.msra.mxu0 %v4586_v63 }
 0x46c   :  { %4332 = vmatprep.subr.bf16.mxu0 %v4589_v35 }
 0x46f   :  { %4333 = vmatpush3.bf16.msra.mxu0 %v4590_v57 }
 0x470   :  { %4334 = vmatprep.subr.bf16.mxu0 %v4593_v44 }
 0x473   :  { %4335 = vmatpush3.bf16.msra.mxu0 %v4594_v31 }
 0x516   :  { %v4361_v58 = vpop.f32.mrf.mxu0 }
 0x517   :  { %v4247_v21 = vmul.f32 -1.702, %v4361_v58 }
 0x518   :  { %v3435_v24 = vpop.f32.mrf.mxu0 }
 0x519   :  { %v3462_v18 = vmul.f32 1.442695, %v4247_v21  ;;  %v4245_v45 = vmul.f32 -1.702, %v3435_v24 }
 0x51a   :  { %v4362_v19 = vpop.f32.mrf.mxu0 }
 0x51b   :  { %4667 = vpow2.f32 %v3462_v18  ;;  %v3458_v53 = vmul.f32 1.442695, %v4245_v45  ;;  %v4248_v22 = vmul.f32 -1.702, %v4362_v19 }
 0x51c   :  { %v3438_v4 = vpop.f32.mrf.mxu0 }
 0x51d   :  { %4669 = vpow2.f32 %v3458_v53  ;;  %v3464_v62 = vmul.f32 1.442695, %v4248_v22  ;;  %v4246_v1 = vmul.f32 -1.702, %v3438_v4 }
 0x51f   :  { %4671 = vpow2.f32 %v3464_v62  ;;  %v3460_v32 = vmul.f32 1.442695, %v4246_v1 }
 0x521   :  { %4673 = vpow2.f32 %v3460_v32 }
 0x528   :  { %v4668_v15 = vpop.eup %4667 }
 0x529   :  { %v3468_v6 = vadd.f32 1.0, %v4668_v15 }
 0x52a   :  { %v4670_v42 = vpop.eup %4669 }
 0x52b   :  { %v3466_v11 = vadd.f32 1.0, %v4670_v42  ;;  %4675 = vrcp.f32 %v3468_v6 }
 0x52c   :  { %v4672_v49 = vpop.eup %4671 }
 0x52d   :  { %v3469_v46 = vadd.f32 1.0, %v4672_v49  ;;  %4677 = vrcp.f32 %v3466_v11 }
 0x52e   :  { %v4674_v52 = vpop.eup %4673 }
 0x52f   :  { %4679 = vrcp.f32 %v3469_v46  ;;  %v3467_v61 = vadd.f32 1.0, %v4674_v52 }
 0x531   :  { %4681 = vrcp.f32 %v3467_v61 }
 0x538   :  { %v4676_v60 = vpop.eup %4675 }
 0x539   :  { %v3480_v28 = vmul.f32 %v4676_v60, %v4361_v58 }
 0x53a   :  { %v4678_v12 = vpop.eup %4677 }
 0x53b   :  { %v3478_v7 = vmul.f32 %v4678_v12, %v3435_v24  ;;  %v3484_v3 = vpack.c.bf16 %v3480_v28, %v3480_v28 }
 0x53c   :  { %v4680_v59 = vpop.eup %4679 }
 0x53d   :  { %v3481_v51 = vmul.f32 %v4680_v59, %v4362_v19  ;;  %v3482_v23 = vpack.c.bf16 %v3478_v7, %v3478_v7 }
 0x53e   :  { %v4682_v27 = vpop.eup %4681 }
 0x53f   :  { %v3485_v26 = vpack.c.bf16 %v3481_v51, %v3481_v51  ;;  %v3479_v8 = vmul.f32 %v4682_v27, %v3438_v4 }
 0x541   :  { %v3483_v13 = vpack.c.bf16 %v3479_v8, %v3479_v8  ;;  %3821 = vmatprep.mubr.bf16.mxu0 %v3485_v26 }
 0x542   :  { %3822 = vmatmul.mubr.bf16.vlgmr.msra.gmra.mxu0 %v3484_v3 }
 0x543   :  { %3781 = vmatprep.mubr.bf16.mxu1 %v3483_v13 }
 0x544   :  { %3782 = vmatmul.mubr.bf16.vlgmr.msra.gmra.mxu1 %v3482_v23 }
 0x545   :  { %4364 = vmatpush3.bf16.msra.mxu1 %v4595_v0  ;;  %4379 = vmatprep.mubr.msk.bf16.mxu1 %vm4690_vm7, %v4689_v17 }
 0x546   :  { %4365 = vmatprep.subr.bf16.mxu1 %v4689_v17 }
 0x549   :  { %4366 = vmatpush3.bf16.msra.mxu1 %v4596_v43 }
 0x54a   :  { %4367 = vmatprep.subr.bf16.mxu1 %v4689_v17 }
 0x54d   :  { %4368 = vmatpush3.bf16.msra.mxu1 %v4597_v20 }
 0x54e   :  { %4369 = vmatprep.subr.bf16.mxu1 %v4689_v17 }
 0x551   :  { %4370 = vmatpush3.bf16.msra.mxu1 %v4598_v54 }
 0x552   :  { %4371 = vmatprep.subr.bf16.mxu1 %v4689_v17 }
 0x555   :  { %4372 = vmatpush3.bf16.msra.mxu1 %v4599_v48 }
 0x556   :  { %4373 = vmatprep.subr.bf16.mxu1 %v4689_v17 }
 0x559   :  { %4374 = vmatpush3.bf16.msra.mxu1 %v4600_v41 }
 0x55a   :  { %4375 = vmatprep.subr.bf16.mxu1 %v4689_v17 }
 0x55d   :  { %4376 = vmatpush3.bf16.msra.mxu1 %v4601_v37 }
 0x55e   :  { %4377 = vmatprep.subr.bf16.mxu1 %v4689_v17 }
 0x561   :  { %4378 = vmatpush3.bf16.msra.mxu1 %v4602_v9 }
 0x602   :  { %v4336_v56 = vpop.f32.mrf.mxu0 }
 0x604   :  { %v4314_v10 = vpop.f32.mrf.mxu1  ;;  %v4337_v25 = vpop.f32.mrf.mxu0 }
 0x605   :  { %v4338_v16 = vadd.f32 %v4337_v25, %v4336_v56 }
 0x606   :  { %v4315_v30 = vpop.f32.mrf.mxu1  ;;  %v4339_v29 = vpop.f32.mrf.mxu0 }
 0x607   :  { %v4316_v14 = vadd.f32 %v4315_v30, %v4314_v10 }
 0x608   :  { %v4317_v55 = vpop.f32.mrf.mxu1  ;;  %v4340_v5 = vpop.f32.mrf.mxu0 }
 0x609   :  { %v3784_v47 = vadd.f32 %v4316_v14, %v4249_v50 }
 0x60a   :  { %v4318_v39 = vpop.f32.mrf.mxu1 }
 0x60b   :  { %v3824_v2 = vadd.f32 %v4338_v16, %v3784_v47 }
 0x60d   :  { %v4282_v40 = vmul.f32 -1.702, %v3824_v2 }
 0x60f   :  { %v3831_v63 = vmul.f32 1.442695, %v4282_v40 }
 0x611   :  { %4683 = vpow2.f32 %v3831_v63 }
 0x61e   :  { %v4684_v38 = vpop.eup %4683 }
 0x61f   :  { %v3833_v35 = vadd.f32 1.0, %v4684_v38 }
 0x621   :  { %4685 = vrcp.f32 %v3833_v35 }
 0x62e   :  { %v4686_v34 = vpop.eup %4685 }
 0x62f   :  { %v3836_v57 = vmul.f32 %v4686_v34, %v3824_v2 }
 0x631   :  { %v3837_v36 = vpack.c.bf16 %v3836_v57, %v3836_v57 }
 0x633   :  { %4380 = vmatmul.mubr.bf16.vlgmr.msra.gmra.mxu1 %v3837_v36 }
 0x6f3   :  { %v3943_v44 = vpop.f32.mrf.mxu1 }
 0x6f4   :  { %v3944_v31 = vadd.f32 %v4283_v33, %v3943_v44 }
 0x6f5   :  { %v4381_v58 = vpop.f32.mrf.mxu1 }
 0x6f6   :  { %3949 = vst [vmem:[%s6676_s11] sm:$0xff] %v3944_v31 }
 0x6f7   :  { %v3946_v21 = vpop.f32.mrf.mxu1 }
 0x6f9   :  { %v4382_v24 = vpop.f32.mrf.mxu1 }

</bundles_post_ra>
